<compile_context>
chip_gen: v7x
topology: tpu7x:2x2x1
jax: 0.10.0
libtpu: 0.0.40
codegen_flags: <defaults>
</compile_context>

<pallas_src>
import functools

import jax
import jax.numpy as jnp
from jax.experimental import pallas as pl
from jax.experimental.pallas import tpu as pltpu

EPS = 1e-5                # nn.BatchNorm2d default eps
CPAD = 128                # lane-dense padded channel count for all layers
TILE_M = 256              # M tile, used only when a layer has >= 2 such tiles
ACT_DTYPE = jnp.bfloat16  # inter-layer activation / matmul-input dtype


# ---------------------------------------------------------------------------
# Pallas kernels
# ---------------------------------------------------------------------------
def _gemm_bn_kernel(*refs, apply_relu, has_residual):
    """o = maybe_relu(x @ w_folded + shift [+ res]); epilogue in f32."""
    if has_residual:
        x_ref, w_ref, shift_ref, res_ref, o_ref = refs
    else:
        x_ref, w_ref, shift_ref, o_ref = refs
        res_ref = None
    acc = jnp.dot(x_ref[...], w_ref[...], preferred_element_type=jnp.float32)
    out = acc + shift_ref[...]
    if res_ref is not None:
        out = out + res_ref[...].astype(jnp.float32)
    if apply_relu:
        out = jnp.maximum(out, 0.0)
    o_ref[...] = out.astype(o_ref.dtype)


def _dual_gemm_kernel(x_ref, w1_ref, s1_ref, wsc_ref, ssc_ref, h_ref, sc_ref,
                      *, center_col, c):
    """Fused ResBlock front: conv1 3x3 (BN+ReLU) and 1x1 shortcut (BN, no ReLU).

    Both share one im2col LHS; the stride-matched 1x1 shortcut is exactly the
    center-tap column block of the 3x3 patches, so it reuses the same VMEM
    tile instead of a second im2col / pallas_call."""
    acc1 = jnp.dot(x_ref[...], w1_ref[...], preferred_element_type=jnp.float32)
    h = jnp.maximum(acc1 + s1_ref[...], 0.0)
    acc_sc = jnp.dot(x_ref[:, center_col:center_col + c], wsc_ref[...],
                     preferred_element_type=jnp.float32)
    sc = acc_sc + ssc_ref[...]
    h_ref[...] = h.astype(h_ref.dtype)
    sc_ref[...] = sc.astype(sc_ref.dtype)


def _gemm_res_pool_fc_kernel(x_ref, w_ref, shift_ref, res_ref, wfc_ref,
                             bfc_ref, o_ref, *, n, ohw):
    """Fused final conv (+residual, ReLU) + global max-pool + Linear."""
    acc = jnp.dot(x_ref[...], w_ref[...], preferred_element_type=jnp.float32)
    out = jnp.maximum(acc + shift_ref[...] + res_ref[...].astype(jnp.float32),
                      0.0)
    # AdaptiveMaxPool2d(1): max over the ohw spatial rows of each batch item.
    pooled = jnp.concatenate(
        [jnp.max(out[b * ohw:(b + 1) * ohw, :], axis=0, keepdims=True)
         for b in range(n)], axis=0)                               # (n, C)
    logits = jnp.dot(pooled, wfc_ref[...],
                     preferred_element_type=jnp.float32) + bfc_ref[...]
    o_ref[...] = logits.astype(o_ref.dtype)


# ---------------------------------------------------------------------------
# Wrappers (im2col, BN folding, pallas_call plumbing)
# ---------------------------------------------------------------------------
def im2col(x_nhwc, kh, kw, stride, pad):
    N, H, W, C = x_nhwc.shape
    if pad:
        x_nhwc = jnp.pad(x_nhwc, ((0, 0), (pad, pad), (pad, pad), (0, 0)))
    Hp, Wp = H + 2 * pad, W + 2 * pad
    OH = (Hp - kh) // stride + 1
    OW = (Wp - kw) // stride + 1
    cols = []
    for dh in range(kh):
        for dw in range(kw):
            cols.append(x_nhwc[:, dh:dh + stride * (OH - 1) + 1:stride,
                                  dw:dw + stride * (OW - 1) + 1:stride, :])
    patches = jnp.concatenate(cols, axis=-1)        # (N, OH, OW, kh*kw*C)
    return patches.reshape(N * OH * OW, kh * kw * C), (N, OH, OW)


def fold_conv_bn(p, cin_pad, cout_pad):
    """Fold BN(eval) into the conv weight (scale) and a per-channel shift."""
    w = p["w"]                                      # PyTorch (Cout,Cin,kh,kw)
    cout, cin, kh, kw = w.shape
    scale = p["gamma"] / jnp.sqrt(p["var"] + EPS)
    shift = (p["b"] - p["mean"]) * scale + p["beta"]
    w_mat = jnp.transpose(w, (2, 3, 1, 0)) * scale  # (kh,kw,Cin,Cout), folded
    w_mat = jnp.pad(w_mat, ((0, 0), (0, 0),
                            (0, cin_pad - cin), (0, cout_pad - cout)))
    w_mat = w_mat.reshape(kh * kw * cin_pad, cout_pad).astype(ACT_DTYPE)
    shift = jnp.pad(shift, (0, cout_pad - cout)).reshape(1, cout_pad)
    return w_mat, shift.astype(jnp.float32)


def gemm_bn(cols, w_mat, shift, residual=None, apply_relu=True):
    M, K = cols.shape
    Cout = w_mat.shape[1]
    has_res = residual is not None
    kernel = functools.partial(_gemm_bn_kernel, apply_relu=apply_relu,
                               has_residual=has_res)
    args = (cols, w_mat, shift) + ((residual,) if has_res else ())
    out_shape = jax.ShapeDtypeStruct((M, Cout), ACT_DTYPE)

    if M % TILE_M == 0 and M >= 2 * TILE_M:
        # Only the stem is big enough to split; "parallel" lets both v7x
        # TensorCores work on it.
        in_specs = [
            pl.BlockSpec((TILE_M, K), lambda i: (i, 0)),
            pl.BlockSpec((K, Cout), lambda i: (0, 0)),
            pl.BlockSpec((1, Cout), lambda i: (0, 0)),
        ]
        if has_res:
            in_specs.append(pl.BlockSpec((TILE_M, Cout), lambda i: (i, 0)))
        return pl.pallas_call(
            kernel,
            out_shape=out_shape,
            grid_spec=pltpu.PrefetchScalarGridSpec(
                num_scalar_prefetch=0,
                grid=(M // TILE_M,),
                in_specs=in_specs,
                out_specs=pl.BlockSpec((TILE_M, Cout), lambda i: (i, 0))),
            compiler_params=pltpu.CompilerParams(
                dimension_semantics=("parallel",)),
        )(*args)

    # Single-step layer: whole arrays as one block (no M padding / slicing).
    return pl.pallas_call(kernel, out_shape=out_shape)(*args)


# ---------------------------------------------------------------------------
# Model
# ---------------------------------------------------------------------------
def stem(x_nhwc, p):
    # Conv2d(3,16,k3,s3,p0) + BN + ReLU; output channels padded to CPAD.
    cols, (N, OH, OW) = im2col(x_nhwc, 3, 3, stride=3, pad=0)
    w_mat, shift = fold_conv_bn(p, cin_pad=x_nhwc.shape[-1], cout_pad=CPAD)
    out = gemm_bn(cols, w_mat, shift, apply_relu=True)
    return out.reshape(N, OH, OW, CPAD)


def block_front(x_nhwc, p, stride):
    """conv1 3x3(s, p=1)+BN+ReLU and shortcut 1x1(s)+BN, fused in one kernel."""
    C = x_nhwc.shape[-1]                            # == CPAD
    cols, (N, OH, OW) = im2col(x_nhwc, 3, 3, stride=stride, pad=1)
    w1, s1 = fold_conv_bn(p["conv1"], cin_pad=C, cout_pad=CPAD)
    wsc, ssc = fold_conv_bn(p["short"], cin_pad=C, cout_pad=CPAD)
    M = cols.shape[0]
    h, sc = pl.pallas_call(
        functools.partial(_dual_gemm_kernel, center_col=4 * C, c=C),
        out_shape=(jax.ShapeDtypeStruct((M, CPAD), ACT_DTYPE),
                   jax.ShapeDtypeStruct((M, CPAD), ACT_DTYPE)),
    )(cols, w1, s1, wsc, ssc)
    return h.reshape(N, OH, OW, CPAD), sc, (N, OH, OW)


def res_block(x_nhwc, p, stride):
    h_nhwc, sc, (N, OH, OW) = block_front(x_nhwc, p, stride)
    # conv2 3x3(s=1, p=1) + BN + shortcut add + ReLU, all in one GEMM kernel.
    cols2, _ = im2col(h_nhwc, 3, 3, stride=1, pad=1)
    w2, s2 = fold_conv_bn(p["conv2"], cin_pad=CPAD, cout_pad=CPAD)
    out = gemm_bn(cols2, w2, s2, residual=sc, apply_relu=True)
    return out.reshape(N, OH, OW, CPAD)


def resnet_forward(x_nchw, params):
    x = jnp.transpose(x_nchw, (0, 2, 3, 1)).astype(ACT_DTYPE)   # NCHW -> NHWC
    x = stem(x, params["stem"])                                  # (N,16,16,128)
    x = res_block(x, params["block1"], stride=3)                 # (N, 6, 6,128)

    # Block2: conv1+shortcut fused kernel, then (conv2 + residual + ReLU +
    # AdaptiveMaxPool2d(1) + Flatten + Linear) fused into a single kernel.
    h_nhwc, sc, (N, OH, OW) = block_front(x, params["block2"], stride=3)
    cols2, _ = im2col(h_nhwc, 3, 3, stride=1, pad=1)
    w2, s2 = fold_conv_bn(params["block2"]["conv2"], cin_pad=CPAD,
                          cout_pad=CPAD)
    fc_w, fc_b = params["fc_w"], params["fc_b"]
    num_classes, c_real = fc_w.shape
    wfc = jnp.pad(fc_w.T, ((0, CPAD - c_real), (0, 0))).astype(jnp.float32)
    bfc = fc_b.reshape(1, num_classes).astype(jnp.float32)
    return pl.pallas_call(
        functools.partial(_gemm_res_pool_fc_kernel, n=N, ohw=OH * OW),
        out_shape=jax.ShapeDtypeStruct((N, num_classes), jnp.float32),
    )(cols2, w2, s2, sc, wfc, bfc)


# ---------------------------------------------------------------------------
# Deterministic parameter init
# ---------------------------------------------------------------------------
def init_conv_bn(key, cin, cout, k):
    ks = jax.random.split(key, 6)
    return {
        "w": 0.1 * jax.random.normal(ks[0], (cout, cin, k, k), jnp.float32),
        "b": 0.05 * jax.random.normal(ks[1], (cout,), jnp.float32),
        "gamma": 1.0 + 0.1 * jax.random.normal(ks[2], (cout,), jnp.float32),
        "beta": 0.1 * jax.random.normal(ks[3], (cout,), jnp.float32),
        "mean": 0.05 * jax.random.normal(ks[4], (cout,), jnp.float32),
        "var": 1.0 + 0.1 * jax.random.uniform(ks[5], (cout,), jnp.float32),
    }


if __name__ == "__main__":
    num_classes = 5
    key = jax.random.PRNGKey(0)
    k_in, k_p = jax.random.split(key)
    ks = jax.random.split(k_p, 9)
    params = {
        "stem": init_conv_bn(ks[0], 3, 16, 3),
        "block1": {
            "conv1": init_conv_bn(ks[1], 16, 32, 3),
            "conv2": init_conv_bn(ks[2], 32, 32, 3),
            "short": init_conv_bn(ks[3], 16, 32, 1),
        },
        "block2": {
            "conv1": init_conv_bn(ks[4], 32, 64, 3),
            "conv2": init_conv_bn(ks[5], 64, 64, 3),
            "short": init_conv_bn(ks[6], 32, 64, 1),
        },
        "fc_w": 0.1 * jax.random.normal(ks[7], (num_classes, 64), jnp.float32),
        "fc_b": 0.05 * jax.random.normal(ks[8], (num_classes,), jnp.float32),
    }

    # NCHW input, 3 channels; spatial 48 so the three stride-3 stages give
    # 48 -> 16 -> 6 -> 2 before the global max pool.
    x = jax.random.normal(k_in, (2, 3, 48, 48), jnp.float32)

    out = jax.jit(resnet_forward)(x, params)
    jax.block_until_ready(out)
    assert out.shape == (2, num_classes)
    assert out.dtype == jnp.float32
    print("KERNEL_OK")
</pallas_src>

<mosaic_0001>
module attributes {stable_mosaic.version = 11 : i64} {
  func.func @_gemm_bn_kernel(%arg0: i32, %arg1: memref<256x27xbf16, #tpu.memory_space<vmem>>, %arg2: memref<27x128xbf16, #tpu.memory_space<vmem>>, %arg3: memref<1x128xf32, #tpu.memory_space<vmem>>, %arg4: memref<256x128xbf16, #tpu.memory_space<vmem>>) attributes {dimension_semantics = [#tpu.dimension_semantics<parallel>], iteration_bounds = array<i64: 2>, scalar_prefetch = 0 : i64, scratch_operands = 0 : i64, tpu.core_type = #tpu.core_type<tc>, window_params = [{transform_indices = @transform_0, window_bounds = array<i64: 256, 27>}, {pipeline_mode = #tpu.pipeline_mode<synchronous>, transform_indices = @transform_1, window_bounds = array<i64: 27, 128>}, {pipeline_mode = #tpu.pipeline_mode<synchronous>, transform_indices = @transform_2, window_bounds = array<i64: 1, 128>}, {transform_indices = @transform_3, window_bounds = array<i64: 256, 128>}]} {
    %c0 = arith.constant 0 : index
    %c0_0 = arith.constant 0 : index
    %0 = vector.load %arg1[%c0, %c0_0] : memref<256x27xbf16, #tpu.memory_space<vmem>>, vector<256x27xbf16>
    %c0_1 = arith.constant 0 : index
    %c0_2 = arith.constant 0 : index
    %1 = vector.load %arg2[%c0_1, %c0_2] : memref<27x128xbf16, #tpu.memory_space<vmem>>, vector<27x128xbf16>
    %cst = arith.constant dense<0.000000e+00> : vector<256x128xf32>
    %2 = tpu.matmul %0, %1, %cst {dimension_numbers = #tpu.dot_dimension_numbers<[1], [0], [0], [1], [0, 0, 1, 1], [], []>} : vector<256x27xbf16>, vector<27x128xbf16>, vector<256x128xf32> -> vector<256x128xf32>
    %c0_3 = arith.constant 0 : index
    %c0_4 = arith.constant 0 : index
    %3 = vector.load %arg3[%c0_3, %c0_4] : memref<1x128xf32, #tpu.memory_space<vmem>>, vector<1x128xf32>
    %4 = vector.broadcast %3 : vector<1x128xf32> to vector<256x128xf32>
    %5 = arith.addf %2, %4 : vector<256x128xf32>
    %cst_5 = arith.constant 0.000000e+00 : f32
    %6 = vector.broadcast %cst_5 : f32 to vector<256x128xf32>
    %7 = arith.maximumf %5, %6 : vector<256x128xf32>
    %8 = arith.truncf %7 : vector<256x128xf32> to vector<256x128xbf16>
    %c0_6 = arith.constant 0 : index
    %c0_7 = arith.constant 0 : index
    %9 = vector.load %arg4[%c0_6, %c0_7] : memref<256x128xbf16, #tpu.memory_space<vmem>>, vector<256x128xbf16>
    tpu.vector_store %arg4[%c0_6, %c0_7], %8 {strides = array<i32>} : memref<256x128xbf16, #tpu.memory_space<vmem>>, vector<256x128xbf16>,
    return
  }
  func.func @transform_0(%arg0: i32) -> (i32, i32) {
    %c0_i32 = arith.constant 0 : i32
    %c0_i32_0 = arith.constant 0 : i32
    return %arg0, %c0_i32 : i32, i32
  }
  func.func @transform_1(%arg0: i32) -> (i32, i32) {
    %c0_i32 = arith.constant 0 : i32
    %c0_i32_0 = arith.constant 0 : i32
    %c0_i32_1 = arith.constant 0 : i32
    return %c0_i32, %c0_i32_0 : i32, i32
  }
  func.func @transform_2(%arg0: i32) -> (i32, i32) {
    %c0_i32 = arith.constant 0 : i32
    %c0_i32_0 = arith.constant 0 : i32
    %c0_i32_1 = arith.constant 0 : i32
    return %c0_i32, %c0_i32_0 : i32, i32
  }
  func.func @transform_3(%arg0: i32) -> (i32, i32) {
    %c0_i32 = arith.constant 0 : i32
    %c0_i32_0 = arith.constant 0 : i32
    return %arg0, %c0_i32 : i32, i32
  }
}

module attributes {stable_mosaic.version = 11 : i64} {
  func.func @_dual_gemm_kernel(%arg0: memref<72x1152xbf16, #tpu.memory_space<vmem>>, %arg1: memref<1152x128xbf16, #tpu.memory_space<vmem>>, %arg2: memref<1x128xf32, #tpu.memory_space<vmem>>, %arg3: memref<128x128xbf16, #tpu.memory_space<vmem>>, %arg4: memref<1x128xf32, #tpu.memory_space<vmem>>, %arg5: memref<72x128xbf16, #tpu.memory_space<vmem>>, %arg6: memref<72x128xbf16, #tpu.memory_space<vmem>>) attributes {dimension_semantics = [], scalar_prefetch = 0 : i64, scratch_operands = 0 : i64, tpu.core_type = #tpu.core_type<tc>} {
    %c0 = arith.constant 0 : index
    %c0_0 = arith.constant 0 : index
    %0 = vector.load %arg0[%c0, %c0_0] : memref<72x1152xbf16, #tpu.memory_space<vmem>>, vector<72x1152xbf16>
    %c0_1 = arith.constant 0 : index
    %c0_2 = arith.constant 0 : index
    %1 = vector.load %arg1[%c0_1, %c0_2] : memref<1152x128xbf16, #tpu.memory_space<vmem>>, vector<1152x128xbf16>
    %cst = arith.constant dense<0.000000e+00> : vector<72x128xf32>
    %2 = tpu.matmul %0, %1, %cst {dimension_numbers = #tpu.dot_dimension_numbers<[1], [0], [0], [1], [0, 0, 1, 1], [], []>} : vector<72x1152xbf16>, vector<1152x128xbf16>, vector<72x128xf32> -> vector<72x128xf32>
    %c0_3 = arith.constant 0 : index
    %c0_4 = arith.constant 0 : index
    %3 = vector.load %arg2[%c0_3, %c0_4] : memref<1x128xf32, #tpu.memory_space<vmem>>, vector<1x128xf32>
    %4 = vector.broadcast %3 : vector<1x128xf32> to vector<72x128xf32>
    %5 = arith.addf %2, %4 : vector<72x128xf32>
    %cst_5 = arith.constant 0.000000e+00 : f32
    %6 = vector.broadcast %cst_5 : f32 to vector<72x128xf32>
    %7 = arith.maximumf %5, %6 : vector<72x128xf32>
    %c0_6 = arith.constant 0 : index
    %c512 = arith.constant 512 : index
    %8 = vector.load %arg0[%c0_6, %c512] : memref<72x1152xbf16, #tpu.memory_space<vmem>>, vector<72x128xbf16>
    %c0_7 = arith.constant 0 : index
    %c0_8 = arith.constant 0 : index
    %9 = vector.load %arg3[%c0_7, %c0_8] : memref<128x128xbf16, #tpu.memory_space<vmem>>, vector<128x128xbf16>
    %cst_9 = arith.constant dense<0.000000e+00> : vector<72x128xf32>
    %10 = tpu.matmul %8, %9, %cst_9 {dimension_numbers = #tpu.dot_dimension_numbers<[1], [0], [0], [1], [0, 0, 1, 1], [], []>} : vector<72x128xbf16>, vector<128x128xbf16>, vector<72x128xf32> -> vector<72x128xf32>
    %c0_10 = arith.constant 0 : index
    %c0_11 = arith.constant 0 : index
    %11 = vector.load %arg4[%c0_10, %c0_11] : memref<1x128xf32, #tpu.memory_space<vmem>>, vector<1x128xf32>
    %12 = vector.broadcast %11 : vector<1x128xf32> to vector<72x128xf32>
    %13 = arith.addf %10, %12 : vector<72x128xf32>
    %14 = arith.truncf %7 : vector<72x128xf32> to vector<72x128xbf16>
    %c0_12 = arith.constant 0 : index
    %c0_13 = arith.constant 0 : index
    %15 = vector.load %arg5[%c0_12, %c0_13] : memref<72x128xbf16, #tpu.memory_space<vmem>>, vector<72x128xbf16>
    tpu.vector_store %arg5[%c0_12, %c0_13], %14 {strides = array<i32>} : memref<72x128xbf16, #tpu.memory_space<vmem>>, vector<72x128xbf16>,
    %16 = arith.truncf %13 : vector<72x128xf32> to vector<72x128xbf16>
    %c0_14 = arith.constant 0 : index
    %c0_15 = arith.constant 0 : index
    %17 = vector.load %arg6[%c0_14, %c0_15] : memref<72x128xbf16, #tpu.memory_space<vmem>>, vector<72x128xbf16>
    tpu.vector_store %arg6[%c0_14, %c0_15], %16 {strides = array<i32>} : memref<72x128xbf16, #tpu.memory_space<vmem>>, vector<72x128xbf16>,
    return
  }
}

module attributes {stable_mosaic.version = 11 : i64} {
  func.func @_gemm_bn_kernel(%arg0: memref<72x1152xbf16, #tpu.memory_space<vmem>>, %arg1: memref<1152x128xbf16, #tpu.memory_space<vmem>>, %arg2: memref<1x128xf32, #tpu.memory_space<vmem>>, %arg3: memref<72x128xbf16, #tpu.memory_space<vmem>>, %arg4: memref<72x128xbf16, #tpu.memory_space<vmem>>) attributes {dimension_semantics = [], scalar_prefetch = 0 : i64, scratch_operands = 0 : i64, tpu.core_type = #tpu.core_type<tc>} {
    %c0 = arith.constant 0 : index
    %c0_0 = arith.constant 0 : index
    %0 = vector.load %arg0[%c0, %c0_0] : memref<72x1152xbf16, #tpu.memory_space<vmem>>, vector<72x1152xbf16>
    %c0_1 = arith.constant 0 : index
    %c0_2 = arith.constant 0 : index
    %1 = vector.load %arg1[%c0_1, %c0_2] : memref<1152x128xbf16, #tpu.memory_space<vmem>>, vector<1152x128xbf16>
    %cst = arith.constant dense<0.000000e+00> : vector<72x128xf32>
    %2 = tpu.matmul %0, %1, %cst {dimension_numbers = #tpu.dot_dimension_numbers<[1], [0], [0], [1], [0, 0, 1, 1], [], []>} : vector<72x1152xbf16>, vector<1152x128xbf16>, vector<72x128xf32> -> vector<72x128xf32>
    %c0_3 = arith.constant 0 : index
    %c0_4 = arith.constant 0 : index
    %3 = vector.load %arg2[%c0_3, %c0_4] : memref<1x128xf32, #tpu.memory_space<vmem>>, vector<1x128xf32>
    %4 = vector.broadcast %3 : vector<1x128xf32> to vector<72x128xf32>
    %5 = arith.addf %2, %4 : vector<72x128xf32>
    %c0_5 = arith.constant 0 : index
    %c0_6 = arith.constant 0 : index
    %6 = vector.load %arg3[%c0_5, %c0_6] : memref<72x128xbf16, #tpu.memory_space<vmem>>, vector<72x128xbf16>
    %7 = arith.extf %6 : vector<72x128xbf16> to vector<72x128xf32>
    %8 = arith.addf %5, %7 : vector<72x128xf32>
    %cst_7 = arith.constant 0.000000e+00 : f32
    %9 = vector.broadcast %cst_7 : f32 to vector<72x128xf32>
    %10 = arith.maximumf %8, %9 : vector<72x128xf32>
    %11 = arith.truncf %10 : vector<72x128xf32> to vector<72x128xbf16>
    %c0_8 = arith.constant 0 : index
    %c0_9 = arith.constant 0 : index
    %12 = vector.load %arg4[%c0_8, %c0_9] : memref<72x128xbf16, #tpu.memory_space<vmem>>, vector<72x128xbf16>
    tpu.vector_store %arg4[%c0_8, %c0_9], %11 {strides = array<i32>} : memref<72x128xbf16, #tpu.memory_space<vmem>>, vector<72x128xbf16>,
    return
  }
}

module attributes {stable_mosaic.version = 11 : i64} {
  func.func @_dual_gemm_kernel(%arg0: memref<8x1152xbf16, #tpu.memory_space<vmem>>, %arg1: memref<1152x128xbf16, #tpu.memory_space<vmem>>, %arg2: memref<1x128xf32, #tpu.memory_space<vmem>>, %arg3: memref<128x128xbf16, #tpu.memory_space<vmem>>, %arg4: memref<1x128xf32, #tpu.memory_space<vmem>>, %arg5: memref<8x128xbf16, #tpu.memory_space<vmem>>, %arg6: memref<8x128xbf16, #tpu.memory_space<vmem>>) attributes {dimension_semantics = [], scalar_prefetch = 0 : i64, scratch_operands = 0 : i64, tpu.core_type = #tpu.core_type<tc>} {
    %c0 = arith.constant 0 : index
    %c0_0 = arith.constant 0 : index
    %0 = vector.load %arg0[%c0, %c0_0] : memref<8x1152xbf16, #tpu.memory_space<vmem>>, vector<8x1152xbf16>
    %c0_1 = arith.constant 0 : index
    %c0_2 = arith.constant 0 : index
    %1 = vector.load %arg1[%c0_1, %c0_2] : memref<1152x128xbf16, #tpu.memory_space<vmem>>, vector<1152x128xbf16>
    %cst = arith.constant dense<0.000000e+00> : vector<8x128xf32>
    %2 = tpu.matmul %0, %1, %cst {dimension_numbers = #tpu.dot_dimension_numbers<[1], [0], [0], [1], [0, 0, 1, 1], [], []>} : vector<8x1152xbf16>, vector<1152x128xbf16>, vector<8x128xf32> -> vector<8x128xf32>
    %c0_3 = arith.constant 0 : index
    %c0_4 = arith.constant 0 : index
    %3 = vector.load %arg2[%c0_3, %c0_4] : memref<1x128xf32, #tpu.memory_space<vmem>>, vector<1x128xf32>
    %4 = vector.broadcast %3 : vector<1x128xf32> to vector<8x128xf32>
    %5 = arith.addf %2, %4 : vector<8x128xf32>
    %cst_5 = arith.constant 0.000000e+00 : f32
    %6 = vector.broadcast %cst_5 : f32 to vector<8x128xf32>
    %7 = arith.maximumf %5, %6 : vector<8x128xf32>
    %c0_6 = arith.constant 0 : index
    %c512 = arith.constant 512 : index
    %8 = vector.load %arg0[%c0_6, %c512] : memref<8x1152xbf16, #tpu.memory_space<vmem>>, vector<8x128xbf16>
    %c0_7 = arith.constant 0 : index
    %c0_8 = arith.constant 0 : index
    %9 = vector.load %arg3[%c0_7, %c0_8] : memref<128x128xbf16, #tpu.memory_space<vmem>>, vector<128x128xbf16>
    %cst_9 = arith.constant dense<0.000000e+00> : vector<8x128xf32>
    %10 = tpu.matmul %8, %9, %cst_9 {dimension_numbers = #tpu.dot_dimension_numbers<[1], [0], [0], [1], [0, 0, 1, 1], [], []>} : vector<8x128xbf16>, vector<128x128xbf16>, vector<8x128xf32> -> vector<8x128xf32>
    %c0_10 = arith.constant 0 : index
    %c0_11 = arith.constant 0 : index
    %11 = vector.load %arg4[%c0_10, %c0_11] : memref<1x128xf32, #tpu.memory_space<vmem>>, vector<1x128xf32>
    %12 = vector.broadcast %11 : vector<1x128xf32> to vector<8x128xf32>
    %13 = arith.addf %10, %12 : vector<8x128xf32>
    %14 = arith.truncf %7 : vector<8x128xf32> to vector<8x128xbf16>
    %c0_12 = arith.constant 0 : index
    %c0_13 = arith.constant 0 : index
    %15 = vector.load %arg5[%c0_12, %c0_13] : memref<8x128xbf16, #tpu.memory_space<vmem>>, vector<8x128xbf16>
    tpu.vector_store %arg5[%c0_12, %c0_13], %14 {strides = array<i32>} : memref<8x128xbf16, #tpu.memory_space<vmem>>, vector<8x128xbf16>,
    %16 = arith.truncf %13 : vector<8x128xf32> to vector<8x128xbf16>
    %c0_14 = arith.constant 0 : index
    %c0_15 = arith.constant 0 : index
    %17 = vector.load %arg6[%c0_14, %c0_15] : memref<8x128xbf16, #tpu.memory_space<vmem>>, vector<8x128xbf16>
    tpu.vector_store %arg6[%c0_14, %c0_15], %16 {strides = array<i32>} : memref<8x128xbf16, #tpu.memory_space<vmem>>, vector<8x128xbf16>,
    return
  }
}

module attributes {stable_mosaic.version = 11 : i64} {
  func.func @_gemm_res_pool_fc_kernel(%arg0: memref<8x1152xbf16, #tpu.memory_space<vmem>>, %arg1: memref<1152x128xbf16, #tpu.memory_space<vmem>>, %arg2: memref<1x128xf32, #tpu.memory_space<vmem>>, %arg3: memref<8x128xbf16, #tpu.memory_space<vmem>>, %arg4: memref<128x5xf32, #tpu.memory_space<vmem>>, %arg5: memref<1x5xf32, #tpu.memory_space<vmem>>, %arg6: memref<2x5xf32, #tpu.memory_space<vmem>>) attributes {dimension_semantics = [], scalar_prefetch = 0 : i64, scratch_operands = 0 : i64, tpu.core_type = #tpu.core_type<tc>} {
    %c0 = arith.constant 0 : index
    %c0_0 = arith.constant 0 : index
    %0 = vector.load %arg0[%c0, %c0_0] : memref<8x1152xbf16, #tpu.memory_space<vmem>>, vector<8x1152xbf16>
    %c0_1 = arith.constant 0 : index
    %c0_2 = arith.constant 0 : index
    %1 = vector.load %arg1[%c0_1, %c0_2] : memref<1152x128xbf16, #tpu.memory_space<vmem>>, vector<1152x128xbf16>
    %cst = arith.constant dense<0.000000e+00> : vector<8x128xf32>
    %2 = tpu.matmul %0, %1, %cst {dimension_numbers = #tpu.dot_dimension_numbers<[1], [0], [0], [1], [0, 0, 1, 1], [], []>} : vector<8x1152xbf16>, vector<1152x128xbf16>, vector<8x128xf32> -> vector<8x128xf32>
    %c0_3 = arith.constant 0 : index
    %c0_4 = arith.constant 0 : index
    %3 = vector.load %arg2[%c0_3, %c0_4] : memref<1x128xf32, #tpu.memory_space<vmem>>, vector<1x128xf32>
    %4 = vector.broadcast %3 : vector<1x128xf32> to vector<8x128xf32>
    %5 = arith.addf %2, %4 : vector<8x128xf32>
    %c0_5 = arith.constant 0 : index
    %c0_6 = arith.constant 0 : index
    %6 = vector.load %arg3[%c0_5, %c0_6] : memref<8x128xbf16, #tpu.memory_space<vmem>>, vector<8x128xbf16>
    %7 = arith.extf %6 : vector<8x128xbf16> to vector<8x128xf32>
    %8 = arith.addf %5, %7 : vector<8x128xf32>
    %cst_7 = arith.constant 0.000000e+00 : f32
    %9 = vector.broadcast %cst_7 : f32 to vector<8x128xf32>
    %10 = arith.maximumf %8, %9 : vector<8x128xf32>
    %11 = vector.extract_strided_slice %10 {offsets = [0, 0], sizes = [4, 128], strides = [1, 1]} : vector<8x128xf32> to vector<4x128xf32>
    %cst_8 = arith.constant dense<0xFF800000> : vector<128xf32>
    %12 = vector.multi_reduction <maximumf>, %11, %cst_8 [0] : vector<4x128xf32> to vector<128xf32>
    %13 = vector.shape_cast %12 : vector<128xf32> to vector<1x128xf32>
    %14 = vector.extract_strided_slice %10 {offsets = [4, 0], sizes = [4, 128], strides = [1, 1]} : vector<8x128xf32> to vector<4x128xf32>
    %cst_9 = arith.constant dense<0xFF800000> : vector<128xf32>
    %15 = vector.multi_reduction <maximumf>, %14, %cst_9 [0] : vector<4x128xf32> to vector<128xf32>
    %16 = vector.shape_cast %15 : vector<128xf32> to vector<1x128xf32>
    %17 = tpu.concatenate %13, %16 in 0 : vector<1x128xf32>, vector<1x128xf32> -> vector<2x128xf32>
    %c0_10 = arith.constant 0 : index
    %c0_11 = arith.constant 0 : index
    %18 = vector.load %arg4[%c0_10, %c0_11] : memref<128x5xf32, #tpu.memory_space<vmem>>, vector<128x5xf32>
    %cst_12 = arith.constant dense<0.000000e+00> : vector<2x5xf32>
    %19 = tpu.matmul %17, %18, %cst_12 {dimension_numbers = #tpu.dot_dimension_numbers<[1], [0], [0], [1], [0, 0, 1, 1], [], []>} : vector<2x128xf32>, vector<128x5xf32>, vector<2x5xf32> -> vector<2x5xf32>
    %c0_13 = arith.constant 0 : index
    %c0_14 = arith.constant 0 : index
    %20 = vector.load %arg5[%c0_13, %c0_14] : memref<1x5xf32, #tpu.memory_space<vmem>>, vector<1x5xf32>
    %21 = vector.broadcast %20 : vector<1x5xf32> to vector<2x5xf32>
    %22 = arith.addf %19, %21 : vector<2x5xf32>
    %c0_15 = arith.constant 0 : index
    %c0_16 = arith.constant 0 : index
    %23 = vector.load %arg6[%c0_15, %c0_16] : memref<2x5xf32, #tpu.memory_space<vmem>>, vector<2x5xf32>
    tpu.vector_store %arg6[%c0_15, %c0_16], %22 {strides = array<i32>} : memref<2x5xf32, #tpu.memory_space<vmem>>, vector<2x5xf32>,
    return
  }
}

</mosaic_0001>

<bundles_post_ra>
// kernel: resnet_forward.5
= control target key start
LH: loop header
LB: loop body
LE: loop exit
PB: predicated region body
PF: predicated region fallthrough
CT: control target
= control target key end

     0   :  { %s1093_s12 = smov 0   ;;  %s1212_s0 = inlined_call_operand.vmem [shape: bf16[512,27], index: 0, kind: input, shape index: {}]   ;;  %s1213_s1 = inlined_call_operand.vmem [shape: bf16[27,128], index: 1, kind: input, shape index: {}]   ;;  %s1214_s2 = inlined_call_operand.vmem [shape: f32[1,128], index: 2, kind: input, shape index: {}]   ;;  %s1215_s3 = inlined_call_operand.vmem [shape: bf16[512,128], index: 3, kind: output, shape index: {}]  }
   0x1 LB: > { %s774_s13 = sadd.s32 4294967295, %s1070_s12   ;;  %p778_p0 = scmp.ge.s32.totalorder %s1070_s12, 1  ;;  %s1070_s12 = sphi %s1093_s12, %s13_s12  }
   0x2   : > { %p138_p1 = scmp.lt.s32.totalorder %s1070_s12, 3 }
   0x4   : > { %p139_p2 = pnand %p778_p0, %p138_p1 }
   0x5   : > { %v1046_v0 = vld [vmem:[%s1213_s1] sm:$0xff] (!%p139_p2)   ;;  %vm358_vm0 = vcmask (!%p139_p2), 1044480   ;;  %v1047_v1 = vld [vmem:[%s1213_s1 + $0x8] sm:$0x3f] (!%p139_p2)   ;;  %vm359_vm1 = vcmask (!%p139_p2), 1045504   ;;  %s779_s18 = sshll.u32 (!%p139_p2), %s774_s13, 5 }
   0x6   : > { %142 = sbr.rel (%p139_p2) target bundleno = 265 (0x109), region = 32  ;;  %997 = vmatprep.subr.bf16.mxu0 (!%p139_p2), %v1046_v0  ;;  %1033 = vmatprep.subr.bf16.mxu1 (!%p139_p2), %v1046_v0  ;;  %v1072_v2 = vmov (!%p139_p2), 65535   ;;  %p163_p3 = scmp.lt.s32.totalorder (!%p139_p2), %s779_s18, 63  ;;  %vm309_vm2 = vcmask (!%p139_p2), 220160   ;;  %v1152_v22 = vld [vmem:[%s1214_s2] ss:$0 sm:$0xff] (!%p139_p2) }
   0x7   : > { %998 = vmatpush3.bf16.msra.mxu0 (!%p139_p2), %v1046_v0  ;;  %1035 = vmatpush3.bf16.msra.mxu1 (!%p139_p2), %v1046_v0  ;;  %v360_v3 = vsel (!%p139_p2), %vm358_vm0, 4294967295, %v1072_v2 }
   0x8   : > { %v361_v4 = vsel (!%p139_p2), %vm359_vm1, %v360_v3, 0 }
   0x9   : > { %v363_v5 = vand.u32 (!%p139_p2), %v1047_v1, %v361_v4 }
   0xb   : > { %999 = vmatprep.subr.bf16.mxu0 (!%p139_p2), %v363_v5  ;;  %1034 = vmatprep.subr.bf16.mxu1 (!%p139_p2), %v363_v5 }
   0xc   : > { %1000 = vmatpush3.bf16.msra.mxu0 (!%p139_p2), %v363_v5  ;;  %1036 = vmatpush3.bf16.msra.mxu1 (!%p139_p2), %v363_v5 }
   0xd   : > { %s1217_s18 = smov (!%p163_p3, %s779_s18), 63 }
   0xe   : > { %s780_s19 = sshll.u32 %s1217_s18, 2 }
   0xf   : > { %s1115_s22 = scalar_lea.vmem %s1212_s0, %s780_s19  ;;  %s1167_s27 = scalar_lea.vmem %s1215_s3, %s780_s19 }
  0x10   : > { %v1048_v6 = vld [vmem:[%s1115_s22] sm:$0xff]   ;;  %v1050_v8 = vld [vmem:[%s1115_s22 + $0x8] sm:$0xff]   ;;  %v1052_v10 = vld [vmem:[%s1115_s22 + $0x10] sm:$0xff]  }
  0x11   : > { %v1049_v7 = vld [vmem:[%s1115_s22 + $0x40] sm:$0xff]   ;;  %1001 = vmatprep.mubr.msk.bf16.mxu0 %vm309_vm2, %v1048_v6  ;;  %v1051_v9 = vld [vmem:[%s1115_s22 + $0x48] sm:$0xff]   ;;  %v1053_v11 = vld [vmem:[%s1115_s22 + $0x50] sm:$0xff]  }
  0x12   : > { %1017 = vmatprep.mubr.msk.bf16.mxu1 %vm309_vm2, %v1049_v7  ;;  %1002 = vmatmul.mubr.msk.bf16.vlgmr.msra.gmra.mrb[0].mxu0 %vm309_vm2, %v1050_v8  ;;  %v1054_v12 = vld [vmem:[%s1115_s22 + $0x18] sm:$0xff]   ;;  %v1056_v14 = vld [vmem:[%s1115_s22 + $0x20] sm:$0xff]   ;;  %v1058_v16 = vld [vmem:[%s1115_s22 + $0x28] sm:$0xff]  }
  0x13   : > { %1018 = vmatmul.mubr.msk.bf16.vlgmr.msra.gmra.mrb[0].mxu1 %vm309_vm2, %v1051_v9  ;;  %1005 = vmatprep.mubr.msk.bf16.mxu0 %vm309_vm2, %v1052_v10  ;;  %v1055_v13 = vld [vmem:[%s1115_s22 + $0x58] sm:$0xff]   ;;  %v1057_v15 = vld [vmem:[%s1115_s22 + $0x60] sm:$0xff]   ;;  %v1059_v17 = vld [vmem:[%s1115_s22 + $0x68] sm:$0xff]  }
  0x14   : > { %1021 = vmatprep.mubr.msk.bf16.mxu1 %vm309_vm2, %v1053_v11  ;;  %v1060_v18 = vld [vmem:[%s1115_s22 + $0x30] sm:$0xff]   ;;  %v1062_v20 = vld [vmem:[%s1115_s22 + $0x38] sm:$0xff]  }
  0x15   : > { %v1061_v19 = vld [vmem:[%s1115_s22 + $0x70] sm:$0xff]   ;;  %v1063_v21 = vld [vmem:[%s1115_s22 + $0x78] sm:$0xff]  }
  0x1a   : > { %1006 = vmatmul.mubr.msk.bf16.gmra.mrb[4].mxu0 %vm309_vm2, %v1054_v12 }
  0x1b   : > { %1022 = vmatmul.mubr.msk.bf16.gmra.mrb[4].mxu1 %vm309_vm2, %v1055_v13  ;;  %1009 = vmatprep.mubr.msk.bf16.mxu0 %vm309_vm2, %v1056_v14 }
  0x1c   : > { %1025 = vmatprep.mubr.msk.bf16.mxu1 %vm309_vm2, %v1057_v15 }
  0x22   : > { %1010 = vmatmul.mubr.msk.bf16.gmra.mrb[8].mxu0 %vm309_vm2, %v1058_v16 }
  0x23   : > { %1026 = vmatmul.mubr.msk.bf16.gmra.mrb[8].mxu1 %vm309_vm2, %v1059_v17  ;;  %1013 = vmatprep.mubr.msk.bf16.mxu0 %vm309_vm2, %v1060_v18 }
  0x24   : > { %1029 = vmatprep.mubr.msk.bf16.mxu1 %vm309_vm2, %v1061_v19 }
  0x2a   : > { %1014 = vmatmul.mubr.msk.bf16.gmra.mrb[12].mxu0 %vm309_vm2, %v1062_v20 }
  0x2b   : > { %1030 = vmatmul.mubr.msk.bf16.gmra.mrb[12].mxu1 %vm309_vm2, %v1063_v21 }
  0xe5   : > { %v1003_v23 = vpop.f32.mrb[0].mxu0 }
  0xe6   : > { %v408_v24 = vadd.f32 %v1003_v23, %v1152_v22  ;;  %v1019_v25 = vpop.f32.mrb[0].mxu1  ;;  %v399_v26 = vpop.f32.mrb[1].mxu0 }
  0xe7   : > { %v472_v27 = vadd.f32 %v1019_v25, %v1152_v22  ;;  %v400_v28 = vadd.f32 %v1152_v22, %v399_v26  ;;  %v463_v29 = vpop.f32.mrb[1].mxu1  ;;  %v1004_v30 = vpop.f32.mrb[2].mxu0 }
  0xe8   : > { %v464_v31 = vadd.f32 %v1152_v22, %v463_v29  ;;  %v411_v32 = vadd.f32 %v1004_v30, %v1152_v22  ;;  %v1020_v33 = vpop.f32.mrb[2].mxu1  ;;  %v402_v34 = vpop.f32.mrb[3].mxu0  ;;  %v528_v38 = vmax.f32 %v408_v24, 0.0 }
  0xe9   : > { %v475_v35 = vadd.f32 %v1020_v33, %v1152_v22  ;;  %v403_v36 = vadd.f32 %v1152_v22, %v402_v34  ;;  %v466_v37 = vpop.f32.mrb[3].mxu1  ;;  %v544_v41 = vmax.f32 %v472_v27, 0.0  ;;  %v526_v42 = vmax.f32 %v400_v28, 0.0 }
  0xea   : > { %v529_v39 = vmax.f32 %v411_v32, 0.0  ;;  %v467_v40 = vadd.f32 %v1152_v22, %v466_v37  ;;  %v542_v45 = vmax.f32 %v464_v31, 0.0 }
  0xeb   : > { %v545_v43 = vmax.f32 %v475_v35, 0.0  ;;  %v527_v44 = vmax.f32 %v403_v36, 0.0 }
  0xec   : > { %v892_v46 = vpack.c.bf16 %v529_v39, %v528_v38  ;;  %v543_v47 = vmax.f32 %v467_v40, 0.0 }
  0xed   : > { %v932_v48 = vpack.c.bf16 %v545_v43, %v544_v41  ;;  %v887_v49 = vpack.c.bf16 %v527_v44, %v526_v42  ;;  %v1007_v50 = vpop.f32.mrb[4].mxu0 }
  0xee   : > { %964 = vst [vmem:[%s1167_s27 + $0x8] sm:$0xff] %v892_v46   ;;  %v927_v51 = vpack.c.bf16 %v543_v47, %v542_v45  ;;  %v424_v52 = vadd.f32 %v1007_v50, %v1152_v22  ;;  %v1023_v53 = vpop.f32.mrb[4].mxu1  ;;  %v415_v54 = vpop.f32.mrb[5].mxu0 }
  0xef   : > { %972 = vst [vmem:[%s1167_s27 + $0x48] sm:$0xff] %v932_v48   ;;  %888 = vst [vmem:[%s1167_s27] sm:$0xff] %v887_v49   ;;  %v488_v55 = vadd.f32 %v1023_v53, %v1152_v22  ;;  %v416_v56 = vadd.f32 %v1152_v22, %v415_v54  ;;  %v479_v57 = vpop.f32.mrb[5].mxu1  ;;  %v1008_v58 = vpop.f32.mrb[6].mxu0 }
  0xf0   : > { %971 = vst [vmem:[%s1167_s27 + $0x40] sm:$0xff] %v927_v51   ;;  %v480_v59 = vadd.f32 %v1152_v22, %v479_v57  ;;  %v427_v60 = vadd.f32 %v1008_v58, %v1152_v22  ;;  %v1024_v61 = vpop.f32.mrb[6].mxu1  ;;  %v418_v62 = vpop.f32.mrb[7].mxu0  ;;  %v532_v2 = vmax.f32 %v424_v52, 0.0 }
  0xf1   : > { %v491_v63 = vadd.f32 %v1024_v61, %v1152_v22  ;;  %v419_v0 = vadd.f32 %v1152_v22, %v418_v62  ;;  %v482_v1 = vpop.f32.mrb[7].mxu1  ;;  %v548_v5 = vmax.f32 %v488_v55, 0.0  ;;  %v530_v6 = vmax.f32 %v416_v56, 0.0 }
  0xf2   : > { %v533_v3 = vmax.f32 %v427_v60, 0.0  ;;  %v483_v4 = vadd.f32 %v1152_v22, %v482_v1  ;;  %v546_v9 = vmax.f32 %v480_v59, 0.0 }
  0xf3   : > { %v549_v7 = vmax.f32 %v491_v63, 0.0  ;;  %v531_v8 = vmax.f32 %v419_v0, 0.0 }
  0xf4   : > { %v902_v10 = vpack.c.bf16 %v533_v3, %v532_v2  ;;  %v547_v11 = vmax.f32 %v483_v4, 0.0 }
  0xf5   : > { %v942_v12 = vpack.c.bf16 %v549_v7, %v548_v5  ;;  %v897_v13 = vpack.c.bf16 %v531_v8, %v530_v6  ;;  %v1011_v14 = vpop.f32.mrb[8].mxu0 }
  0xf6   : > { %966 = vst [vmem:[%s1167_s27 + $0x18] sm:$0xff] %v902_v10   ;;  %v937_v15 = vpack.c.bf16 %v547_v11, %v546_v9  ;;  %v440_v16 = vadd.f32 %v1011_v14, %v1152_v22  ;;  %v1027_v17 = vpop.f32.mrb[8].mxu1  ;;  %v431_v18 = vpop.f32.mrb[9].mxu0 }
  0xf7   : > { %974 = vst [vmem:[%s1167_s27 + $0x58] sm:$0xff] %v942_v12   ;;  %965 = vst [vmem:[%s1167_s27 + $0x10] sm:$0xff] %v897_v13   ;;  %v504_v19 = vadd.f32 %v1027_v17, %v1152_v22  ;;  %v432_v20 = vadd.f32 %v1152_v22, %v431_v18  ;;  %v495_v21 = vpop.f32.mrb[9].mxu1  ;;  %v1012_v23 = vpop.f32.mrb[10].mxu0 }
  0xf8   : > { %973 = vst [vmem:[%s1167_s27 + $0x50] sm:$0xff] %v937_v15   ;;  %v496_v24 = vadd.f32 %v1152_v22, %v495_v21  ;;  %v443_v25 = vadd.f32 %v1012_v23, %v1152_v22  ;;  %v1028_v26 = vpop.f32.mrb[10].mxu1  ;;  %v434_v27 = vpop.f32.mrb[11].mxu0  ;;  %v536_v31 = vmax.f32 %v440_v16, 0.0 }
  0xf9   : > { %v507_v28 = vadd.f32 %v1028_v26, %v1152_v22  ;;  %v435_v29 = vadd.f32 %v1152_v22, %v434_v27  ;;  %v498_v30 = vpop.f32.mrb[11].mxu1  ;;  %v552_v34 = vmax.f32 %v504_v19, 0.0  ;;  %v534_v35 = vmax.f32 %v432_v20, 0.0 }
  0xfa   : > { %v537_v32 = vmax.f32 %v443_v25, 0.0  ;;  %v499_v33 = vadd.f32 %v1152_v22, %v498_v30  ;;  %v550_v38 = vmax.f32 %v496_v24, 0.0 }
  0xfb   : > { %v553_v36 = vmax.f32 %v507_v28, 0.0  ;;  %v535_v37 = vmax.f32 %v435_v29, 0.0 }
  0xfc   : > { %v912_v39 = vpack.c.bf16 %v537_v32, %v536_v31  ;;  %v551_v40 = vmax.f32 %v499_v33, 0.0 }
  0xfd   : > { %v952_v41 = vpack.c.bf16 %v553_v36, %v552_v34  ;;  %v907_v42 = vpack.c.bf16 %v535_v37, %v534_v35  ;;  %v1015_v43 = vpop.f32.mrb[12].mxu0 }
  0xfe   : > { %968 = vst [vmem:[%s1167_s27 + $0x28] sm:$0xff] %v912_v39   ;;  %v947_v44 = vpack.c.bf16 %v551_v40, %v550_v38  ;;  %v456_v45 = vadd.f32 %v1015_v43, %v1152_v22  ;;  %v1031_v46 = vpop.f32.mrb[12].mxu1  ;;  %v447_v47 = vpop.f32.mrb[13].mxu0 }
  0xff   : > { %976 = vst [vmem:[%s1167_s27 + $0x68] sm:$0xff] %v952_v41   ;;  %967 = vst [vmem:[%s1167_s27 + $0x20] sm:$0xff] %v907_v42   ;;  %v520_v48 = vadd.f32 %v1031_v46, %v1152_v22  ;;  %v448_v49 = vadd.f32 %v1152_v22, %v447_v47  ;;  %v511_v50 = vpop.f32.mrb[13].mxu1  ;;  %v1016_v51 = vpop.f32.mrb[14].mxu0 }
 0x100   : > { %975 = vst [vmem:[%s1167_s27 + $0x60] sm:$0xff] %v947_v44   ;;  %v512_v52 = vadd.f32 %v1152_v22, %v511_v50  ;;  %v459_v53 = vadd.f32 %v1016_v51, %v1152_v22  ;;  %v1032_v54 = vpop.f32.mrb[14].mxu1  ;;  %v450_v55 = vpop.f32.mrb[15].mxu0  ;;  %v540_v59 = vmax.f32 %v456_v45, 0.0 }
 0x101   : > { %v523_v56 = vadd.f32 %v1032_v54, %v1152_v22  ;;  %v451_v57 = vadd.f32 %v1152_v22, %v450_v55  ;;  %v514_v58 = vpop.f32.mrb[15].mxu1  ;;  %v556_v62 = vmax.f32 %v520_v48, 0.0  ;;  %v538_v63 = vmax.f32 %v448_v49, 0.0 }
 0x102   : > { %v541_v60 = vmax.f32 %v459_v53, 0.0  ;;  %v515_v61 = vadd.f32 %v1152_v22, %v514_v58  ;;  %v554_v2 = vmax.f32 %v512_v52, 0.0 }
 0x103   : > { %v557_v0 = vmax.f32 %v523_v56, 0.0  ;;  %v539_v1 = vmax.f32 %v451_v57, 0.0 }
 0x104   : > { %v922_v3 = vpack.c.bf16 %v541_v60, %v540_v59  ;;  %v555_v4 = vmax.f32 %v515_v61, 0.0 }
 0x105   : > { %v962_v5 = vpack.c.bf16 %v557_v0, %v556_v62  ;;  %v917_v6 = vpack.c.bf16 %v539_v1, %v538_v63 }
 0x106   : > { %970 = vst [vmem:[%s1167_s27 + $0x38] sm:$0xff] %v922_v3   ;;  %v957_v7 = vpack.c.bf16 %v555_v4, %v554_v2 }
 0x107   : > { %978 = vst [vmem:[%s1167_s27 + $0x78] sm:$0xff] %v962_v5   ;;  %969 = vst [vmem:[%s1167_s27 + $0x30] sm:$0xff] %v917_v6  }
 0x108   : > { %977 = vst [vmem:[%s1167_s27 + $0x70] sm:$0xff] %v957_v7  }
 0x109 PF: > { %s13_s12 = sadd.s32 1, %s1070_s12  }
 0x10a   : > { %p10_p4 = scmp.ge.s32.totalorder %s13_s12, 4  }
 0x10c   :  { %12 = sbr.rel (!%p10_p4) target bundleno = 1 (0x1), region = 62 }

// kernel: resnet_forward.6
= control target key start
LH: loop header
LB: loop body
LE: loop exit
PB: predicated region body
PF: predicated region fallthrough
CT: control target
= control target key end

     0   :  { %vm2161_vm0 = vmmov 0   ;;  %s2723_s1 = inlined_call_operand.vmem [shape: bf16[1152,128], index: 1, kind: input, shape index: {}]   ;;  %s2724_s0 = inlined_call_operand.vmem [shape: bf16[72,1152], index: 0, kind: input, shape index: {}]   ;;  %s2725_s3 = inlined_call_operand.vmem [shape: bf16[128,128], index: 3, kind: input, shape index: {}]   ;;  %s2726_s2 = inlined_call_operand.vmem [shape: f32[1,128], index: 2, kind: input, shape index: {}]   ;;  %s2727_s4 = inlined_call_operand.vmem [shape: f32[1,128], index: 4, kind: input, shape index: {}]   ;;  %s2728_s6 = inlined_call_operand.vmem [shape: bf16[72,128], index: 6, kind: output, shape index: {1}]   ;;  %s2729_s5 = inlined_call_operand.vmem [shape: bf16[72,128], index: 5, kind: output, shape index: {0}]  }
   0x1   :  { %v2014_v0 = vld [vmem:[%s2723_s1 + $0x40] sm:$0xff]   ;;  %v2018_v4 = vld [vmem:[%s2723_s1 + $0x48] sm:$0xff]   ;;  %v2022_v8 = vld [vmem:[%s2723_s1 + $0x50] sm:$0xff]  }
   0x2   :  { %v2015_v1 = vld [vmem:[%s2723_s1 + $0xc0] sm:$0xff]   ;;  %1730 = vmatprep.subr.bf16.mxu0 %v2014_v0  ;;  %v2019_v5 = vld [vmem:[%s2723_s1 + $0xc8] sm:$0xff]   ;;  %v2023_v9 = vld [vmem:[%s2723_s1 + $0xd0] sm:$0xff]  }
   0x3   :  { %v2016_v2 = vld [vmem:[%s2723_s1] sm:$0xff]   ;;  %1776 = vmatprep.subr.bf16.mxu1 %v2015_v1  ;;  %v2020_v6 = vld [vmem:[%s2723_s1 + $0x8] sm:$0xff]   ;;  %v2024_v10 = vld [vmem:[%s2723_s1 + $0x10] sm:$0xff]  }
   0x4   :  { %v2017_v3 = vld [vmem:[%s2723_s1 + $0x80] sm:$0xff]   ;;  %1731 = vmatpush3.bf16.msra.mxu0 %v2016_v2  ;;  %v2021_v7 = vld [vmem:[%s2723_s1 + $0x88] sm:$0xff]   ;;  %v2025_v11 = vld [vmem:[%s2723_s1 + $0x90] sm:$0xff]  }
   0x5   :  { %1777 = vmatpush3.bf16.msra.mxu1 %v2017_v3  ;;  %1732 = vmatprep.subr.bf16.mxu0 %v2018_v4  ;;  %v2026_v12 = vld [vmem:[%s2723_s1 + $0x58] sm:$0xff]   ;;  %v2030_v16 = vld [vmem:[%s2723_s1 + $0x60] sm:$0xff]   ;;  %v2034_v20 = vld [vmem:[%s2723_s1 + $0x68] sm:$0xff]  }
   0x6   :  { %1778 = vmatprep.subr.bf16.mxu1 %v2019_v5  ;;  %v2027_v13 = vld [vmem:[%s2723_s1 + $0xd8] sm:$0xff]   ;;  %v2031_v17 = vld [vmem:[%s2723_s1 + $0xe0] sm:$0xff]   ;;  %v2035_v21 = vld [vmem:[%s2723_s1 + $0xe8] sm:$0xff]  }
   0x7   :  { %v2028_v14 = vld [vmem:[%s2723_s1 + $0x18] sm:$0xff]   ;;  %v2032_v18 = vld [vmem:[%s2723_s1 + $0x20] sm:$0xff]   ;;  %v2036_v22 = vld [vmem:[%s2723_s1 + $0x28] sm:$0xff]  }
   0x8   :  { %1733 = vmatpush3.bf16.msra.mxu0 %v2020_v6  ;;  %v2029_v15 = vld [vmem:[%s2723_s1 + $0x98] sm:$0xff]   ;;  %v2033_v19 = vld [vmem:[%s2723_s1 + $0xa0] sm:$0xff]   ;;  %v2037_v23 = vld [vmem:[%s2723_s1 + $0xa8] sm:$0xff]  }
   0x9   :  { %1779 = vmatpush3.bf16.msra.mxu1 %v2021_v7  ;;  %1734 = vmatprep.subr.bf16.mxu0 %v2022_v8  ;;  %v2038_v24 = vld [vmem:[%s2723_s1 + $0x70] sm:$0xff]   ;;  %v2042_v28 = vld [vmem:[%s2723_s1 + $0x78] sm:$0xff]   ;;  %v2046_v32 = vld [vmem:[%s2724_s0] ss:$36 sps:$4 sm:$0xff]  }
   0xa   :  { %1780 = vmatprep.subr.bf16.mxu1 %v2023_v9  ;;  %v2039_v25 = vld [vmem:[%s2723_s1 + $0xf0] sm:$0xff]   ;;  %v2043_v29 = vld [vmem:[%s2723_s1 + $0xf8] sm:$0xff]   ;;  %v2048_v33 = vld [vmem:[%s2724_s0 + $0x4] ss:$36 sps:$4 sm:$0xff]  }
   0xb   :  { %v2040_v26 = vld [vmem:[%s2723_s1 + $0x30] sm:$0xff]   ;;  %v2044_v30 = vld [vmem:[%s2723_s1 + $0x38] sm:$0xff]   ;;  %v2049_v34 = vld [vmem:[%s2724_s0 + $0x8] ss:$36 sps:$4 sm:$0xff]   ;;  %899 = vmatprep.mubr.bf16.mxu0 %v2048_v33 }
   0xc   :  { %1735 = vmatpush3.bf16.msra.mxu0 %v2024_v10  ;;  %v2041_v27 = vld [vmem:[%s2723_s1 + $0xb0] sm:$0xff]   ;;  %v2045_v31 = vld [vmem:[%s2723_s1 + $0xb8] sm:$0xff]   ;;  %v2052_v36 = vld [vmem:[%s2723_s1 + $0x140] sm:$0xff]  }
   0xd   :  { %1781 = vmatpush3.bf16.msra.mxu1 %v2025_v11  ;;  %1736 = vmatprep.subr.bf16.mxu0 %v2026_v12  ;;  %v2051_v35 = vld [vmem:[%s2724_s0 + $0xc] ss:$36 sps:$4 sm:$0xff]   ;;  %v2053_v37 = vld [vmem:[%s2723_s1 + $0x100] sm:$0xff]   ;;  %v2060_v43 = vld [vmem:[%s2724_s0 + $0x54] ss:$36 sps:$4 sm:$0xff]  }
   0xe   :  { %1782 = vmatprep.subr.bf16.mxu1 %v2027_v13  ;;  %971 = vmatprep.mubr.bf16.mxu1 %v2051_v35  ;;  %v2054_v38 = vld [vmem:[%s2723_s1 + $0x1c0] sm:$0xff]   ;;  %v2056_v40 = vld [vmem:[%s2723_s1 + $0x148] sm:$0xff]   ;;  %v2064_v46 = vld [vmem:[%s2724_s0 + $0x50] ss:$36 sps:$4 sm:$0xff]  }
   0xf   :  { %v2055_v39 = vld [vmem:[%s2723_s1 + $0x180] sm:$0xff]   ;;  %v2057_v41 = vld [vmem:[%s2723_s1 + $0x108] sm:$0xff]   ;;  %v2066_v48 = vld [vmem:[%s2723_s1 + $0x150] sm:$0xff]  }
  0x10   :  { %1737 = vmatpush3.bf16.msra.mxu0 %v2028_v14  ;;  %v2058_v42 = vld [vmem:[%s2724_s0 + $0x4c] ss:$36 sps:$4 sm:$0xff]   ;;  %v2070_v52 = vld [vmem:[%s2724_s0 + $0x94] ss:$36 sps:$4 sm:$0xff]   ;;  %v2072_v53 = vld [vmem:[%s2724_s0 + $0x9c] ss:$36 sps:$4 sm:$0xff]  }
  0x11   :  { %1783 = vmatpush3.bf16.msra.mxu1 %v2029_v15  ;;  %1738 = vmatprep.subr.bf16.mxu0 %v2030_v16  ;;  %v2062_v44 = vld [vmem:[%s2723_s1 + $0x1c8] sm:$0xff]   ;;  %v2067_v49 = vld [vmem:[%s2723_s1 + $0x110] sm:$0xff]   ;;  %v2074_v54 = vld [vmem:[%s2723_s1 + $0x158] sm:$0xff]  }
  0x12   :  { %1784 = vmatprep.subr.bf16.mxu1 %v2031_v17  ;;  %v2063_v45 = vld [vmem:[%s2724_s0 + $0x48] ss:$36 sps:$4 sm:$0xff]   ;;  %v2068_v50 = vld [vmem:[%s2723_s1 + $0x1d0] sm:$0xff]   ;;  %v2076_v56 = vld [vmem:[%s2724_s0 + $0x98] ss:$36 sps:$4 sm:$0xff]  }
  0x13   :  { %v2065_v47 = vld [vmem:[%s2723_s1 + $0x188] sm:$0xff]   ;;  %v2069_v51 = vld [vmem:[%s2723_s1 + $0x190] sm:$0xff]   ;;  %v2077_v57 = vld [vmem:[%s2723_s1 + $0x118] sm:$0xff]  }
  0x14   :  { %1739 = vmatpush3.bf16.msra.mxu0 %v2032_v18  ;;  %v2075_v55 = vld [vmem:[%s2724_s0 + $0x90] ss:$36 sps:$4 sm:$0xff]   ;;  %v2078_v58 = vld [vmem:[%s2723_s1 + $0x1d8] sm:$0xff]   ;;  %v2080_v60 = vld [vmem:[%s2723_s1 + $0x160] sm:$0xff]  }
  0x15   :  { %1785 = vmatpush3.bf16.msra.mxu1 %v2033_v19  ;;  %1740 = vmatprep.subr.bf16.mxu0 %v2034_v20  ;;  %v2079_v59 = vld [vmem:[%s2723_s1 + $0x198] sm:$0xff]   ;;  %v2081_v61 = vld [vmem:[%s2723_s1 + $0x120] sm:$0xff]   ;;  %v2090_v4 = vld [vmem:[%s2723_s1 + $0x168] sm:$0xff]  }
  0x16   :  { %1786 = vmatprep.subr.bf16.mxu1 %v2035_v21  ;;  %v2082_v62 = vld [vmem:[%s2723_s1 + $0x1e0] sm:$0xff]   ;;  %v2088_v2 = vld [vmem:[%s2724_s0 + $0xd8] ss:$36 sps:$4 sm:$0xff]   ;;  %v2091_v5 = vld [vmem:[%s2723_s1 + $0x128] sm:$0xff]  }
  0x17   :  { %v2083_v63 = vld [vmem:[%s2724_s0 + $0xdc] ss:$36 sps:$4 sm:$0xff]   ;;  %v2085_v0 = vld [vmem:[%s2724_s0 + $0xe4] ss:$36 sps:$4 sm:$0xff]   ;;  %v2094_v8 = vld [vmem:[%s2723_s1 + $0x170] sm:$0xff]  }
  0x18   :  { %1741 = vmatpush3.bf16.msra.mxu0 %v2036_v22  ;;  %v2087_v1 = vld [vmem:[%s2723_s1 + $0x1a0] sm:$0xff]   ;;  %v2092_v6 = vld [vmem:[%s2723_s1 + $0x1e8] sm:$0xff]   ;;  %v2097_v14 = vld [vmem:[%s2723_s1 + $0x130] sm:$0xff]  }
  0x19   :  { %1787 = vmatpush3.bf16.msra.mxu1 %v2037_v23  ;;  %1742 = vmatprep.subr.bf16.mxu0 %v2038_v24  ;;  %v2089_v3 = vld [vmem:[%s2724_s0 + $0xe0] ss:$36 sps:$4 sm:$0xff]   ;;  %v2093_v7 = vld [vmem:[%s2723_s1 + $0x1a8] sm:$0xff]   ;;  %v2100_v16 = vld [vmem:[%s2723_s1 + $0x1f0] sm:$0xff]   ;;  %v2160_v24 = vmov 0.0  }
  0x1a   :  { %1788 = vmatprep.subr.bf16.mxu1 %v2039_v25  ;;  %v63_v9 = vld [vmem:[%s2724_s0 + $0x120] sm:$0xff]  ;;  %v64_v11 = vld [vmem:[%s2724_s0 + $0x128] sm:$0xff]  ;;  %v2101_v17 = vld [vmem:[%s2723_s1 + $0x1b0] sm:$0xff]  }
  0x1b   :  { %v1554_v10 = vcombine.high %v63_v9, %v63_v9  ;;  %v1553_v12 = vcombine.low %v63_v9, %v63_v9  ;;  %v1556_v13 = vcombine.high %v64_v11, %v64_v11  ;;  %v1555_v15 = vcombine.low %v64_v11, %v64_v11  ;;  %v2102_v18 = vld [vmem:[%s2723_s1 + $0x178] sm:$0xff]   ;;  %v2106_v22 = vld [vmem:[%s2724_s0 + $0x10] ss:$36 sps:$4 sm:$0xff]   ;;  %v2120_v33 = vld [vmem:[%s2724_s0 + $0x60] ss:$36 sps:$4 sm:$0xff]  }
  0x1c   :  { %1743 = vmatpush3.bf16.msra.mxu0 %v2040_v26  ;;  %v2103_v19 = vld [vmem:[%s2723_s1 + $0x138] sm:$0xff]   ;;  %v2122_v35 = vld [vmem:[%s2723_s1 + $0x210] sm:$0xff]   ;;  %v2614_v9 = vld [vmem:[%s2726_s2] ss:$0 sm:$0xff] }
  0x1d   :  { %1789 = vmatpush3.bf16.msra.mxu1 %v2041_v27  ;;  %1744 = vmatprep.subr.bf16.mxu0 %v2042_v28  ;;  %v2104_v20 = vld [vmem:[%s2723_s1 + $0x1f8] sm:$0xff]   ;;  %v2112_v27 = vld [vmem:[%s2723_s1 + $0x200] sm:$0xff]  }
  0x1e   :  { %1790 = vmatprep.subr.bf16.mxu1 %v2043_v29  ;;  %v2105_v21 = vld [vmem:[%s2723_s1 + $0x1b8] sm:$0xff]   ;;  %v2113_v28 = vld [vmem:[%s2725_s3] sm:$0xff]   ;;  %v2114_v29 = vld [vmem:[%s2723_s1 + $0x208] sm:$0xff]  }
  0x1f   :  { %v2108_v23 = vld [vmem:[%s2724_s0 + $0x14] ss:$36 sps:$4 sm:$0xff]   ;;  %v2111_v26 = vld [vmem:[%s2724_s0 + $0x1c] ss:$36 sps:$4 sm:$0xff]  }
  0x20   :  { %1745 = vmatpush3.bf16.msra.mxu0 %v2044_v30  ;;  %v2109_v25 = vld [vmem:[%s2724_s0 + $0x18] ss:$36 sps:$4 sm:$0xff]  }
  0x21   :  { %1791 = vmatpush3.bf16.msra.mxu1 %v2045_v31  ;;  %1822 = vmatprep.subr.bf16.mxu0 %v2052_v36  ;;  %v2115_v30 = vld [vmem:[%s2724_s0 + $0x5c] ss:$36 sps:$4 sm:$0xff]   ;;  %v2117_v31 = vld [vmem:[%s2724_s0 + $0x64] ss:$36 sps:$4 sm:$0xff]   ;;  %v2123_v36 = vld [vmem:[%s2725_s3 + $0x10] sm:$0xff]  }
  0x22   :  { %1868 = vmatprep.subr.bf16.mxu1 %v2054_v38  ;;  %v2126_v38 = vld [vmem:[%s2724_s0 + $0xac] ss:$36 sps:$4 sm:$0xff]  }
  0x23   :  { %900 = vmatmul.mubr.bf16.vlgmr.msra.gmra.mrb[0].mxu0 %v2046_v32  ;;  %v2119_v32 = vld [vmem:[%s2724_s0 + $0x58] ss:$36 sps:$4 sm:$0xff]  }
  0x24   :  { %972 = vmatmul.mubr.bf16.vlgmr.msra.gmra.mrb[0].mxu1 %v2049_v34  ;;  %1823 = vmatpush3.bf16.msra.mxu0 %v2053_v37  ;;  %v2121_v34 = vld [vmem:[%s2725_s3 + $0x8] sm:$0xff]  }
  0x25   :  { %1869 = vmatpush3.bf16.msra.mxu1 %v2055_v39  ;;  %1824 = vmatprep.subr.bf16.mxu0 %v2056_v40  ;;  %v2124_v37 = vld [vmem:[%s2724_s0 + $0xa4] ss:$36 sps:$4 sm:$0xff]   ;;  %v2130_v40 = vld [vmem:[%s2723_s1 + $0x218] sm:$0xff]  }
  0x26   :  { %907 = vmatprep.mubr.bf16.mxu0 %v2058_v42  ;;  %979 = vmatprep.mubr.bf16.mxu1 %v2060_v43  ;;  %v2128_v39 = vld [vmem:[%s2724_s0 + $0xa0] ss:$36 sps:$4 sm:$0xff]   ;;  %v2131_v42 = vld [vmem:[%s2725_s3 + $0x18] sm:$0xff]  }
  0x27   :  { %1870 = vmatprep.subr.bf16.mxu1 %v2062_v44  ;;  %v2132_v43 = vld [vmem:[%s2723_s1 + $0x220] sm:$0xff]   ;;  %v2133_v44 = vld [vmem:[%s2724_s0 + $0xec] ss:$36 sps:$4 sm:$0xff]  }
  0x28   :  { %1825 = vmatpush3.bf16.msra.mxu0 %v2057_v41  ;;  %v2129_v41 = vld [vmem:[%s2724_s0 + $0xa8] ss:$36 sps:$4 sm:$0xff]  }
  0x29   :  { %1871 = vmatpush3.bf16.msra.mxu1 %v2065_v47  ;;  %1826 = vmatprep.subr.bf16.mxu0 %v2066_v48  ;;  %v2140_v47 = vld [vmem:[%s2723_s1 + $0x228] sm:$0xff]  }
  0x2a   :  { %1872 = vmatprep.subr.bf16.mxu1 %v2068_v50  ;;  %v2141_v48 = vld [vmem:[%s2725_s3 + $0x28] sm:$0xff]   ;;  %v66_v50 = vld [vmem:[%s2724_s0 + $0x138] sm:$0xff] }
  0x2b   :  { %908 = vmatmul.mubr.bf16.gmra.mrb[4].mxu0 %v2063_v45  ;;  %v2135_v45 = vld [vmem:[%s2724_s0 + $0xf4] ss:$36 sps:$4 sm:$0xff]  }
  0x2c   :  { %980 = vmatmul.mubr.bf16.gmra.mrb[4].mxu1 %v2064_v46  ;;  %1827 = vmatpush3.bf16.msra.mxu0 %v2067_v49  ;;  %v2137_v46 = vld [vmem:[%s2725_s3 + $0x20] sm:$0xff]   ;;  %v65_v49 = vld [vmem:[%s2724_s0 + $0x130] sm:$0xff] }
  0x2d   :  { %1873 = vmatpush3.bf16.msra.mxu1 %v2069_v51  ;;  %915 = vmatprep.mubr.bf16.mxu0 %v2070_v52  ;;  %v2138_v51 = vld [vmem:[%s2724_s0 + $0xe8] ss:$36 sps:$4 sm:$0xff]   ;;  %v2139_v52 = vld [vmem:[%s2724_s0 + $0xf0] ss:$36 sps:$4 sm:$0xff]  }
  0x2e   :  { %987 = vmatprep.mubr.bf16.mxu1 %v2072_v53  ;;  %1828 = vmatprep.subr.bf16.mxu0 %v2074_v54  ;;  %v1558_v53 = vcombine.high %v65_v49, %v65_v49  ;;  %v1560_v54 = vcombine.high %v66_v50, %v66_v50 }
  0x2f   :  { %1874 = vmatprep.subr.bf16.mxu1 %v2078_v58  ;;  %v2149_v58 = vld [vmem:[%s2725_s3 + $0x38] sm:$0xff]  }
  0x30   :  { %1829 = vmatpush3.bf16.msra.mxu0 %v2077_v57  ;;  %v2148_v57 = vld [vmem:[%s2723_s1 + $0x238] sm:$0xff]  }
  0x31   :  { %1875 = vmatpush3.bf16.msra.mxu1 %v2079_v59  ;;  %1830 = vmatprep.subr.bf16.mxu0 %v2080_v60  ;;  %v1557_v59 = vcombine.low %v65_v49, %v65_v49  ;;  %v1559_v60 = vcombine.low %v66_v50, %v66_v50 }
  0x32   :  { %1876 = vmatprep.subr.bf16.mxu1 %v2082_v62  ;;  %v2151_v62 = vld [vmem:[%s2724_s0 + $0x10] ss:$36 sps:$4 sm:$0xff]  }
  0x33   :  { %916 = vmatmul.mubr.bf16.gmra.mrb[8].mxu0 %v2075_v55  ;;  %v2144_v55 = vld [vmem:[%s2723_s1 + $0x230] sm:$0xff]  }
  0x34   :  { %988 = vmatmul.mubr.bf16.gmra.mrb[8].mxu1 %v2076_v56  ;;  %1831 = vmatpush3.bf16.msra.mxu0 %v2081_v61  ;;  %v2147_v56 = vld [vmem:[%s2725_s3 + $0x30] sm:$0xff]   ;;  %v2150_v61 = vld [vmem:[%s2724_s0 + $0x20] ss:$36 sps:$4 sm:$0xff]  }
  0x35   :  { %923 = vmatprep.mubr.bf16.mxu0 %v2083_v63  ;;  %995 = vmatprep.mubr.bf16.mxu1 %v2085_v0  ;;  %v2152_v63 = vld [vmem:[%s2724_s0 + $0x68] ss:$36 sps:$4 sm:$0xff]   ;;  %v2153_v0 = vld [vmem:[%s2724_s0 + $0x58] ss:$36 sps:$4 sm:$0xff]  }
  0x36   :  { %1877 = vmatpush3.bf16.msra.mxu1 %v2087_v1  ;;  %1832 = vmatprep.subr.bf16.mxu0 %v2090_v4  ;;  %v2154_v1 = vld [vmem:[%s2724_s0 + $0xb0] ss:$36 sps:$4 sm:$0xff]   ;;  %v2157_v4 = vld [vmem:[%s2724_s0 + $0xe8] ss:$36 sps:$4 sm:$0xff]  }
  0x37   :  { %1878 = vmatprep.subr.bf16.mxu1 %v2092_v6  ;;  %v2159_v6 = vld [vmem:[%s2724_s0 + $0x130] ss:$0 sps:$4 sm:$0xff]  }
  0x38   :  { %1833 = vmatpush3.bf16.msra.mxu0 %v2091_v5  ;;  %v2158_v5 = vld [vmem:[%s2724_s0 + $0x140] ss:$0 sps:$4 sm:$0xff]  }
  0x39   :  { %1834 = vmatprep.subr.bf16.mxu0 %v2094_v8 }
  0x3a   :  { %1879 = vmatpush3.bf16.msra.mxu1 %v2093_v7 }
  0x3b   :  { %924 = vmatmul.mubr.bf16.gmra.mrb[12].mxu0 %v2088_v2  ;;  %1880 = vmatprep.subr.bf16.mxu1 %v2100_v16  ;;  %v2155_v2 = vld [vmem:[%s2724_s0 + $0xa0] ss:$36 sps:$4 sm:$0xff]  }
  0x3c   :  { %996 = vmatmul.mubr.bf16.gmra.mrb[12].mxu1 %v2089_v3  ;;  %931 = vmatprep.mubr.bf16.mxu0 %v1554_v10  ;;  %v2156_v3 = vld [vmem:[%s2724_s0 + $0xf8] ss:$36 sps:$4 sm:$0xff]  }
  0x3d   :  { %1003 = vmatprep.mubr.bf16.mxu1 %v1556_v13  ;;  %1835 = vmatpush3.bf16.msra.mxu0 %v2097_v14 }
  0x3e   :  { %1881 = vmatpush3.bf16.msra.mxu1 %v2101_v17  ;;  %1836 = vmatprep.subr.bf16.mxu0 %v2102_v18 }
  0x3f   :  { %1882 = vmatprep.subr.bf16.mxu1 %v2104_v20 }
  0x41   :  { %1837 = vmatpush3.bf16.msra.mxu0 %v2103_v19 }
  0x42   :  { %1940 = vmatprep.subr.bf16.mxu0 %v2160_v24  ;;  %1883 = vmatpush3.bf16.msra.mxu1 %v2105_v21 }
  0x43   :  { %932 = vmatmul.mubr.bf16.gmra.mrb[16].mxu0 %v1553_v12  ;;  %1976 = vmatprep.subr.bf16.mxu1 %v2160_v24 }
  0x44   :  { %1004 = vmatmul.mubr.bf16.gmra.mrb[16].mxu1 %v1555_v15  ;;  %1043 = vmatprep.mubr.bf16.mxu0 %v2108_v23 }
  0x45   :  { %1115 = vmatprep.mubr.bf16.mxu1 %v2111_v26 }
  0x4b   :  { %1044 = vmatmul.mubr.bf16.vlgmr.msra.gmra.mrb[20].mxu0 %v2106_v22 }
  0x4c   :  { %1116 = vmatmul.mubr.bf16.vlgmr.msra.gmra.mrb[20].mxu1 %v2109_v25  ;;  %1941 = vmatpush3.bf16.msra.mxu0 %v2112_v27 }
  0x4d   :  { %1977 = vmatpush3.bf16.msra.mxu1 %v2113_v28  ;;  %1942 = vmatprep.subr.bf16.mxu0 %v2160_v24 }
  0x4e   :  { %1051 = vmatprep.mubr.bf16.mxu0 %v2115_v30  ;;  %1978 = vmatprep.subr.bf16.mxu1 %v2160_v24 }
  0x4f   :  { %1123 = vmatprep.mubr.bf16.mxu1 %v2117_v31 }
  0x50   :  { %1943 = vmatpush3.bf16.msra.mxu0 %v2114_v29 }
  0x51   :  { %1979 = vmatpush3.bf16.msra.mxu1 %v2121_v34  ;;  %1944 = vmatprep.subr.bf16.mxu0 %v2160_v24 }
  0x52   :  { %1980 = vmatprep.subr.bf16.mxu1 %v2160_v24 }
  0x53   :  { %1052 = vmatmul.mubr.bf16.gmra.mrb[24].mxu0 %v2119_v32 }
  0x54   :  { %1124 = vmatmul.mubr.bf16.gmra.mrb[24].mxu1 %v2120_v33  ;;  %1945 = vmatpush3.bf16.msra.mxu0 %v2122_v35 }
  0x55   :  { %1981 = vmatpush3.bf16.msra.mxu1 %v2123_v36  ;;  %1059 = vmatprep.mubr.bf16.mxu0 %v2124_v37 }
  0x56   :  { %1131 = vmatprep.mubr.bf16.mxu1 %v2126_v38  ;;  %1946 = vmatprep.subr.bf16.mxu0 %v2160_v24 }
  0x57   :  { %1982 = vmatprep.subr.bf16.mxu1 %v2160_v24 }
  0x58   :  { %1947 = vmatpush3.bf16.msra.mxu0 %v2130_v40 }
  0x59   :  { %1983 = vmatpush3.bf16.msra.mxu1 %v2131_v42  ;;  %1948 = vmatprep.subr.bf16.mxu0 %v2160_v24 }
  0x5a   :  { %1984 = vmatprep.subr.bf16.mxu1 %v2160_v24 }
  0x5b   :  { %1060 = vmatmul.mubr.bf16.gmra.mrb[28].mxu0 %v2128_v39 }
  0x5c   :  { %1132 = vmatmul.mubr.bf16.gmra.mrb[28].mxu1 %v2129_v41  ;;  %1949 = vmatpush3.bf16.msra.mxu0 %v2132_v43 }
  0x5d   :  { %1067 = vmatprep.mubr.bf16.mxu0 %v2133_v44  ;;  %1139 = vmatprep.mubr.bf16.mxu1 %v2135_v45 }
  0x5e   :  { %1985 = vmatpush3.bf16.msra.mxu1 %v2137_v46  ;;  %1950 = vmatprep.subr.bf16.mxu0 %v2160_v24 }
  0x5f   :  { %1986 = vmatprep.subr.bf16.mxu1 %v2160_v24 }
  0x60   :  { %1951 = vmatpush3.bf16.msra.mxu0 %v2140_v47 }
  0x61   :  { %1952 = vmatprep.subr.bf16.mxu0 %v2160_v24 }
  0x62   :  { %1987 = vmatpush3.bf16.msra.mxu1 %v2141_v48 }
  0x63   :  { %1068 = vmatmul.mubr.bf16.gmra.mrb[32].mxu0 %v2138_v51  ;;  %1988 = vmatprep.subr.bf16.mxu1 %v2160_v24 }
  0x64   :  { %1140 = vmatmul.mubr.bf16.gmra.mrb[32].mxu1 %v2139_v52  ;;  %1075 = vmatprep.mubr.bf16.mxu0 %v1558_v53 }
  0x65   :  { %1147 = vmatprep.mubr.bf16.mxu1 %v1560_v54  ;;  %1953 = vmatpush3.bf16.msra.mxu0 %v2144_v55 }
  0x66   :  { %1989 = vmatpush3.bf16.msra.mxu1 %v2147_v56  ;;  %1954 = vmatprep.subr.bf16.mxu0 %v2160_v24 }
  0x67   :  { %1990 = vmatprep.subr.bf16.mxu1 %v2160_v24 }
  0x69   :  { %1955 = vmatpush3.bf16.msra.mxu0 %v2148_v57 }
  0x6a   :  { %1991 = vmatpush3.bf16.msra.mxu1 %v2149_v58 }
  0x6b   :  { %1076 = vmatmul.mubr.bf16.gmra.mrb[36].mxu0 %v1557_v59 }
  0x6c   :  { %1148 = vmatmul.mubr.bf16.gmra.mrb[36].mxu1 %v1559_v60  ;;  %1956 = vmatprep.mubr.msk.bf16.mxu0 %vm2161_vm0, %v2160_v24 }
  0x6d   :  { %1992 = vmatprep.mubr.msk.bf16.mxu1 %vm2161_vm0, %v2160_v24 }
  0x73   :  { %1957 = vmatmul.mubr.bf16.vlgmr.msra.gmra.mrb[40].mxu0 %v2150_v61 }
  0x74   :  { %1993 = vmatmul.mubr.bf16.vlgmr.msra.gmra.mrb[40].mxu1 %v2151_v62  ;;  %1960 = vmatprep.mubr.msk.bf16.mxu0 %vm2161_vm0, %v2160_v24 }
  0x75   :  { %1996 = vmatprep.mubr.msk.bf16.mxu1 %vm2161_vm0, %v2160_v24 }
  0x7b   :  { %1961 = vmatmul.mubr.bf16.gmra.mrb[44].mxu0 %v2152_v63 }
  0x7c   :  { %1997 = vmatmul.mubr.bf16.gmra.mrb[44].mxu1 %v2153_v0  ;;  %1964 = vmatprep.mubr.msk.bf16.mxu0 %vm2161_vm0, %v2160_v24 }
  0x7d   :  { %2000 = vmatprep.mubr.msk.bf16.mxu1 %vm2161_vm0, %v2160_v24 }
  0x83   :  { %1965 = vmatmul.mubr.bf16.gmra.mrb[48].mxu0 %v2154_v1 }
  0x84   :  { %2001 = vmatmul.mubr.bf16.gmra.mrb[48].mxu1 %v2155_v2  ;;  %1968 = vmatprep.mubr.msk.bf16.mxu0 %vm2161_vm0, %v2160_v24 }
  0x85   :  { %2004 = vmatprep.mubr.msk.bf16.mxu1 %vm2161_vm0, %v2160_v24 }
  0x8b   :  { %1969 = vmatmul.mubr.bf16.gmra.mrb[52].mxu0 %v2156_v3 }
  0x8c   :  { %2005 = vmatmul.mubr.bf16.gmra.mrb[52].mxu1 %v2157_v4  ;;  %1972 = vmatprep.mubr.msk.bf16.mxu0 %vm2161_vm0, %v2160_v24 }
  0x8d   :  { %2008 = vmatprep.mubr.msk.bf16.mxu1 %vm2161_vm0, %v2160_v24 }
  0x93   :  { %1973 = vmatmul.mubr.bf16.gmra.mrb[56].mxu0 %v2158_v5 }
  0x94   :  { %2009 = vmatmul.mubr.bf16.gmra.mrb[56].mxu1 %v2159_v6 }
  0xf6   :  { %v1746_v7 = vpop.f32.mrb[0].mxu0 }
  0xf7   :  { %v1792_v8 = vpop.f32.mrb[0].mxu1  ;;  %v1747_v10 = vpop.f32.mrb[1].mxu0 }
  0xf8   :  { %v1748_v11 = vadd.f32 %v1747_v10, %v1746_v7  ;;  %v1793_v12 = vpop.f32.mrb[1].mxu1  ;;  %v1749_v13 = vpop.f32.mrb[2].mxu0 }
  0xf9   :  { %v1794_v14 = vadd.f32 %v1793_v12, %v1792_v8  ;;  %v1795_v15 = vpop.f32.mrb[2].mxu1  ;;  %v1750_v16 = vpop.f32.mrb[3].mxu0 }
  0xfa   :  { %v902_v17 = vadd.f32 %v1748_v11, %v2614_v9  ;;  %v1751_v18 = vadd.f32 %v1750_v16, %v1749_v13  ;;  %v1796_v19 = vpop.f32.mrb[3].mxu1 }
  0xfb   :  { %v1797_v20 = vadd.f32 %v1796_v19, %v1795_v15 }
  0xfc   :  { %v2617_v21 = vadd.f32 %v1794_v14, %v902_v17  ;;  %v905_v22 = vadd.f32 %v1751_v18, %v2614_v9 }
  0xfe   :  { %v2620_v23 = vadd.f32 %v1797_v20, %v905_v22  ;;  %v1752_v24 = vpop.f32.mrb[4].mxu0 }
  0xff   :  { %v1798_v25 = vpop.f32.mrb[4].mxu1  ;;  %v1753_v26 = vpop.f32.mrb[5].mxu0 }
 0x100   :  { %v1754_v27 = vadd.f32 %v1753_v26, %v1752_v24  ;;  %v1799_v28 = vpop.f32.mrb[5].mxu1  ;;  %v1755_v29 = vpop.f32.mrb[6].mxu0 }
 0x101   :  { %v1800_v30 = vadd.f32 %v1799_v28, %v1798_v25  ;;  %v1801_v31 = vpop.f32.mrb[6].mxu1  ;;  %v1756_v32 = vpop.f32.mrb[7].mxu0 }
 0x102   :  { %v910_v33 = vadd.f32 %v1754_v27, %v2614_v9  ;;  %v1757_v34 = vadd.f32 %v1756_v32, %v1755_v29  ;;  %v1802_v35 = vpop.f32.mrb[7].mxu1 }
 0x103   :  { %v1803_v36 = vadd.f32 %v1802_v35, %v1801_v31 }
 0x104   :  { %v2623_v37 = vadd.f32 %v1800_v30, %v910_v33  ;;  %v913_v38 = vadd.f32 %v1757_v34, %v2614_v9 }
 0x106   :  { %v2626_v39 = vadd.f32 %v1803_v36, %v913_v38  ;;  %v1758_v40 = vpop.f32.mrb[8].mxu0 }
 0x107   :  { %v1804_v41 = vpop.f32.mrb[8].mxu1  ;;  %v1759_v42 = vpop.f32.mrb[9].mxu0 }
 0x108   :  { %v1760_v43 = vadd.f32 %v1759_v42, %v1758_v40  ;;  %v1805_v44 = vpop.f32.mrb[9].mxu1  ;;  %v1761_v45 = vpop.f32.mrb[10].mxu0 }
 0x109   :  { %v1806_v46 = vadd.f32 %v1805_v44, %v1804_v41  ;;  %v1807_v47 = vpop.f32.mrb[10].mxu1  ;;  %v1762_v48 = vpop.f32.mrb[11].mxu0 }
 0x10a   :  { %v918_v49 = vadd.f32 %v1760_v43, %v2614_v9  ;;  %v1763_v50 = vadd.f32 %v1762_v48, %v1761_v45  ;;  %v1808_v51 = vpop.f32.mrb[11].mxu1 }
 0x10b   :  { %v1809_v52 = vadd.f32 %v1808_v51, %v1807_v47 }
 0x10c   :  { %v2629_v53 = vadd.f32 %v1806_v46, %v918_v49  ;;  %v921_v54 = vadd.f32 %v1763_v50, %v2614_v9 }
 0x10e   :  { %v2632_v55 = vadd.f32 %v1809_v52, %v921_v54  ;;  %v1764_v56 = vpop.f32.mrb[12].mxu0 }
 0x10f   :  { %v1810_v57 = vpop.f32.mrb[12].mxu1  ;;  %v1765_v58 = vpop.f32.mrb[13].mxu0 }
 0x110   :  { %v1811_v59 = vpop.f32.mrb[13].mxu1  ;;  %v1766_v60 = vadd.f32 %v1765_v58, %v1764_v56  ;;  %v1767_v62 = vpop.f32.mrb[14].mxu0 }
 0x111   :  { %v1812_v61 = vadd.f32 %v1811_v59, %v1810_v57  ;;  %v1813_v63 = vpop.f32.mrb[14].mxu1  ;;  %v1768_v0 = vpop.f32.mrb[15].mxu0 }
 0x112   :  { %v1814_v1 = vpop.f32.mrb[15].mxu1  ;;  %v926_v2 = vadd.f32 %v1766_v60, %v2614_v9  ;;  %v1769_v3 = vadd.f32 %v1768_v0, %v1767_v62 }
 0x113   :  { %v1815_v4 = vadd.f32 %v1814_v1, %v1813_v63 }
 0x114   :  { %v2635_v5 = vadd.f32 %v1812_v61, %v926_v2  ;;  %v929_v6 = vadd.f32 %v1769_v3, %v2614_v9 }
 0x116   :  { %v2638_v7 = vadd.f32 %v1815_v4, %v929_v6  ;;  %v1770_v8 = vpop.f32.mrb[16].mxu0 }
 0x117   :  { %v1816_v10 = vpop.f32.mrb[16].mxu1  ;;  %v1771_v11 = vpop.f32.mrb[17].mxu0 }
 0x118   :  { %v1817_v12 = vpop.f32.mrb[17].mxu1  ;;  %v1772_v13 = vadd.f32 %v1771_v11, %v1770_v8  ;;  %v1773_v15 = vpop.f32.mrb[18].mxu0 }
 0x119   :  { %v1818_v14 = vadd.f32 %v1817_v12, %v1816_v10  ;;  %v1819_v16 = vpop.f32.mrb[18].mxu1  ;;  %v1774_v17 = vpop.f32.mrb[19].mxu0 }
 0x11a   :  { %v1820_v18 = vpop.f32.mrb[19].mxu1  ;;  %v934_v19 = vadd.f32 %v1772_v13, %v2614_v9 }
 0x11c   :  { %v2641_v20 = vadd.f32 %v1818_v14, %v934_v19 }
 0x11e   :  { %v1838_v22 = vpop.f32.mrb[20].mxu0 }
 0x11f   :  { %v1884_v24 = vpop.f32.mrb[20].mxu1  ;;  %v1839_v25 = vpop.f32.mrb[21].mxu0 }
 0x120   :  { %v1840_v26 = vadd.f32 %v1839_v25, %v1838_v22  ;;  %v1885_v27 = vpop.f32.mrb[21].mxu1  ;;  %v1841_v28 = vpop.f32.mrb[22].mxu0 }
 0x121   :  { %v1886_v29 = vadd.f32 %v1885_v27, %v1884_v24  ;;  %v1887_v30 = vpop.f32.mrb[22].mxu1  ;;  %v1842_v31 = vpop.f32.mrb[23].mxu0 }
 0x122   :  { %v1046_v32 = vadd.f32 %v1840_v26, %v2617_v21  ;;  %v1843_v33 = vadd.f32 %v1842_v31, %v1841_v28  ;;  %v1888_v34 = vpop.f32.mrb[23].mxu1 }
 0x123   :  { %v1889_v35 = vadd.f32 %v1888_v34, %v1887_v30 }
 0x124   :  { %v1049_v36 = vadd.f32 %v1843_v33, %v2620_v23  ;;  %v2645_v38 = vadd.f32 %v1886_v29, %v1046_v32 }
 0x126   :  { %v1844_v9 = vpop.f32.mrb[24].mxu0  ;;  %v2647_v40 = vadd.f32 %v1889_v35, %v1049_v36 }
 0x127   :  { %v1890_v41 = vpop.f32.mrb[24].mxu1  ;;  %v1845_v42 = vpop.f32.mrb[25].mxu0 }
 0x128   :  { %v1846_v43 = vadd.f32 %v1845_v42, %v1844_v9  ;;  %v1891_v44 = vpop.f32.mrb[25].mxu1  ;;  %v1847_v45 = vpop.f32.mrb[26].mxu0 }
 0x129   :  { %v1892_v46 = vadd.f32 %v1891_v44, %v1890_v41  ;;  %v1893_v47 = vpop.f32.mrb[26].mxu1  ;;  %v1848_v48 = vpop.f32.mrb[27].mxu0 }
 0x12a   :  { %v1054_v21 = vadd.f32 %v1846_v43, %v2623_v37  ;;  %v1849_v49 = vadd.f32 %v1848_v48, %v1847_v45  ;;  %v1894_v50 = vpop.f32.mrb[27].mxu1 }
 0x12b   :  { %v1895_v51 = vadd.f32 %v1894_v50, %v1893_v47 }
 0x12c   :  { %v1057_v23 = vadd.f32 %v1849_v49, %v2626_v39  ;;  %v2651_v52 = vadd.f32 %v1892_v46, %v1054_v21 }
 0x12e   :  { %v1850_v54 = vpop.f32.mrb[28].mxu0  ;;  %v2653_v56 = vadd.f32 %v1895_v51, %v1057_v23 }
 0x12f   :  { %v1896_v57 = vpop.f32.mrb[28].mxu1  ;;  %v1851_v58 = vpop.f32.mrb[29].mxu0 }
 0x130   :  { %v1852_v59 = vadd.f32 %v1851_v58, %v1850_v54  ;;  %v1897_v60 = vpop.f32.mrb[29].mxu1  ;;  %v1853_v61 = vpop.f32.mrb[30].mxu0 }
 0x131   :  { %v1898_v62 = vadd.f32 %v1897_v60, %v1896_v57  ;;  %v1899_v63 = vpop.f32.mrb[30].mxu1  ;;  %v1854_v0 = vpop.f32.mrb[31].mxu0 }
 0x132   :  { %v1062_v37 = vadd.f32 %v1852_v59, %v2629_v53  ;;  %v1855_v1 = vadd.f32 %v1854_v0, %v1853_v61  ;;  %v1900_v2 = vpop.f32.mrb[31].mxu1 }
 0x133   :  { %v1901_v3 = vadd.f32 %v1900_v2, %v1899_v63 }
 0x134   :  { %v1065_v39 = vadd.f32 %v1855_v1, %v2632_v55  ;;  %v2657_v4 = vadd.f32 %v1898_v62, %v1062_v37 }
 0x136   :  { %v1856_v6 = vpop.f32.mrb[32].mxu0  ;;  %v2659_v8 = vadd.f32 %v1901_v3, %v1065_v39 }
 0x137   :  { %v1902_v10 = vpop.f32.mrb[32].mxu1  ;;  %v1857_v11 = vpop.f32.mrb[33].mxu0 }
 0x138   :  { %v1858_v12 = vadd.f32 %v1857_v11, %v1856_v6  ;;  %v1903_v13 = vpop.f32.mrb[33].mxu1  ;;  %v1859_v14 = vpop.f32.mrb[34].mxu0 }
 0x139   :  { %v1904_v15 = vadd.f32 %v1903_v13, %v1902_v10  ;;  %v1905_v16 = vpop.f32.mrb[34].mxu1  ;;  %v1860_v17 = vpop.f32.mrb[35].mxu0 }
 0x13a   :  { %v1070_v53 = vadd.f32 %v1858_v12, %v2635_v5  ;;  %v1861_v18 = vadd.f32 %v1860_v17, %v1859_v14  ;;  %v1906_v19 = vpop.f32.mrb[35].mxu1 }
 0x13b   :  { %v1907_v22 = vadd.f32 %v1906_v19, %v1905_v16 }
 0x13c   :  { %v1073_v55 = vadd.f32 %v1861_v18, %v2638_v7  ;;  %v2663_v24 = vadd.f32 %v1904_v15, %v1070_v53  ;;  %v2673_v7 = vld [vmem:[%s2727_s4] ss:$0 sm:$0xff] }
 0x13e   :  { %v1862_v25 = vpop.f32.mrb[36].mxu0  ;;  %v2665_v26 = vadd.f32 %v1907_v22, %v1073_v55 }
 0x13f   :  { %v1908_v27 = vpop.f32.mrb[36].mxu1  ;;  %v1863_v28 = vpop.f32.mrb[37].mxu0 }
 0x140   :  { %v1864_v29 = vadd.f32 %v1863_v28, %v1862_v25  ;;  %v1909_v30 = vpop.f32.mrb[37].mxu1  ;;  %v1865_v31 = vpop.f32.mrb[38].mxu0 }
 0x141   :  { %v1910_v32 = vadd.f32 %v1909_v30, %v1908_v27  ;;  %v1911_v33 = vpop.f32.mrb[38].mxu1  ;;  %v1866_v34 = vpop.f32.mrb[39].mxu0 }
 0x142   :  { %v1078_v5 = vadd.f32 %v1864_v29, %v2641_v20  ;;  %v1912_v35 = vpop.f32.mrb[39].mxu1 }
 0x144   :  { %v2668_v36 = vadd.f32 %v1910_v32, %v1078_v5 }
 0x146   :  { %v1189_v9 = vpop.f32.mrb[40].mxu0 }
 0x147   :  { %v1190_v41 = vadd.f32 %v1189_v9, %v2645_v38  ;;  %v1378_v42 = vpop.f32.mrb[40].mxu1  ;;  %v1958_v43 = vpop.f32.mrb[41].mxu0 }
 0x148   :  { %v1379_v44 = vadd.f32 %v2673_v7, %v1378_v42  ;;  %v1994_v45 = vpop.f32.mrb[41].mxu1  ;;  %v1192_v46 = vpop.f32.mrb[42].mxu0 }
 0x149   :  { %v1193_v47 = vadd.f32 %v1192_v46, %v2647_v40  ;;  %v1381_v20 = vpop.f32.mrb[42].mxu1  ;;  %v1959_v48 = vpop.f32.mrb[43].mxu0  ;;  %v1227_v50 = vmax.f32 %v1190_v41, 0.0 }
 0x14a   :  { %v1382_v21 = vadd.f32 %v2673_v7, %v1381_v20  ;;  %v1995_v49 = vpop.f32.mrb[43].mxu1 }
 0x14b   :  { %v1228_v51 = vmax.f32 %v1193_v47, 0.0 }
 0x14c   :  { %v1707_v23 = vpack.c.bf16 %v1382_v21, %v1379_v44 }
 0x14d   :  { %v1687_v54 = vpack.c.bf16 %v1228_v51, %v1227_v50 }
 0x14e   :  { %1708 = vst [vmem:[%s2728_s6] sm:$0xff] %v1707_v23   ;;  %v1197_v38 = vpop.f32.mrb[44].mxu0 }
 0x14f   :  { %1688 = vst [vmem:[%s2729_s5] sm:$0xff] %v1687_v54   ;;  %v1198_v40 = vadd.f32 %v1197_v38, %v2651_v52  ;;  %v1386_v57 = vpop.f32.mrb[44].mxu1  ;;  %v1962_v58 = vpop.f32.mrb[45].mxu0 }
 0x150   :  { %v1387_v59 = vadd.f32 %v2673_v7, %v1386_v57  ;;  %v1998_v60 = vpop.f32.mrb[45].mxu1  ;;  %v1200_v61 = vpop.f32.mrb[46].mxu0 }
 0x151   :  { %v1201_v62 = vadd.f32 %v1200_v61, %v2653_v56  ;;  %v1389_v63 = vpop.f32.mrb[46].mxu1  ;;  %v1963_v0 = vpop.f32.mrb[47].mxu0  ;;  %v1229_v2 = vmax.f32 %v1198_v40, 0.0 }
 0x152   :  { %v1390_v37 = vadd.f32 %v2673_v7, %v1389_v63  ;;  %v1999_v1 = vpop.f32.mrb[47].mxu1 }
 0x153   :  { %v1230_v3 = vmax.f32 %v1201_v62, 0.0 }
 0x154   :  { %v1712_v39 = vpack.c.bf16 %v1390_v37, %v1387_v59 }
 0x155   :  { %v1692_v6 = vpack.c.bf16 %v1230_v3, %v1229_v2 }
 0x156   :  { %1727 = vst [vmem:[%s2728_s6 + $0x8] sm:$0xff] %v1712_v39   ;;  %v1205_v52 = vpop.f32.mrb[48].mxu0 }
 0x157   :  { %1724 = vst [vmem:[%s2729_s5 + $0x8] sm:$0xff] %v1692_v6   ;;  %v1206_v56 = vadd.f32 %v1205_v52, %v2657_v4  ;;  %v1394_v10 = vpop.f32.mrb[48].mxu1  ;;  %v1966_v11 = vpop.f32.mrb[49].mxu0 }
 0x158   :  { %v1395_v12 = vadd.f32 %v2673_v7, %v1394_v10  ;;  %v2002_v13 = vpop.f32.mrb[49].mxu1  ;;  %v1208_v14 = vpop.f32.mrb[50].mxu0 }
 0x159   :  { %v1209_v15 = vadd.f32 %v1208_v14, %v2659_v8  ;;  %v1397_v16 = vpop.f32.mrb[50].mxu1  ;;  %v1967_v17 = vpop.f32.mrb[51].mxu0  ;;  %v1231_v19 = vmax.f32 %v1206_v56, 0.0 }
 0x15a   :  { %v1398_v53 = vadd.f32 %v2673_v7, %v1397_v16  ;;  %v2003_v18 = vpop.f32.mrb[51].mxu1 }
 0x15b   :  { %v1232_v22 = vmax.f32 %v1209_v15, 0.0 }
 0x15c   :  { %v1717_v55 = vpack.c.bf16 %v1398_v53, %v1395_v12 }
 0x15d   :  { %v1697_v25 = vpack.c.bf16 %v1232_v22, %v1231_v19 }
 0x15e   :  { %1728 = vst [vmem:[%s2728_s6 + $0x10] sm:$0xff] %v1717_v55   ;;  %v1213_v4 = vpop.f32.mrb[52].mxu0 }
 0x15f   :  { %1725 = vst [vmem:[%s2729_s5 + $0x10] sm:$0xff] %v1697_v25   ;;  %v1214_v8 = vadd.f32 %v1213_v4, %v2663_v24  ;;  %v1402_v27 = vpop.f32.mrb[52].mxu1  ;;  %v1970_v28 = vpop.f32.mrb[53].mxu0 }
 0x160   :  { %v1403_v29 = vadd.f32 %v2673_v7, %v1402_v27  ;;  %v2006_v30 = vpop.f32.mrb[53].mxu1  ;;  %v1216_v31 = vpop.f32.mrb[54].mxu0 }
 0x161   :  { %v1217_v32 = vadd.f32 %v1216_v31, %v2665_v26  ;;  %v1405_v33 = vpop.f32.mrb[54].mxu1  ;;  %v1971_v34 = vpop.f32.mrb[55].mxu0  ;;  %v1233_v9 = vmax.f32 %v1214_v8, 0.0 }
 0x162   :  { %v1406_v5 = vadd.f32 %v2673_v7, %v1405_v33  ;;  %v2007_v35 = vpop.f32.mrb[55].mxu1 }
 0x163   :  { %v1234_v41 = vmax.f32 %v1217_v32, 0.0 }
 0x164   :  { %v1722_v42 = vpack.c.bf16 %v1406_v5, %v1403_v29 }
 0x165   :  { %v1702_v43 = vpack.c.bf16 %v1234_v41, %v1233_v9 }
 0x166   :  { %1729 = vst [vmem:[%s2728_s6 + $0x18] sm:$0xff] %v1722_v42   ;;  %v1221_v24 = vpop.f32.mrb[56].mxu0 }
 0x167   :  { %1726 = vst [vmem:[%s2729_s5 + $0x18] sm:$0xff] %v1702_v43   ;;  %v1222_v26 = vadd.f32 %v1221_v24, %v2668_v36  ;;  %v1410_v44 = vpop.f32.mrb[56].mxu1  ;;  %v1974_v45 = vpop.f32.mrb[57].mxu0 }
 0x168   :  { %v1411_v46 = vadd.f32 %v2673_v7, %v1410_v44  ;;  %v2010_v47 = vpop.f32.mrb[57].mxu1  ;;  %v1224_v20 = vpop.f32.mrb[58].mxu0 }
 0x169   :  { %v1235_v48 = vmax.f32 %v1222_v26, 0.0  ;;  %v1413_v21 = vpop.f32.mrb[58].mxu1  ;;  %v1975_v49 = vpop.f32.mrb[59].mxu0 }
 0x16a   :  { %v1683_v50 = vpack.c.bf16 %v1411_v46, %v1411_v46  ;;  %v2011_v51 = vpop.f32.mrb[59].mxu1 }
 0x16b   :  { %v1674_v23 = vpack.c.bf16 %v1235_v48, %v1235_v48 }
 0x16c   :  { %1507 = vst [vmem:[%s2728_s6 + $0x20] sm:$0xf] %v1683_v50 }
 0x16d   :  { %1461 = vst [vmem:[%s2729_s5 + $0x20] sm:$0xf] %v1674_v23 }

// kernel: resnet_forward.7
= control target key start
LH: loop header
LB: loop body
LE: loop exit
PB: predicated region body
PF: predicated region fallthrough
CT: control target
= control target key end

     0   :  { %vm1871_vm0 = vmmov 0   ;;  %s2346_s1 = inlined_call_operand.vmem [shape: bf16[1152,128], index: 1, kind: input, shape index: {}]   ;;  %s2347_s0 = inlined_call_operand.vmem [shape: bf16[72,1152], index: 0, kind: input, shape index: {}]   ;;  %s2348_s2 = inlined_call_operand.vmem [shape: f32[1,128], index: 2, kind: input, shape index: {}]   ;;  %s2349_s3 = inlined_call_operand.vmem [shape: bf16[72,128], index: 3, kind: input, shape index: {}]   ;;  %s2350_s4 = inlined_call_operand.vmem [shape: bf16[72,128], index: 4, kind: output, shape index: {}]  }
   0x1   :  { %v1737_v0 = vld [vmem:[%s2346_s1 + $0x40] sm:$0xff]   ;;  %v1741_v4 = vld [vmem:[%s2346_s1 + $0x48] sm:$0xff]   ;;  %v1745_v8 = vld [vmem:[%s2346_s1 + $0x50] sm:$0xff]  }
   0x2   :  { %v1738_v1 = vld [vmem:[%s2346_s1 + $0xc0] sm:$0xff]   ;;  %1486 = vmatprep.subr.bf16.mxu0 %v1737_v0  ;;  %v1742_v5 = vld [vmem:[%s2346_s1 + $0xc8] sm:$0xff]   ;;  %v1746_v9 = vld [vmem:[%s2346_s1 + $0xd0] sm:$0xff]  }
   0x3   :  { %v1739_v2 = vld [vmem:[%s2346_s1] sm:$0xff]   ;;  %1532 = vmatprep.subr.bf16.mxu1 %v1738_v1  ;;  %v1743_v6 = vld [vmem:[%s2346_s1 + $0x8] sm:$0xff]   ;;  %v1747_v10 = vld [vmem:[%s2346_s1 + $0x10] sm:$0xff]  }
   0x4   :  { %v1740_v3 = vld [vmem:[%s2346_s1 + $0x80] sm:$0xff]   ;;  %1487 = vmatpush3.bf16.msra.mxu0 %v1739_v2  ;;  %v1744_v7 = vld [vmem:[%s2346_s1 + $0x88] sm:$0xff]   ;;  %v1748_v11 = vld [vmem:[%s2346_s1 + $0x90] sm:$0xff]  }
   0x5   :  { %1533 = vmatpush3.bf16.msra.mxu1 %v1740_v3  ;;  %1488 = vmatprep.subr.bf16.mxu0 %v1741_v4  ;;  %v1749_v12 = vld [vmem:[%s2346_s1 + $0x58] sm:$0xff]   ;;  %v1753_v16 = vld [vmem:[%s2346_s1 + $0x60] sm:$0xff]   ;;  %v1757_v20 = vld [vmem:[%s2346_s1 + $0x68] sm:$0xff]  }
   0x6   :  { %1534 = vmatprep.subr.bf16.mxu1 %v1742_v5  ;;  %v1750_v13 = vld [vmem:[%s2346_s1 + $0xd8] sm:$0xff]   ;;  %v1754_v17 = vld [vmem:[%s2346_s1 + $0xe0] sm:$0xff]   ;;  %v1758_v21 = vld [vmem:[%s2346_s1 + $0xe8] sm:$0xff]  }
   0x7   :  { %v1751_v14 = vld [vmem:[%s2346_s1 + $0x18] sm:$0xff]   ;;  %v1755_v18 = vld [vmem:[%s2346_s1 + $0x20] sm:$0xff]   ;;  %v1759_v22 = vld [vmem:[%s2346_s1 + $0x28] sm:$0xff]  }
   0x8   :  { %1489 = vmatpush3.bf16.msra.mxu0 %v1743_v6  ;;  %v1752_v15 = vld [vmem:[%s2346_s1 + $0x98] sm:$0xff]   ;;  %v1756_v19 = vld [vmem:[%s2346_s1 + $0xa0] sm:$0xff]   ;;  %v1760_v23 = vld [vmem:[%s2346_s1 + $0xa8] sm:$0xff]  }
   0x9   :  { %1535 = vmatpush3.bf16.msra.mxu1 %v1744_v7  ;;  %1490 = vmatprep.subr.bf16.mxu0 %v1745_v8  ;;  %v1761_v24 = vld [vmem:[%s2346_s1 + $0x70] sm:$0xff]   ;;  %v1765_v28 = vld [vmem:[%s2346_s1 + $0x78] sm:$0xff]   ;;  %v1769_v32 = vld [vmem:[%s2347_s0] ss:$36 sps:$4 sm:$0xff]  }
   0xa   :  { %1536 = vmatprep.subr.bf16.mxu1 %v1746_v9  ;;  %v1762_v25 = vld [vmem:[%s2346_s1 + $0xf0] sm:$0xff]   ;;  %v1766_v29 = vld [vmem:[%s2346_s1 + $0xf8] sm:$0xff]   ;;  %v1771_v33 = vld [vmem:[%s2347_s0 + $0x4] ss:$36 sps:$4 sm:$0xff]  }
   0xb   :  { %v1763_v26 = vld [vmem:[%s2346_s1 + $0x30] sm:$0xff]   ;;  %v1767_v30 = vld [vmem:[%s2346_s1 + $0x38] sm:$0xff]   ;;  %v1772_v34 = vld [vmem:[%s2347_s0 + $0x8] ss:$36 sps:$4 sm:$0xff]   ;;  %894 = vmatprep.mubr.bf16.mxu0 %v1771_v33 }
   0xc   :  { %1491 = vmatpush3.bf16.msra.mxu0 %v1747_v10  ;;  %v1764_v27 = vld [vmem:[%s2346_s1 + $0xb0] sm:$0xff]   ;;  %v1768_v31 = vld [vmem:[%s2346_s1 + $0xb8] sm:$0xff]   ;;  %v1775_v36 = vld [vmem:[%s2346_s1 + $0x140] sm:$0xff]  }
   0xd   :  { %1537 = vmatpush3.bf16.msra.mxu1 %v1748_v11  ;;  %1492 = vmatprep.subr.bf16.mxu0 %v1749_v12  ;;  %v1774_v35 = vld [vmem:[%s2347_s0 + $0xc] ss:$36 sps:$4 sm:$0xff]   ;;  %v1776_v37 = vld [vmem:[%s2346_s1 + $0x100] sm:$0xff]   ;;  %v1781_v41 = vld [vmem:[%s2347_s0 + $0x54] ss:$36 sps:$4 sm:$0xff]  }
   0xe   :  { %1538 = vmatprep.subr.bf16.mxu1 %v1750_v13  ;;  %966 = vmatprep.mubr.bf16.mxu1 %v1774_v35  ;;  %v1777_v38 = vld [vmem:[%s2346_s1 + $0x148] sm:$0xff]   ;;  %v1784_v43 = vld [vmem:[%s2347_s0 + $0x50] ss:$36 sps:$4 sm:$0xff]   ;;  %v1785_v44 = vld [vmem:[%s2346_s1 + $0x1c0] sm:$0xff]  }
   0xf   :  { %v1778_v39 = vld [vmem:[%s2346_s1 + $0x108] sm:$0xff]   ;;  %v1786_v45 = vld [vmem:[%s2346_s1 + $0x180] sm:$0xff]   ;;  %v1787_v46 = vld [vmem:[%s2346_s1 + $0x150] sm:$0xff]  }
  0x10   :  { %1493 = vmatpush3.bf16.msra.mxu0 %v1751_v14  ;;  %v1779_v40 = vld [vmem:[%s2347_s0 + $0x4c] ss:$36 sps:$4 sm:$0xff]   ;;  %v1791_v50 = vld [vmem:[%s2347_s0 + $0x94] ss:$36 sps:$4 sm:$0xff]   ;;  %v1793_v51 = vld [vmem:[%s2347_s0 + $0x9c] ss:$36 sps:$4 sm:$0xff]  }
  0x11   :  { %1539 = vmatpush3.bf16.msra.mxu1 %v1752_v15  ;;  %1494 = vmatprep.subr.bf16.mxu0 %v1753_v16  ;;  %v1783_v42 = vld [vmem:[%s2347_s0 + $0x48] ss:$36 sps:$4 sm:$0xff]   ;;  %v1788_v47 = vld [vmem:[%s2346_s1 + $0x110] sm:$0xff]   ;;  %v1795_v52 = vld [vmem:[%s2346_s1 + $0x158] sm:$0xff]  }
  0x12   :  { %1540 = vmatprep.subr.bf16.mxu1 %v1754_v17  ;;  %v1789_v48 = vld [vmem:[%s2346_s1 + $0x1c8] sm:$0xff]   ;;  %v1796_v53 = vld [vmem:[%s2347_s0 + $0x90] ss:$36 sps:$4 sm:$0xff]   ;;  %v1797_v54 = vld [vmem:[%s2347_s0 + $0x98] ss:$36 sps:$4 sm:$0xff]  }
  0x13   :  { %v1790_v49 = vld [vmem:[%s2346_s1 + $0x188] sm:$0xff]   ;;  %v1798_v55 = vld [vmem:[%s2346_s1 + $0x118] sm:$0xff]   ;;  %v1799_v56 = vld [vmem:[%s2346_s1 + $0x1d0] sm:$0xff]  }
  0x14   :  { %1495 = vmatpush3.bf16.msra.mxu0 %v1755_v18  ;;  %v1800_v57 = vld [vmem:[%s2346_s1 + $0x190] sm:$0xff]   ;;  %v1801_v58 = vld [vmem:[%s2346_s1 + $0x160] sm:$0xff]   ;;  %v1802_v59 = vld [vmem:[%s2346_s1 + $0x1d8] sm:$0xff]  }
  0x15   :  { %1541 = vmatpush3.bf16.msra.mxu1 %v1756_v19  ;;  %1496 = vmatprep.subr.bf16.mxu0 %v1757_v20  ;;  %v1803_v60 = vld [vmem:[%s2346_s1 + $0x120] sm:$0xff]   ;;  %v1804_v61 = vld [vmem:[%s2346_s1 + $0x198] sm:$0xff]   ;;  %v1812_v3 = vld [vmem:[%s2346_s1 + $0x168] sm:$0xff]  }
  0x16   :  { %1542 = vmatprep.subr.bf16.mxu1 %v1758_v21  ;;  %v1805_v62 = vld [vmem:[%s2347_s0 + $0xdc] ss:$36 sps:$4 sm:$0xff]   ;;  %v1807_v63 = vld [vmem:[%s2347_s0 + $0xe4] ss:$36 sps:$4 sm:$0xff]   ;;  %v1817_v8 = vld [vmem:[%s2346_s1 + $0x170] sm:$0xff]  }
  0x17   :  { %v1809_v0 = vld [vmem:[%s2347_s0 + $0xd8] ss:$36 sps:$4 sm:$0xff]   ;;  %v1810_v1 = vld [vmem:[%s2347_s0 + $0xe0] ss:$36 sps:$4 sm:$0xff]   ;;  %v1814_v5 = vld [vmem:[%s2346_s1 + $0x128] sm:$0xff]  }
  0x18   :  { %1497 = vmatpush3.bf16.msra.mxu0 %v1759_v22  ;;  %v1811_v2 = vld [vmem:[%s2346_s1 + $0x1e0] sm:$0xff]   ;;  %v1815_v6 = vld [vmem:[%s2346_s1 + $0x1e8] sm:$0xff]   ;;  %v1820_v14 = vld [vmem:[%s2346_s1 + $0x130] sm:$0xff]  }
  0x19   :  { %1543 = vmatpush3.bf16.msra.mxu1 %v1760_v23  ;;  %1498 = vmatprep.subr.bf16.mxu0 %v1761_v24  ;;  %v1813_v4 = vld [vmem:[%s2346_s1 + $0x1a0] sm:$0xff]   ;;  %v1816_v7 = vld [vmem:[%s2346_s1 + $0x1a8] sm:$0xff]   ;;  %v1823_v16 = vld [vmem:[%s2346_s1 + $0x1f0] sm:$0xff]   ;;  %v1870_v24 = vmov 0.0  }
  0x1a   :  { %1544 = vmatprep.subr.bf16.mxu1 %v1762_v25  ;;  %v58_v9 = vld [vmem:[%s2347_s0 + $0x120] sm:$0xff]  ;;  %v59_v11 = vld [vmem:[%s2347_s0 + $0x128] sm:$0xff]  ;;  %v1824_v17 = vld [vmem:[%s2346_s1 + $0x1b0] sm:$0xff]  }
  0x1b   :  { %v1346_v10 = vcombine.high %v58_v9, %v58_v9  ;;  %v1345_v12 = vcombine.low %v58_v9, %v58_v9  ;;  %v1348_v13 = vcombine.high %v59_v11, %v59_v11  ;;  %v1347_v15 = vcombine.low %v59_v11, %v59_v11  ;;  %v1825_v18 = vld [vmem:[%s2346_s1 + $0x178] sm:$0xff]   ;;  %v1829_v22 = vld [vmem:[%s2347_s0 + $0x10] ss:$36 sps:$4 sm:$0xff]  }
  0x1c   :  { %1499 = vmatpush3.bf16.msra.mxu0 %v1763_v26  ;;  %v1826_v19 = vld [vmem:[%s2346_s1 + $0x138] sm:$0xff]   ;;  %v1843_v33 = vld [vmem:[%s2346_s1 + $0x210] sm:$0xff]  }
  0x1d   :  { %1545 = vmatpush3.bf16.msra.mxu1 %v1764_v27  ;;  %1500 = vmatprep.subr.bf16.mxu0 %v1765_v28  ;;  %v1827_v20 = vld [vmem:[%s2346_s1 + $0x1f8] sm:$0xff]   ;;  %v1835_v27 = vld [vmem:[%s2346_s1 + $0x200] sm:$0xff]   ;;  %v1836_v28 = vld [vmem:[%s2346_s1 + $0x208] sm:$0xff]  }
  0x1e   :  { %1546 = vmatprep.subr.bf16.mxu1 %v1766_v29  ;;  %v1828_v21 = vld [vmem:[%s2346_s1 + $0x1b8] sm:$0xff]   ;;  %v1846_v35 = vld [vmem:[%s2347_s0 + $0xac] ss:$36 sps:$4 sm:$0xff]  }
  0x1f   :  { %v1831_v23 = vld [vmem:[%s2347_s0 + $0x14] ss:$36 sps:$4 sm:$0xff]   ;;  %v1834_v26 = vld [vmem:[%s2347_s0 + $0x1c] ss:$36 sps:$4 sm:$0xff]  }
  0x20   :  { %1501 = vmatpush3.bf16.msra.mxu0 %v1767_v30  ;;  %v1832_v25 = vld [vmem:[%s2347_s0 + $0x18] ss:$36 sps:$4 sm:$0xff]   ;;  %v1839_v30 = vld [vmem:[%s2347_s0 + $0x64] ss:$36 sps:$4 sm:$0xff]  }
  0x21   :  { %1547 = vmatpush3.bf16.msra.mxu1 %v1768_v31  ;;  %1578 = vmatprep.subr.bf16.mxu0 %v1775_v36  ;;  %v1837_v29 = vld [vmem:[%s2347_s0 + $0x5c] ss:$36 sps:$4 sm:$0xff]  }
  0x22   :  { %1624 = vmatprep.subr.bf16.mxu1 %v1785_v44  ;;  %v1841_v31 = vld [vmem:[%s2347_s0 + $0x58] ss:$36 sps:$4 sm:$0xff]  }
  0x23   :  { %895 = vmatmul.mubr.bf16.vlgmr.msra.gmra.mrb[0].mxu0 %v1769_v32  ;;  %v1842_v32 = vld [vmem:[%s2347_s0 + $0x60] ss:$36 sps:$4 sm:$0xff]   ;;  %v1850_v36 = vld [vmem:[%s2346_s1 + $0x218] sm:$0xff]  }
  0x24   :  { %967 = vmatmul.mubr.bf16.vlgmr.msra.gmra.mrb[0].mxu1 %v1772_v34  ;;  %1579 = vmatpush3.bf16.msra.mxu0 %v1776_v37  ;;  %v1844_v34 = vld [vmem:[%s2347_s0 + $0xa4] ss:$36 sps:$4 sm:$0xff]   ;;  %v61_v44 = vld [vmem:[%s2347_s0 + $0x138] sm:$0xff] }
  0x25   :  { %1580 = vmatprep.subr.bf16.mxu0 %v1777_v38  ;;  %902 = vmatprep.mubr.bf16.mxu0 %v1779_v40  ;;  %v1848_v37 = vld [vmem:[%s2347_s0 + $0xa0] ss:$36 sps:$4 sm:$0xff]   ;;  %v1849_v38 = vld [vmem:[%s2347_s0 + $0xa8] ss:$36 sps:$4 sm:$0xff]  }
  0x26   :  { %974 = vmatprep.mubr.bf16.mxu1 %v1781_v41  ;;  %1625 = vmatpush3.bf16.msra.mxu1 %v1786_v45  ;;  %v1852_v40 = vld [vmem:[%s2347_s0 + $0xec] ss:$36 sps:$4 sm:$0xff]   ;;  %v1854_v41 = vld [vmem:[%s2347_s0 + $0xf4] ss:$36 sps:$4 sm:$0xff]  }
  0x27   :  { %1626 = vmatprep.subr.bf16.mxu1 %v1789_v48  ;;  %v1856_v45 = vld [vmem:[%s2347_s0 + $0xe8] ss:$36 sps:$4 sm:$0xff]   ;;  %v1352_v48 = vcombine.high %v61_v44, %v61_v44 }
  0x28   :  { %1581 = vmatpush3.bf16.msra.mxu0 %v1778_v39  ;;  %v1851_v39 = vld [vmem:[%s2346_s1 + $0x220] sm:$0xff]  }
  0x29   :  { %1582 = vmatprep.subr.bf16.mxu0 %v1787_v46  ;;  %v1857_v46 = vld [vmem:[%s2347_s0 + $0xf0] ss:$36 sps:$4 sm:$0xff]  }
  0x2a   :  { %1627 = vmatpush3.bf16.msra.mxu1 %v1790_v49  ;;  %v1861_v49 = vld [vmem:[%s2346_s1 + $0x230] sm:$0xff]  }
  0x2b   :  { %903 = vmatmul.mubr.bf16.gmra.mrb[4].mxu0 %v1783_v42  ;;  %1628 = vmatprep.subr.bf16.mxu1 %v1799_v56  ;;  %v1858_v42 = vld [vmem:[%s2346_s1 + $0x228] sm:$0xff]   ;;  %v1868_v56 = vld [vmem:[%s2347_s0 + $0x140] ss:$0 sps:$4 sm:$0xff]  }
  0x2c   :  { %975 = vmatmul.mubr.bf16.gmra.mrb[4].mxu1 %v1784_v43  ;;  %1583 = vmatpush3.bf16.msra.mxu0 %v1788_v47  ;;  %v60_v43 = vld [vmem:[%s2347_s0 + $0x130] sm:$0xff] }
  0x2d   :  { %910 = vmatprep.mubr.bf16.mxu0 %v1791_v50  ;;  %982 = vmatprep.mubr.bf16.mxu1 %v1793_v51  ;;  %v1350_v47 = vcombine.high %v60_v43, %v60_v43  ;;  %v1864_v50 = vld [vmem:[%s2346_s1 + $0x238] sm:$0xff]   ;;  %v1349_v51 = vcombine.low %v60_v43, %v60_v43 }
  0x2e   :  { %1584 = vmatprep.subr.bf16.mxu0 %v1795_v52  ;;  %1629 = vmatpush3.bf16.msra.mxu1 %v1800_v57  ;;  %v1351_v52 = vcombine.low %v61_v44, %v61_v44  ;;  %v1869_v57 = vld [vmem:[%s2347_s0 + $0xb0] ss:$36 sps:$4 sm:$0xff]  }
  0x2f   :  { %1630 = vmatprep.subr.bf16.mxu1 %v1802_v59  ;;  %v2260_v59 = vld [vmem:[%s2348_s2] ss:$0 sm:$0xff] }
  0x30   :  { %1585 = vmatpush3.bf16.msra.mxu0 %v1798_v55  ;;  %v1867_v55 = vld [vmem:[%s2347_s0 + $0x68] ss:$36 sps:$4 sm:$0xff]  }
  0x31   :  { %1586 = vmatprep.subr.bf16.mxu0 %v1801_v58 }
  0x32   :  { %1631 = vmatpush3.bf16.msra.mxu1 %v1804_v61 }
  0x33   :  { %911 = vmatmul.mubr.bf16.gmra.mrb[8].mxu0 %v1796_v53  ;;  %1632 = vmatprep.subr.bf16.mxu1 %v1811_v2  ;;  %v1865_v53 = vld [vmem:[%s2347_s0 + $0x20] ss:$36 sps:$4 sm:$0xff]  }
  0x34   :  { %983 = vmatmul.mubr.bf16.gmra.mrb[8].mxu1 %v1797_v54  ;;  %1587 = vmatpush3.bf16.msra.mxu0 %v1803_v60  ;;  %v1866_v54 = vld [vmem:[%s2347_s0 + $0xf8] ss:$36 sps:$4 sm:$0xff]  }
  0x35   :  { %918 = vmatprep.mubr.bf16.mxu0 %v1805_v62  ;;  %990 = vmatprep.mubr.bf16.mxu1 %v1807_v63 }
  0x36   :  { %1588 = vmatprep.subr.bf16.mxu0 %v1812_v3  ;;  %1633 = vmatpush3.bf16.msra.mxu1 %v1813_v4 }
  0x37   :  { %1634 = vmatprep.subr.bf16.mxu1 %v1815_v6 }
  0x38   :  { %1589 = vmatpush3.bf16.msra.mxu0 %v1814_v5 }
  0x39   :  { %1590 = vmatprep.subr.bf16.mxu0 %v1817_v8 }
  0x3a   :  { %1635 = vmatpush3.bf16.msra.mxu1 %v1816_v7 }
  0x3b   :  { %919 = vmatmul.mubr.bf16.gmra.mrb[12].mxu0 %v1809_v0  ;;  %1636 = vmatprep.subr.bf16.mxu1 %v1823_v16 }
  0x3c   :  { %991 = vmatmul.mubr.bf16.gmra.mrb[12].mxu1 %v1810_v1  ;;  %926 = vmatprep.mubr.bf16.mxu0 %v1346_v10 }
  0x3d   :  { %998 = vmatprep.mubr.bf16.mxu1 %v1348_v13  ;;  %1591 = vmatpush3.bf16.msra.mxu0 %v1820_v14 }
  0x3e   :  { %1637 = vmatpush3.bf16.msra.mxu1 %v1824_v17  ;;  %1592 = vmatprep.subr.bf16.mxu0 %v1825_v18 }
  0x3f   :  { %1638 = vmatprep.subr.bf16.mxu1 %v1827_v20 }
  0x41   :  { %1593 = vmatpush3.bf16.msra.mxu0 %v1826_v19 }
  0x42   :  { %1683 = vmatprep.subr.bf16.mxu0 %v1870_v24  ;;  %1639 = vmatpush3.bf16.msra.mxu1 %v1828_v21 }
  0x43   :  { %927 = vmatmul.mubr.bf16.gmra.mrb[16].mxu0 %v1345_v12  ;;  %1719 = vmatprep.subr.bf16.mxu1 %v1870_v24 }
  0x44   :  { %999 = vmatmul.mubr.bf16.gmra.mrb[16].mxu1 %v1347_v15  ;;  %1038 = vmatprep.mubr.bf16.mxu0 %v1831_v23 }
  0x45   :  { %1110 = vmatprep.mubr.bf16.mxu1 %v1834_v26 }
  0x4b   :  { %1039 = vmatmul.mubr.bf16.vlgmr.msra.gmra.mrb[20].mxu0 %v1829_v22 }
  0x4c   :  { %1111 = vmatmul.mubr.bf16.vlgmr.msra.gmra.mrb[20].mxu1 %v1832_v25  ;;  %1684 = vmatpush3.bf16.msra.mxu0 %v1835_v27 }
  0x4d   :  { %1685 = vmatprep.subr.bf16.mxu0 %v1870_v24  ;;  %1046 = vmatprep.mubr.bf16.mxu0 %v1837_v29 }
  0x4e   :  { %1118 = vmatprep.mubr.bf16.mxu1 %v1839_v30  ;;  %1727 = vmatpush3.bf16.msra.mxu1 %v1835_v27 }
  0x4f   :  { %1720 = vmatprep.subr.bf16.mxu1 %v1870_v24 }
  0x50   :  { %1686 = vmatpush3.bf16.msra.mxu0 %v1836_v28 }
  0x51   :  { %1687 = vmatprep.subr.bf16.mxu0 %v1870_v24 }
  0x52   :  { %1728 = vmatpush3.bf16.msra.mxu1 %v1836_v28 }
  0x53   :  { %1047 = vmatmul.mubr.bf16.gmra.mrb[24].mxu0 %v1841_v31  ;;  %1721 = vmatprep.subr.bf16.mxu1 %v1870_v24 }
  0x54   :  { %1119 = vmatmul.mubr.bf16.gmra.mrb[24].mxu1 %v1842_v32  ;;  %1688 = vmatpush3.bf16.msra.mxu0 %v1843_v33 }
  0x55   :  { %1054 = vmatprep.mubr.bf16.mxu0 %v1844_v34  ;;  %1126 = vmatprep.mubr.bf16.mxu1 %v1846_v35 }
  0x56   :  { %1689 = vmatprep.subr.bf16.mxu0 %v1870_v24  ;;  %1729 = vmatpush3.bf16.msra.mxu1 %v1843_v33 }
  0x57   :  { %1722 = vmatprep.subr.bf16.mxu1 %v1870_v24 }
  0x58   :  { %1690 = vmatpush3.bf16.msra.mxu0 %v1850_v36 }
  0x59   :  { %1691 = vmatprep.subr.bf16.mxu0 %v1870_v24 }
  0x5a   :  { %1730 = vmatpush3.bf16.msra.mxu1 %v1850_v36 }
  0x5b   :  { %1055 = vmatmul.mubr.bf16.gmra.mrb[28].mxu0 %v1848_v37  ;;  %1723 = vmatprep.subr.bf16.mxu1 %v1870_v24 }
  0x5c   :  { %1127 = vmatmul.mubr.bf16.gmra.mrb[28].mxu1 %v1849_v38  ;;  %1692 = vmatpush3.bf16.msra.mxu0 %v1851_v39 }
  0x5d   :  { %1062 = vmatprep.mubr.bf16.mxu0 %v1852_v40  ;;  %1134 = vmatprep.mubr.bf16.mxu1 %v1854_v41 }
  0x5e   :  { %1731 = vmatpush3.bf16.msra.mxu1 %v1851_v39  ;;  %1693 = vmatprep.subr.bf16.mxu0 %v1870_v24 }
  0x5f   :  { %1724 = vmatprep.subr.bf16.mxu1 %v1870_v24 }
  0x60   :  { %1694 = vmatpush3.bf16.msra.mxu0 %v1858_v42 }
  0x61   :  { %1695 = vmatprep.subr.bf16.mxu0 %v1870_v24 }
  0x62   :  { %1732 = vmatpush3.bf16.msra.mxu1 %v1858_v42 }
  0x63   :  { %1063 = vmatmul.mubr.bf16.gmra.mrb[32].mxu0 %v1856_v45  ;;  %1725 = vmatprep.subr.bf16.mxu1 %v1870_v24 }
  0x64   :  { %1135 = vmatmul.mubr.bf16.gmra.mrb[32].mxu1 %v1857_v46  ;;  %1070 = vmatprep.mubr.bf16.mxu0 %v1350_v47 }
  0x65   :  { %1142 = vmatprep.mubr.bf16.mxu1 %v1352_v48  ;;  %1696 = vmatpush3.bf16.msra.mxu0 %v1861_v49 }
  0x66   :  { %1733 = vmatpush3.bf16.msra.mxu1 %v1861_v49  ;;  %1697 = vmatprep.subr.bf16.mxu0 %v1870_v24 }
  0x67   :  { %1726 = vmatprep.subr.bf16.mxu1 %v1870_v24 }
  0x69   :  { %1698 = vmatpush3.bf16.msra.mxu0 %v1864_v50 }
  0x6a   :  { %1734 = vmatpush3.bf16.msra.mxu1 %v1864_v50 }
  0x6b   :  { %1071 = vmatmul.mubr.bf16.gmra.mrb[36].mxu0 %v1349_v51 }
  0x6c   :  { %1143 = vmatmul.mubr.bf16.gmra.mrb[36].mxu1 %v1351_v52  ;;  %1699 = vmatprep.mubr.msk.bf16.mxu0 %vm1871_vm0, %v1870_v24 }
  0x6d   :  { %1711 = vmatprep.mubr.msk.bf16.mxu1 %vm1871_vm0, %v1870_v24 }
  0x73   :  { %1700 = vmatmul.mubr.bf16.vlgmr.msra.gmra.mrb[40].mxu0 %v1865_v53 }
  0x74   :  { %1712 = vmatmul.mubr.bf16.vlgmr.msra.gmra.mrb[40].mxu1 %v1866_v54  ;;  %1703 = vmatprep.mubr.msk.bf16.mxu0 %vm1871_vm0, %v1870_v24 }
  0x75   :  { %1715 = vmatprep.mubr.msk.bf16.mxu1 %vm1871_vm0, %v1870_v24 }
  0x7b   :  { %1704 = vmatmul.mubr.bf16.gmra.mrb[44].mxu0 %v1867_v55 }
  0x7c   :  { %1716 = vmatmul.mubr.bf16.gmra.mrb[44].mxu1 %v1868_v56  ;;  %1707 = vmatprep.mubr.msk.bf16.mxu0 %vm1871_vm0, %v1870_v24 }
  0x83   :  { %1708 = vmatmul.mubr.bf16.gmra.mrb[48].mxu0 %v1869_v57 }
  0xf6   :  { %v1502_v58 = vpop.f32.mrb[0].mxu0 }
  0xf7   :  { %v1503_v60 = vpop.f32.mrb[1].mxu0  ;;  %v1548_v61 = vpop.f32.mrb[0].mxu1 }
  0xf8   :  { %v1504_v62 = vadd.f32 %v1503_v60, %v1502_v58  ;;  %v1505_v63 = vpop.f32.mrb[2].mxu0  ;;  %v1549_v0 = vpop.f32.mrb[1].mxu1 }
  0xf9   :  { %v1506_v1 = vpop.f32.mrb[3].mxu0  ;;  %v1550_v2 = vadd.f32 %v1549_v0, %v1548_v61  ;;  %v1551_v3 = vpop.f32.mrb[2].mxu1 }
  0xfa   :  { %v897_v4 = vadd.f32 %v1504_v62, %v2260_v59  ;;  %v1507_v5 = vadd.f32 %v1506_v1, %v1505_v63  ;;  %v1552_v6 = vpop.f32.mrb[3].mxu1 }
  0xfb   :  { %v1553_v7 = vadd.f32 %v1552_v6, %v1551_v3 }
  0xfc   :  { %v900_v8 = vadd.f32 %v1507_v5, %v2260_v59  ;;  %v2264_v9 = vadd.f32 %v1550_v2, %v897_v4 }
  0xfe   :  { %v2266_v10 = vadd.f32 %v1553_v7, %v900_v8  ;;  %v1508_v11 = vpop.f32.mrb[4].mxu0 }
  0xff   :  { %v1509_v12 = vpop.f32.mrb[5].mxu0  ;;  %v1554_v13 = vpop.f32.mrb[4].mxu1 }
 0x100   :  { %v1510_v14 = vadd.f32 %v1509_v12, %v1508_v11  ;;  %v1511_v15 = vpop.f32.mrb[6].mxu0  ;;  %v1555_v16 = vpop.f32.mrb[5].mxu1 }
 0x101   :  { %v1512_v17 = vpop.f32.mrb[7].mxu0  ;;  %v1556_v18 = vadd.f32 %v1555_v16, %v1554_v13  ;;  %v1557_v19 = vpop.f32.mrb[6].mxu1 }
 0x102   :  { %v905_v20 = vadd.f32 %v1510_v14, %v2260_v59  ;;  %v1513_v21 = vadd.f32 %v1512_v17, %v1511_v15  ;;  %v1558_v22 = vpop.f32.mrb[7].mxu1 }
 0x103   :  { %v1559_v23 = vadd.f32 %v1558_v22, %v1557_v19 }
 0x104   :  { %v908_v24 = vadd.f32 %v1513_v21, %v2260_v59  ;;  %v2270_v25 = vadd.f32 %v1556_v18, %v905_v20 }
 0x106   :  { %v2272_v26 = vadd.f32 %v1559_v23, %v908_v24  ;;  %v1514_v27 = vpop.f32.mrb[8].mxu0 }
 0x107   :  { %v1515_v28 = vpop.f32.mrb[9].mxu0  ;;  %v1560_v29 = vpop.f32.mrb[8].mxu1 }
 0x108   :  { %v1516_v30 = vadd.f32 %v1515_v28, %v1514_v27  ;;  %v1517_v31 = vpop.f32.mrb[10].mxu0  ;;  %v1561_v32 = vpop.f32.mrb[9].mxu1 }
 0x109   :  { %v1518_v33 = vpop.f32.mrb[11].mxu0  ;;  %v1562_v34 = vadd.f32 %v1561_v32, %v1560_v29  ;;  %v1563_v35 = vpop.f32.mrb[10].mxu1 }
 0x10a   :  { %v913_v36 = vadd.f32 %v1516_v30, %v2260_v59  ;;  %v1519_v37 = vadd.f32 %v1518_v33, %v1517_v31  ;;  %v1564_v38 = vpop.f32.mrb[11].mxu1 }
 0x10b   :  { %v1565_v39 = vadd.f32 %v1564_v38, %v1563_v35 }
 0x10c   :  { %v916_v40 = vadd.f32 %v1519_v37, %v2260_v59  ;;  %v2276_v41 = vadd.f32 %v1562_v34, %v913_v36 }
 0x10e   :  { %v2278_v42 = vadd.f32 %v1565_v39, %v916_v40  ;;  %v1520_v43 = vpop.f32.mrb[12].mxu0 }
 0x10f   :  { %v1566_v44 = vpop.f32.mrb[12].mxu1  ;;  %v1521_v45 = vpop.f32.mrb[13].mxu0 }
 0x110   :  { %v1567_v46 = vpop.f32.mrb[13].mxu1  ;;  %v1522_v47 = vadd.f32 %v1521_v45, %v1520_v43  ;;  %v1523_v48 = vpop.f32.mrb[14].mxu0 }
 0x111   :  { %v1568_v49 = vadd.f32 %v1567_v46, %v1566_v44  ;;  %v1569_v50 = vpop.f32.mrb[14].mxu1  ;;  %v1524_v51 = vpop.f32.mrb[15].mxu0 }
 0x112   :  { %v1570_v52 = vpop.f32.mrb[15].mxu1  ;;  %v921_v53 = vadd.f32 %v1522_v47, %v2260_v59  ;;  %v1525_v54 = vadd.f32 %v1524_v51, %v1523_v48 }
 0x113   :  { %v1571_v55 = vadd.f32 %v1570_v52, %v1569_v50 }
 0x114   :  { %v924_v56 = vadd.f32 %v1525_v54, %v2260_v59  ;;  %v2282_v57 = vadd.f32 %v1568_v49, %v921_v53 }
 0x116   :  { %v2284_v58 = vadd.f32 %v1571_v55, %v924_v56  ;;  %v1526_v60 = vpop.f32.mrb[16].mxu0 }
 0x117   :  { %v1572_v61 = vpop.f32.mrb[16].mxu1  ;;  %v1527_v62 = vpop.f32.mrb[17].mxu0 }
 0x118   :  { %v1573_v63 = vpop.f32.mrb[17].mxu1  ;;  %v1528_v0 = vadd.f32 %v1527_v62, %v1526_v60  ;;  %v1529_v1 = vpop.f32.mrb[18].mxu0 }
 0x119   :  { %v1574_v2 = vadd.f32 %v1573_v63, %v1572_v61  ;;  %v1575_v3 = vpop.f32.mrb[18].mxu1  ;;  %v1530_v4 = vpop.f32.mrb[19].mxu0 }
 0x11a   :  { %v1576_v5 = vpop.f32.mrb[19].mxu1  ;;  %v929_v6 = vadd.f32 %v1528_v0, %v2260_v59 }
 0x11c   :  { %v2287_v7 = vadd.f32 %v1574_v2, %v929_v6 }
 0x11e   :  { %v1594_v8 = vpop.f32.mrb[20].mxu0 }
 0x11f   :  { %v1595_v11 = vpop.f32.mrb[21].mxu0  ;;  %v1640_v12 = vpop.f32.mrb[20].mxu1 }
 0x120   :  { %v1596_v13 = vadd.f32 %v1595_v11, %v1594_v8  ;;  %v1597_v14 = vpop.f32.mrb[22].mxu0  ;;  %v1641_v15 = vpop.f32.mrb[21].mxu1 }
 0x121   :  { %v1598_v16 = vpop.f32.mrb[23].mxu0  ;;  %v1642_v17 = vadd.f32 %v1641_v15, %v1640_v12  ;;  %v1643_v18 = vpop.f32.mrb[22].mxu1 }
 0x122   :  { %v1041_v19 = vadd.f32 %v1596_v13, %v2264_v9  ;;  %v1599_v20 = vadd.f32 %v1598_v16, %v1597_v14  ;;  %v1644_v21 = vpop.f32.mrb[23].mxu1 }
 0x123   :  { %v1645_v22 = vadd.f32 %v1644_v21, %v1643_v18 }
 0x124   :  { %v1044_v23 = vadd.f32 %v1599_v20, %v2266_v10  ;;  %v2291_v24 = vadd.f32 %v1642_v17, %v1041_v19 }
 0x126   :  { %v1600_v59 = vpop.f32.mrb[24].mxu0  ;;  %v2293_v27 = vadd.f32 %v1645_v22, %v1044_v23 }
 0x127   :  { %v1601_v28 = vpop.f32.mrb[25].mxu0  ;;  %v1646_v29 = vpop.f32.mrb[24].mxu1 }
 0x128   :  { %v1602_v30 = vadd.f32 %v1601_v28, %v1600_v59  ;;  %v1603_v31 = vpop.f32.mrb[26].mxu0  ;;  %v1647_v32 = vpop.f32.mrb[25].mxu1 }
 0x129   :  { %v1604_v33 = vpop.f32.mrb[27].mxu0  ;;  %v1648_v34 = vadd.f32 %v1647_v32, %v1646_v29  ;;  %v1649_v35 = vpop.f32.mrb[26].mxu1 }
 0x12a   :  { %v1049_v9 = vadd.f32 %v1602_v30, %v2270_v25  ;;  %v1605_v36 = vadd.f32 %v1604_v33, %v1603_v31  ;;  %v1650_v37 = vpop.f32.mrb[27].mxu1 }
 0x12b   :  { %v1651_v38 = vadd.f32 %v1650_v37, %v1649_v35 }
 0x12c   :  { %v1052_v10 = vadd.f32 %v1605_v36, %v2272_v26  ;;  %v2297_v39 = vadd.f32 %v1648_v34, %v1049_v9 }
 0x12e   :  { %v1606_v40 = vpop.f32.mrb[28].mxu0  ;;  %v2299_v43 = vadd.f32 %v1651_v38, %v1052_v10 }
 0x12f   :  { %v1607_v44 = vpop.f32.mrb[29].mxu0  ;;  %v1652_v45 = vpop.f32.mrb[28].mxu1 }
 0x130   :  { %v1608_v46 = vadd.f32 %v1607_v44, %v1606_v40  ;;  %v1609_v47 = vpop.f32.mrb[30].mxu0  ;;  %v1653_v48 = vpop.f32.mrb[29].mxu1 }
 0x131   :  { %v1610_v49 = vpop.f32.mrb[31].mxu0  ;;  %v1654_v50 = vadd.f32 %v1653_v48, %v1652_v45  ;;  %v1655_v51 = vpop.f32.mrb[30].mxu1  ;;  %v1230_v48 = vld [vmem:[%s2349_s3 + $0x20] sm:$0xf] }
 0x132   :  { %v1057_v25 = vadd.f32 %v1608_v46, %v2276_v41  ;;  %v1611_v52 = vadd.f32 %v1610_v49, %v1609_v47  ;;  %v1656_v53 = vpop.f32.mrb[31].mxu1  ;;  %v1480_v47 = vld [vmem:[%s2349_s3 + $0x8] sm:$0xff]  }
 0x133   :  { %v1657_v54 = vadd.f32 %v1656_v53, %v1655_v51 }
 0x134   :  { %v1060_v26 = vadd.f32 %v1611_v52, %v2278_v42  ;;  %v2303_v55 = vadd.f32 %v1654_v50, %v1057_v25  ;;  %v1450_v25 = vunpack.c.l.bf16 %v1480_v47 }
 0x136   :  { %v1612_v56 = vpop.f32.mrb[32].mxu0  ;;  %v2305_v60 = vadd.f32 %v1657_v54, %v1060_v26  ;;  %v1239_v54 = vunpack.c.l.bf16 %v1230_v48 }
 0x137   :  { %v1613_v61 = vpop.f32.mrb[33].mxu0  ;;  %v1658_v62 = vpop.f32.mrb[32].mxu1 }
 0x138   :  { %v1614_v63 = vadd.f32 %v1613_v61, %v1612_v56  ;;  %v1615_v0 = vpop.f32.mrb[34].mxu0  ;;  %v1659_v1 = vpop.f32.mrb[33].mxu1 }
 0x139   :  { %v1616_v2 = vpop.f32.mrb[35].mxu0  ;;  %v1660_v3 = vadd.f32 %v1659_v1, %v1658_v62  ;;  %v1661_v4 = vpop.f32.mrb[34].mxu1 }
 0x13a   :  { %v1065_v41 = vadd.f32 %v1614_v63, %v2282_v57  ;;  %v1617_v5 = vadd.f32 %v1616_v2, %v1615_v0  ;;  %v1662_v6 = vpop.f32.mrb[35].mxu1  ;;  %v1445_v57 = vld [vmem:[%s2349_s3] sm:$0xff]   ;;  %v1451_v63 = vunpack.c.h.bf16 %v1480_v47 }
 0x13b   :  { %v1663_v8 = vadd.f32 %v1662_v6, %v1661_v4  ;;  %v1446_v28 = vunpack.c.l.bf16 %v1445_v57  ;;  %v1447_v34 = vunpack.c.h.bf16 %v1445_v57 }
 0x13c   :  { %v1068_v42 = vadd.f32 %v1617_v5, %v2284_v58  ;;  %v1137_v11 = vadd.f32 %v1660_v3, %v1065_v41  ;;  %v1482_v58 = vld [vmem:[%s2349_s3 + $0x18] sm:$0xff]  }
 0x13d   :  { %v1458_v30 = vunpack.c.l.bf16 %v1482_v58  ;;  %v1459_v36 = vunpack.c.h.bf16 %v1482_v58 }
 0x13e   :  { %v1618_v12 = vpop.f32.mrb[36].mxu0  ;;  %v1140_v13 = vadd.f32 %v1663_v8, %v1068_v42  ;;  %v1481_v8 = vld [vmem:[%s2349_s3 + $0x10] sm:$0xff]  }
 0x13f   :  { %v1619_v14 = vpop.f32.mrb[37].mxu0  ;;  %v1664_v15 = vpop.f32.mrb[36].mxu1 }
 0x140   :  { %v1620_v16 = vadd.f32 %v1619_v14, %v1618_v12  ;;  %v1621_v17 = vpop.f32.mrb[38].mxu0  ;;  %v1665_v18 = vpop.f32.mrb[37].mxu1 }
 0x141   :  { %v1622_v19 = vpop.f32.mrb[39].mxu0  ;;  %v1666_v20 = vadd.f32 %v1665_v18, %v1664_v15  ;;  %v1667_v21 = vpop.f32.mrb[38].mxu1  ;;  %v1454_v15 = vunpack.c.l.bf16 %v1481_v8 }
 0x142   :  { %v1073_v22 = vadd.f32 %v1620_v16, %v2287_v7  ;;  %v1668_v23 = vpop.f32.mrb[39].mxu1 }
 0x144   :  { %v1145_v59 = vadd.f32 %v1666_v20, %v1073_v22  ;;  %v1455_v20 = vunpack.c.h.bf16 %v1481_v8 }
 0x146   :  { %v1184_v29 = vpop.f32.mrb[40].mxu0 }
 0x147   :  { %v1185_v31 = vadd.f32 %v1184_v29, %v2291_v24  ;;  %v1208_v32 = vpop.f32.mrb[40].mxu1  ;;  %v1701_v33 = vpop.f32.mrb[41].mxu0 }
 0x148   :  { %v1209_v35 = vadd.f32 %v1208_v32, %v1137_v11  ;;  %v1713_v7 = vpop.f32.mrb[41].mxu1  ;;  %v1187_v9 = vpop.f32.mrb[42].mxu0 }
 0x149   :  { %v1240_v37 = vadd.f32 %v1446_v28, %v1185_v31  ;;  %v1188_v38 = vadd.f32 %v1187_v9, %v2293_v27  ;;  %v1211_v10 = vpop.f32.mrb[42].mxu1  ;;  %v1702_v40 = vpop.f32.mrb[43].mxu0 }
 0x14a   :  { %v1246_v44 = vadd.f32 %v1458_v30, %v1209_v35  ;;  %v1212_v45 = vadd.f32 %v1211_v10, %v1140_v13  ;;  %v1714_v46 = vpop.f32.mrb[43].mxu1 }
 0x14b   :  { %v1241_v24 = vadd.f32 %v1447_v34, %v1188_v38  ;;  %v1249_v50 = vmax.f32 %v1240_v37, 0.0 }
 0x14c   :  { %v1247_v49 = vadd.f32 %v1459_v36, %v1212_v45  ;;  %v1255_v52 = vmax.f32 %v1246_v44, 0.0 }
 0x14d   :  { %v1250_v51 = vmax.f32 %v1241_v24, 0.0 }
 0x14e   :  { %v1256_v27 = vmax.f32 %v1247_v49, 0.0  ;;  %v1192_v53 = vpop.f32.mrb[44].mxu0 }
 0x14f   :  { %v1463_v26 = vpack.c.bf16 %v1250_v51, %v1249_v50  ;;  %v1193_v56 = vadd.f32 %v1192_v53, %v2297_v39  ;;  %v1216_v61 = vpop.f32.mrb[44].mxu1  ;;  %v1705_v62 = vpop.f32.mrb[45].mxu0 }
 0x150   :  { %v1478_v0 = vpack.c.bf16 %v1256_v27, %v1255_v52  ;;  %v1217_v1 = vadd.f32 %v1216_v61, %v1145_v59  ;;  %v1195_v2 = vpop.f32.mrb[46].mxu0  ;;  %v1717_v3 = vpop.f32.mrb[45].mxu1 }
 0x151   :  { %1464 = vst [vmem:[%s2350_s4] sm:$0xff] %v1463_v26   ;;  %v1242_v4 = vadd.f32 %v1450_v25, %v1193_v56  ;;  %v1196_v41 = vadd.f32 %v1195_v2, %v2299_v43  ;;  %v1706_v5 = vpop.f32.mrb[47].mxu0  ;;  %v1219_v6 = vpop.f32.mrb[46].mxu1 }
 0x152   :  { %1485 = vst [vmem:[%s2350_s4 + $0x18] sm:$0xff] %v1478_v0   ;;  %v1248_v39 = vadd.f32 %v1239_v54, %v1217_v1  ;;  %v1718_v42 = vpop.f32.mrb[47].mxu1 }
 0x153   :  { %v1243_v11 = vadd.f32 %v1451_v63, %v1196_v41  ;;  %v1251_v13 = vmax.f32 %v1242_v4, 0.0 }
 0x154   :  { %v1257_v12 = vmax.f32 %v1248_v39, 0.0 }
 0x155   :  { %v1252_v14 = vmax.f32 %v1243_v11, 0.0 }
 0x156   :  { %v1443_v16 = vpack.c.bf16 %v1257_v12, %v1257_v12  ;;  %v1200_v17 = vpop.f32.mrb[48].mxu0 }
 0x157   :  { %v1468_v43 = vpack.c.bf16 %v1252_v14, %v1251_v13  ;;  %v1201_v18 = vadd.f32 %v1200_v17, %v2303_v55  ;;  %v1709_v19 = vpop.f32.mrb[49].mxu0 }
 0x158   :  { %1303 = vst [vmem:[%s2350_s4 + $0x20] sm:$0xf] %v1443_v16  ;;  %v1203_v21 = vpop.f32.mrb[50].mxu0 }
 0x159   :  { %1483 = vst [vmem:[%s2350_s4 + $0x8] sm:$0xff] %v1468_v43   ;;  %v1244_v22 = vadd.f32 %v1454_v15, %v1201_v18  ;;  %v1204_v23 = vadd.f32 %v1203_v21, %v2305_v60  ;;  %v1710_v57 = vpop.f32.mrb[51].mxu0 }
 0x15b   :  { %v1245_v58 = vadd.f32 %v1455_v20, %v1204_v23  ;;  %v1253_v59 = vmax.f32 %v1244_v22, 0.0 }
 0x15d   :  { %v1254_v28 = vmax.f32 %v1245_v58, 0.0 }
 0x15f   :  { %v1473_v29 = vpack.c.bf16 %v1254_v28, %v1253_v59 }
 0x161   :  { %1484 = vst [vmem:[%s2350_s4 + $0x10] sm:$0xff] %v1473_v29  }

// kernel: resnet_forward.8
= control target key start
LH: loop header
LB: loop body
LE: loop exit
PB: predicated region body
PF: predicated region fallthrough
CT: control target
= control target key end

     0   :  { %vm1297_vm0 = vmmov 0   ;;  %s1603_s1 = inlined_call_operand.vmem [shape: bf16[1152,128], index: 1, kind: input, shape index: {}]   ;;  %s1604_s0 = inlined_call_operand.vmem [shape: bf16[8,1152], index: 0, kind: input, shape index: {}]   ;;  %s1605_s3 = inlined_call_operand.vmem [shape: bf16[128,128], index: 3, kind: input, shape index: {}]   ;;  %s1606_s2 = inlined_call_operand.vmem [shape: f32[1,128], index: 2, kind: input, shape index: {}]   ;;  %s1607_s4 = inlined_call_operand.vmem [shape: f32[1,128], index: 4, kind: input, shape index: {}]   ;;  %s1608_s6 = inlined_call_operand.vmem [shape: bf16[8,128], index: 6, kind: output, shape index: {1}]   ;;  %s1609_s5 = inlined_call_operand.vmem [shape: bf16[8,128], index: 5, kind: output, shape index: {0}]  }
   0x1   :  { %v1207_v0 = vld [vmem:[%s1603_s1 + $0x40] sm:$0xff]   ;;  %v1211_v4 = vld [vmem:[%s1603_s1 + $0x48] sm:$0xff]   ;;  %v1215_v8 = vld [vmem:[%s1603_s1 + $0x50] sm:$0xff]  }
   0x2   :  { %v1208_v1 = vld [vmem:[%s1603_s1 + $0xc0] sm:$0xff]   ;;  %1059 = vmatprep.subr.bf16.mxu0 %v1207_v0  ;;  %v1212_v5 = vld [vmem:[%s1603_s1 + $0xc8] sm:$0xff]   ;;  %v1216_v9 = vld [vmem:[%s1603_s1 + $0xd0] sm:$0xff]  }
   0x3   :  { %v1209_v2 = vld [vmem:[%s1603_s1] sm:$0xff]   ;;  %1081 = vmatprep.subr.bf16.mxu1 %v1208_v1  ;;  %v1213_v6 = vld [vmem:[%s1603_s1 + $0x8] sm:$0xff]   ;;  %v1217_v10 = vld [vmem:[%s1603_s1 + $0x10] sm:$0xff]  }
   0x4   :  { %v1210_v3 = vld [vmem:[%s1603_s1 + $0x80] sm:$0xff]   ;;  %1060 = vmatpush3.bf16.msra.mxu0 %v1209_v2  ;;  %v1214_v7 = vld [vmem:[%s1603_s1 + $0x88] sm:$0xff]   ;;  %v1218_v11 = vld [vmem:[%s1603_s1 + $0x90] sm:$0xff]  }
   0x5   :  { %1082 = vmatpush3.bf16.msra.mxu1 %v1210_v3  ;;  %1061 = vmatprep.subr.bf16.mxu0 %v1211_v4  ;;  %v1219_v12 = vld [vmem:[%s1603_s1 + $0x58] sm:$0xff]   ;;  %v1223_v16 = vld [vmem:[%s1603_s1 + $0x60] sm:$0xff]   ;;  %v1227_v20 = vld [vmem:[%s1603_s1 + $0x68] sm:$0xff]  }
   0x6   :  { %1083 = vmatprep.subr.bf16.mxu1 %v1212_v5  ;;  %v1220_v13 = vld [vmem:[%s1603_s1 + $0xd8] sm:$0xff]   ;;  %v1224_v17 = vld [vmem:[%s1603_s1 + $0xe0] sm:$0xff]   ;;  %v1228_v21 = vld [vmem:[%s1603_s1 + $0xe8] sm:$0xff]  }
   0x7   :  { %v1221_v14 = vld [vmem:[%s1603_s1 + $0x18] sm:$0xff]   ;;  %v1225_v18 = vld [vmem:[%s1603_s1 + $0x20] sm:$0xff]   ;;  %v1229_v22 = vld [vmem:[%s1603_s1 + $0x28] sm:$0xff]  }
   0x8   :  { %1062 = vmatpush3.bf16.msra.mxu0 %v1213_v6  ;;  %v1222_v15 = vld [vmem:[%s1603_s1 + $0x98] sm:$0xff]   ;;  %v1226_v19 = vld [vmem:[%s1603_s1 + $0xa0] sm:$0xff]   ;;  %v1230_v23 = vld [vmem:[%s1603_s1 + $0xa8] sm:$0xff]  }
   0x9   :  { %1084 = vmatpush3.bf16.msra.mxu1 %v1214_v7  ;;  %1063 = vmatprep.subr.bf16.mxu0 %v1215_v8  ;;  %v1231_v24 = vld [vmem:[%s1603_s1 + $0x70] sm:$0xff]   ;;  %v1235_v28 = vld [vmem:[%s1603_s1 + $0x78] sm:$0xff]   ;;  %v23_v32 = vld [vmem:[%s1604_s0] sm:$0xff] }
   0xa   :  { %1085 = vmatprep.subr.bf16.mxu1 %v1216_v9  ;;  %v1232_v25 = vld [vmem:[%s1603_s1 + $0xf0] sm:$0xff]   ;;  %v1236_v29 = vld [vmem:[%s1603_s1 + $0xf8] sm:$0xff]   ;;  %v24_v33 = vld [vmem:[%s1604_s0 + $0x8] sm:$0xff]  ;;  %v969_v34 = vcombine.low %v23_v32, %v23_v32  ;;  %v970_v35 = vcombine.high %v23_v32, %v23_v32 }
   0xb   :  { %v1233_v26 = vld [vmem:[%s1603_s1 + $0x30] sm:$0xff]   ;;  %v1237_v30 = vld [vmem:[%s1603_s1 + $0x38] sm:$0xff]   ;;  %v971_v36 = vcombine.low %v24_v33, %v24_v33  ;;  %v972_v37 = vcombine.high %v24_v33, %v24_v33  ;;  %v1243_v38 = vld [vmem:[%s1603_s1 + $0x140] sm:$0xff]  }
   0xc   :  { %1064 = vmatpush3.bf16.msra.mxu0 %v1217_v10  ;;  %v1234_v27 = vld [vmem:[%s1603_s1 + $0xb0] sm:$0xff]   ;;  %v1238_v31 = vld [vmem:[%s1603_s1 + $0xb8] sm:$0xff]   ;;  %v1244_v39 = vld [vmem:[%s1603_s1 + $0x1c0] sm:$0xff]   ;;  %675 = vmatprep.mubr.bf16.mxu0 %v970_v35 }
   0xd   :  { %1086 = vmatpush3.bf16.msra.mxu1 %v1218_v11  ;;  %1065 = vmatprep.subr.bf16.mxu0 %v1219_v12  ;;  %v1245_v40 = vld [vmem:[%s1603_s1 + $0x100] sm:$0xff]   ;;  %v1247_v42 = vld [vmem:[%s1603_s1 + $0x148] sm:$0xff]   ;;  %v1251_v46 = vld [vmem:[%s1603_s1 + $0x150] sm:$0xff]  }
   0xe   :  { %1087 = vmatprep.subr.bf16.mxu1 %v1220_v13  ;;  %715 = vmatprep.mubr.bf16.mxu1 %v972_v37  ;;  %v1246_v41 = vld [vmem:[%s1603_s1 + $0x180] sm:$0xff]   ;;  %v1248_v43 = vld [vmem:[%s1603_s1 + $0x1c8] sm:$0xff]   ;;  %v1252_v47 = vld [vmem:[%s1603_s1 + $0x1d0] sm:$0xff]   ;;  %v1296_v13 = vmov 0.0  }
   0xf   :  { %v1249_v44 = vld [vmem:[%s1603_s1 + $0x108] sm:$0xff]   ;;  %v1253_v48 = vld [vmem:[%s1603_s1 + $0x110] sm:$0xff]   ;;  %v1255_v50 = vld [vmem:[%s1603_s1 + $0x158] sm:$0xff]  }
  0x10   :  { %1066 = vmatpush3.bf16.msra.mxu0 %v1221_v14  ;;  %v1250_v45 = vld [vmem:[%s1603_s1 + $0x188] sm:$0xff]   ;;  %v1254_v49 = vld [vmem:[%s1603_s1 + $0x190] sm:$0xff]   ;;  %v1256_v51 = vld [vmem:[%s1603_s1 + $0x1d8] sm:$0xff]  }
  0x11   :  { %1088 = vmatpush3.bf16.msra.mxu1 %v1222_v15  ;;  %1067 = vmatprep.subr.bf16.mxu0 %v1223_v16  ;;  %v1257_v52 = vld [vmem:[%s1603_s1 + $0x118] sm:$0xff]   ;;  %v1259_v54 = vld [vmem:[%s1603_s1 + $0x160] sm:$0xff]   ;;  %v1263_v58 = vld [vmem:[%s1603_s1 + $0x168] sm:$0xff]  }
  0x12   :  { %1089 = vmatprep.subr.bf16.mxu1 %v1224_v17  ;;  %v1258_v53 = vld [vmem:[%s1603_s1 + $0x198] sm:$0xff]   ;;  %v1260_v55 = vld [vmem:[%s1603_s1 + $0x1e0] sm:$0xff]   ;;  %v1264_v59 = vld [vmem:[%s1603_s1 + $0x1e8] sm:$0xff]  }
  0x13   :  { %v1261_v56 = vld [vmem:[%s1603_s1 + $0x120] sm:$0xff]   ;;  %v1265_v60 = vld [vmem:[%s1603_s1 + $0x128] sm:$0xff]   ;;  %v1267_v62 = vld [vmem:[%s1603_s1 + $0x170] sm:$0xff]  }
  0x14   :  { %1068 = vmatpush3.bf16.msra.mxu0 %v1225_v18  ;;  %v1262_v57 = vld [vmem:[%s1603_s1 + $0x1a0] sm:$0xff]   ;;  %v1266_v61 = vld [vmem:[%s1603_s1 + $0x1a8] sm:$0xff]   ;;  %v1268_v63 = vld [vmem:[%s1603_s1 + $0x1f0] sm:$0xff]  }
  0x15   :  { %1090 = vmatpush3.bf16.msra.mxu1 %v1226_v19  ;;  %1069 = vmatprep.subr.bf16.mxu0 %v1227_v20  ;;  %v1269_v0 = vld [vmem:[%s1603_s1 + $0x130] sm:$0xff]   ;;  %v1271_v2 = vld [vmem:[%s1603_s1 + $0x178] sm:$0xff]   ;;  %v1279_v12 = vld [vmem:[%s1603_s1 + $0x200] sm:$0xff]  }
  0x16   :  { %1091 = vmatprep.subr.bf16.mxu1 %v1228_v21  ;;  %v1270_v1 = vld [vmem:[%s1603_s1 + $0x1b0] sm:$0xff]   ;;  %v1272_v3 = vld [vmem:[%s1603_s1 + $0x1f8] sm:$0xff]   ;;  %v1280_v14 = vld [vmem:[%s1605_s3] sm:$0xff]  }
  0x17   :  { %v1273_v4 = vld [vmem:[%s1603_s1 + $0x138] sm:$0xff]   ;;  %v25_v6 = vld [vmem:[%s1604_s0 + $0x10] sm:$0xff]  ;;  %v1281_v15 = vld [vmem:[%s1603_s1 + $0x208] sm:$0xff]  }
  0x18   :  { %1070 = vmatpush3.bf16.msra.mxu0 %v1229_v22  ;;  %v1274_v5 = vld [vmem:[%s1603_s1 + $0x1b8] sm:$0xff]   ;;  %v973_v7 = vcombine.low %v25_v6, %v25_v6  ;;  %v974_v8 = vcombine.high %v25_v6, %v25_v6  ;;  %v1282_v16 = vld [vmem:[%s1605_s3 + $0x8] sm:$0xff]   ;;  %v1283_v17 = vld [vmem:[%s1603_s1 + $0x210] sm:$0xff]  }
  0x19   :  { %1092 = vmatpush3.bf16.msra.mxu1 %v1230_v23  ;;  %1071 = vmatprep.subr.bf16.mxu0 %v1231_v24  ;;  %v26_v9 = vld [vmem:[%s1604_s0 + $0x18] sm:$0xff]  ;;  %v1284_v18 = vld [vmem:[%s1605_s3 + $0x10] sm:$0xff]   ;;  %v1287_v21 = vld [vmem:[%s1603_s1 + $0x220] sm:$0xff]  }
  0x1a   :  { %1093 = vmatprep.subr.bf16.mxu1 %v1232_v25  ;;  %v975_v10 = vcombine.low %v26_v9, %v26_v9  ;;  %v976_v11 = vcombine.high %v26_v9, %v26_v9  ;;  %v1285_v19 = vld [vmem:[%s1603_s1 + $0x218] sm:$0xff]   ;;  %v1288_v22 = vld [vmem:[%s1605_s3 + $0x20] sm:$0xff]   ;;  %v1289_v23 = vld [vmem:[%s1603_s1 + $0x228] sm:$0xff]  }
  0x1b   :  { %v1286_v20 = vld [vmem:[%s1605_s3 + $0x18] sm:$0xff]   ;;  %v1290_v24 = vld [vmem:[%s1605_s3 + $0x28] sm:$0xff]   ;;  %v1291_v25 = vld [vmem:[%s1603_s1 + $0x230] sm:$0xff]  }
  0x1c   :  { %1072 = vmatpush3.bf16.msra.mxu0 %v1233_v26  ;;  %v1292_v26 = vld [vmem:[%s1605_s3 + $0x30] sm:$0xff]   ;;  %v968_v33 = vld [vmem:[%s1606_s2] ss:$0 sm:$0xff] }
  0x1d   :  { %1094 = vmatpush3.bf16.msra.mxu1 %v1234_v27  ;;  %1073 = vmatprep.subr.bf16.mxu0 %v1235_v28  ;;  %v1293_v27 = vld [vmem:[%s1603_s1 + $0x238] sm:$0xff]  }
  0x1e   :  { %1095 = vmatprep.subr.bf16.mxu1 %v1236_v29  ;;  %v1294_v28 = vld [vmem:[%s1605_s3 + $0x38] sm:$0xff]   ;;  %v1295_v29 = vld [vmem:[%s1604_s0 + $0x20] ss:$0 sps:$4 sm:$0xff]  }
  0x20   :  { %1074 = vmatpush3.bf16.msra.mxu0 %v1237_v30  ;;  %v844_v30 = vld [vmem:[%s1604_s0 + $0x10] sm:$0xf] }
  0x21   :  { %1096 = vmatpush3.bf16.msra.mxu1 %v1238_v31  ;;  %1103 = vmatprep.subr.bf16.mxu0 %v1243_v38 }
  0x22   :  { %1125 = vmatprep.subr.bf16.mxu1 %v1244_v39 }
  0x23   :  { %676 = vmatmul.mubr.bf16.vlgmr.msra.gmra.mrb[0].mxu0 %v969_v34 }
  0x24   :  { %716 = vmatmul.mubr.bf16.vlgmr.msra.gmra.mrb[0].mxu1 %v971_v36  ;;  %1104 = vmatpush3.bf16.msra.mxu0 %v1245_v40 }
  0x25   :  { %1126 = vmatpush3.bf16.msra.mxu1 %v1246_v41  ;;  %1105 = vmatprep.subr.bf16.mxu0 %v1247_v42 }
  0x26   :  { %1127 = vmatprep.subr.bf16.mxu1 %v1248_v43  ;;  %755 = vmatprep.mubr.bf16.mxu0 %v974_v8 }
  0x27   :  { %795 = vmatprep.mubr.bf16.mxu1 %v976_v11 }
  0x28   :  { %1106 = vmatpush3.bf16.msra.mxu0 %v1249_v44 }
  0x29   :  { %1128 = vmatpush3.bf16.msra.mxu1 %v1250_v45  ;;  %1107 = vmatprep.subr.bf16.mxu0 %v1251_v46 }
  0x2a   :  { %1129 = vmatprep.subr.bf16.mxu1 %v1252_v47 }
  0x2c   :  { %1108 = vmatpush3.bf16.msra.mxu0 %v1253_v48 }
  0x2d   :  { %1130 = vmatpush3.bf16.msra.mxu1 %v1254_v49  ;;  %1109 = vmatprep.subr.bf16.mxu0 %v1255_v50 }
  0x2e   :  { %1131 = vmatprep.subr.bf16.mxu1 %v1256_v51 }
  0x30   :  { %1110 = vmatpush3.bf16.msra.mxu0 %v1257_v52 }
  0x31   :  { %1132 = vmatpush3.bf16.msra.mxu1 %v1258_v53  ;;  %1111 = vmatprep.subr.bf16.mxu0 %v1259_v54 }
  0x32   :  { %1133 = vmatprep.subr.bf16.mxu1 %v1260_v55 }
  0x34   :  { %1112 = vmatpush3.bf16.msra.mxu0 %v1261_v56  ;;  %v1050_v56 = vld [vmem:[%s1607_s4] ss:$0 sm:$0xff] }
  0x35   :  { %1134 = vmatpush3.bf16.msra.mxu1 %v1262_v57  ;;  %1113 = vmatprep.subr.bf16.mxu0 %v1263_v58 }
  0x36   :  { %1135 = vmatprep.subr.bf16.mxu1 %v1264_v59 }
  0x38   :  { %1114 = vmatpush3.bf16.msra.mxu0 %v1265_v60 }
  0x39   :  { %1136 = vmatpush3.bf16.msra.mxu1 %v1266_v61  ;;  %1115 = vmatprep.subr.bf16.mxu0 %v1267_v62 }
  0x3a   :  { %1137 = vmatprep.subr.bf16.mxu1 %v1268_v63 }
  0x3c   :  { %1116 = vmatpush3.bf16.msra.mxu0 %v1269_v0 }
  0x3d   :  { %1138 = vmatpush3.bf16.msra.mxu1 %v1270_v1  ;;  %1117 = vmatprep.subr.bf16.mxu0 %v1271_v2 }
  0x3e   :  { %1139 = vmatprep.subr.bf16.mxu1 %v1272_v3 }
  0x40   :  { %1118 = vmatpush3.bf16.msra.mxu0 %v1273_v4 }
  0x41   :  { %1140 = vmatpush3.bf16.msra.mxu1 %v1274_v5  ;;  %1165 = vmatprep.subr.bf16.mxu0 %v1296_v13 }
  0x42   :  { %1185 = vmatprep.subr.bf16.mxu1 %v1296_v13 }
  0x43   :  { %756 = vmatmul.mubr.bf16.vlgmr.msra.gmra.mrb[4].mxu0 %v973_v7 }
  0x44   :  { %796 = vmatmul.mubr.bf16.vlgmr.msra.gmra.mrb[4].mxu1 %v975_v10  ;;  %1166 = vmatpush3.bf16.msra.mxu0 %v1279_v12 }
  0x45   :  { %1186 = vmatpush3.bf16.msra.mxu1 %v1280_v14  ;;  %1167 = vmatprep.subr.bf16.mxu0 %v1296_v13 }
  0x46   :  { %1187 = vmatprep.subr.bf16.mxu1 %v1296_v13  ;;  %1181 = vmatprep.mubr.msk.bf16.mxu0 %vm1297_vm0, %v1296_v13 }
  0x47   :  { %1201 = vmatprep.mubr.msk.bf16.mxu1 %vm1297_vm0, %v1296_v13 }
  0x48   :  { %1168 = vmatpush3.bf16.msra.mxu0 %v1281_v15 }
  0x49   :  { %1188 = vmatpush3.bf16.msra.mxu1 %v1282_v16  ;;  %1169 = vmatprep.subr.bf16.mxu0 %v1296_v13 }
  0x4a   :  { %1189 = vmatprep.subr.bf16.mxu1 %v1296_v13 }
  0x4c   :  { %1170 = vmatpush3.bf16.msra.mxu0 %v1283_v17 }
  0x4d   :  { %1190 = vmatpush3.bf16.msra.mxu1 %v1284_v18  ;;  %1171 = vmatprep.subr.bf16.mxu0 %v1296_v13 }
  0x4e   :  { %1191 = vmatprep.subr.bf16.mxu1 %v1296_v13 }
  0x50   :  { %1172 = vmatpush3.bf16.msra.mxu0 %v1285_v19 }
  0x51   :  { %1192 = vmatpush3.bf16.msra.mxu1 %v1286_v20  ;;  %1173 = vmatprep.subr.bf16.mxu0 %v1296_v13 }
  0x52   :  { %1193 = vmatprep.subr.bf16.mxu1 %v1296_v13 }
  0x54   :  { %1174 = vmatpush3.bf16.msra.mxu0 %v1287_v21 }
  0x55   :  { %1194 = vmatpush3.bf16.msra.mxu1 %v1288_v22  ;;  %1175 = vmatprep.subr.bf16.mxu0 %v1296_v13 }
  0x56   :  { %1195 = vmatprep.subr.bf16.mxu1 %v1296_v13 }
  0x58   :  { %1176 = vmatpush3.bf16.msra.mxu0 %v1289_v23 }
  0x59   :  { %1196 = vmatpush3.bf16.msra.mxu1 %v1290_v24  ;;  %1177 = vmatprep.subr.bf16.mxu0 %v1296_v13 }
  0x5a   :  { %1197 = vmatprep.subr.bf16.mxu1 %v1296_v13 }
  0x5c   :  { %1178 = vmatpush3.bf16.msra.mxu0 %v1291_v25 }
  0x5d   :  { %1198 = vmatpush3.bf16.msra.mxu1 %v1292_v26  ;;  %1179 = vmatprep.subr.bf16.mxu0 %v1296_v13 }
  0x5e   :  { %1199 = vmatprep.subr.bf16.mxu1 %v1296_v13 }
  0x60   :  { %1180 = vmatpush3.bf16.msra.mxu0 %v1293_v27 }
  0x61   :  { %1200 = vmatpush3.bf16.msra.mxu1 %v1294_v28 }
  0x63   :  { %1182 = vmatmul.mubr.bf16.vlgmr.msra.gmra.mrb[8].mxu0 %v1295_v29 }
  0x64   :  { %1202 = vmatmul.mubr.bf16.vlgmr.msra.gmra.mrb[8].mxu1 %v844_v30 }
  0xf6   :  { %v1075_v31 = vpop.f32.mrb[0].mxu0 }
  0xf7   :  { %v1097_v32 = vpop.f32.mrb[0].mxu1  ;;  %v1076_v34 = vpop.f32.mrb[1].mxu0 }
  0xf8   :  { %v1098_v35 = vpop.f32.mrb[1].mxu1  ;;  %v1077_v36 = vadd.f32 %v1076_v34, %v1075_v31  ;;  %v1078_v38 = vpop.f32.mrb[2].mxu0 }
  0xf9   :  { %v1099_v37 = vadd.f32 %v1098_v35, %v1097_v32  ;;  %v1100_v39 = vpop.f32.mrb[2].mxu1  ;;  %v1079_v40 = vpop.f32.mrb[3].mxu0 }
  0xfa   :  { %v1101_v41 = vpop.f32.mrb[3].mxu1  ;;  %v678_v42 = vadd.f32 %v1077_v36, %v968_v33 }
  0xfc   :  { %v718_v43 = vadd.f32 %v1099_v37, %v678_v42 }
 0x116   :  { %v1119_v44 = vpop.f32.mrb[4].mxu0 }
 0x117   :  { %v1141_v45 = vpop.f32.mrb[4].mxu1  ;;  %v1120_v46 = vpop.f32.mrb[5].mxu0 }
 0x118   :  { %v1142_v47 = vpop.f32.mrb[5].mxu1  ;;  %v1121_v48 = vadd.f32 %v1120_v46, %v1119_v44  ;;  %v1122_v50 = vpop.f32.mrb[6].mxu0 }
 0x119   :  { %v1143_v49 = vadd.f32 %v1142_v47, %v1141_v45  ;;  %v1144_v51 = vpop.f32.mrb[6].mxu1  ;;  %v1123_v52 = vpop.f32.mrb[7].mxu0 }
 0x11a   :  { %v1145_v53 = vpop.f32.mrb[7].mxu1  ;;  %v758_v54 = vadd.f32 %v1121_v48, %v718_v43 }
 0x11c   :  { %v798_v55 = vadd.f32 %v1143_v49, %v758_v54 }
 0x136   :  { %v837_v57 = vpop.f32.mrb[8].mxu0 }
 0x137   :  { %v950_v58 = vpop.f32.mrb[8].mxu1  ;;  %v838_v59 = vadd.f32 %v837_v57, %v798_v55  ;;  %v1183_v61 = vpop.f32.mrb[9].mxu0 }
 0x138   :  { %v951_v60 = vadd.f32 %v1050_v56, %v950_v58  ;;  %v1203_v62 = vpop.f32.mrb[9].mxu1  ;;  %v840_v63 = vpop.f32.mrb[10].mxu0 }
 0x139   :  { %v953_v0 = vpop.f32.mrb[10].mxu1  ;;  %v843_v1 = vmax.f32 %v838_v59, 0.0  ;;  %v1184_v3 = vpop.f32.mrb[11].mxu0 }
 0x13a   :  { %v958_v2 = vpack.c.bf16 %v951_v60, %v951_v60  ;;  %v1204_v4 = vpop.f32.mrb[11].mxu1 }
 0x13b   :  { %v956_v5 = vpack.c.bf16 %v843_v1, %v843_v1 }
 0x13c   :  { %959 = vst [vmem:[%s1608_s6] sm:$0xf] %v958_v2 }
 0x13d   :  { %957 = vst [vmem:[%s1609_s5] sm:$0xf] %v956_v5 }

// kernel: resnet_forward.9
= control target key start
LH: loop header
LB: loop body
LE: loop exit
PB: predicated region body
PF: predicated region fallthrough
CT: control target
= control target key end

     0   :  { %vm1362_vm0 = vmmov 0   ;;  %s1700_s0 = inlined_call_operand.vmem [shape: bf16[8,1152], index: 0, kind: input, shape index: {}]   ;;  %s1701_s1 = inlined_call_operand.vmem [shape: bf16[1152,128], index: 1, kind: input, shape index: {}]   ;;  %s1702_s2 = inlined_call_operand.vmem [shape: f32[1,128], index: 2, kind: input, shape index: {}]   ;;  %s1703_s3 = inlined_call_operand.vmem [shape: bf16[8,128], index: 3, kind: input, shape index: {}]   ;;  %s1704_s4 = inlined_call_operand.vmem [shape: f32[128,5], index: 4, kind: input, shape index: {}]   ;;  %s1705_s5 = inlined_call_operand.vmem [shape: f32[1,5], index: 5, kind: input, shape index: {}]   ;;  %s1706_s6 = inlined_call_operand.hbm [shape: f32[2,5], index: 6, kind: output, shape index: {}]  }
   0x1   :  { %v1256_v0 = vld [vmem:[%s1701_s1 + $0x40] sm:$0xff]   ;;  %v1260_v4 = vld [vmem:[%s1701_s1 + $0x48] sm:$0xff]   ;;  %v1264_v8 = vld [vmem:[%s1701_s1 + $0x50] sm:$0xff]  }
   0x2   :  { %v1257_v1 = vld [vmem:[%s1701_s1] sm:$0xff]   ;;  %1059 = vmatprep.subr.bf16.mxu0 %v1256_v0  ;;  %v1261_v5 = vld [vmem:[%s1701_s1 + $0x8] sm:$0xff]   ;;  %v1265_v9 = vld [vmem:[%s1701_s1 + $0x10] sm:$0xff]  }
   0x3   :  { %v1258_v2 = vld [vmem:[%s1701_s1 + $0xc0] sm:$0xff]   ;;  %1060 = vmatpush3.bf16.msra.mxu0 %v1257_v1  ;;  %v1262_v6 = vld [vmem:[%s1701_s1 + $0xc8] sm:$0xff]   ;;  %v1266_v10 = vld [vmem:[%s1701_s1 + $0xd0] sm:$0xff]  }
   0x4   :  { %v1259_v3 = vld [vmem:[%s1701_s1 + $0x80] sm:$0xff]   ;;  %1081 = vmatprep.subr.bf16.mxu1 %v1258_v2  ;;  %1061 = vmatprep.subr.bf16.mxu0 %v1260_v4  ;;  %v1263_v7 = vld [vmem:[%s1701_s1 + $0x88] sm:$0xff]   ;;  %v1267_v11 = vld [vmem:[%s1701_s1 + $0x90] sm:$0xff]  }
   0x5   :  { %1082 = vmatpush3.bf16.msra.mxu1 %v1259_v3  ;;  %v1268_v12 = vld [vmem:[%s1701_s1 + $0x58] sm:$0xff]   ;;  %v1272_v16 = vld [vmem:[%s1701_s1 + $0x60] sm:$0xff]   ;;  %v1276_v20 = vld [vmem:[%s1701_s1 + $0x68] sm:$0xff]  }
   0x6   :  { %1083 = vmatprep.subr.bf16.mxu1 %v1262_v6  ;;  %v1269_v13 = vld [vmem:[%s1701_s1 + $0x18] sm:$0xff]   ;;  %v1273_v17 = vld [vmem:[%s1701_s1 + $0x20] sm:$0xff]   ;;  %v1277_v21 = vld [vmem:[%s1701_s1 + $0x28] sm:$0xff]  }
   0x7   :  { %1062 = vmatpush3.bf16.msra.mxu0 %v1261_v5  ;;  %v1270_v14 = vld [vmem:[%s1701_s1 + $0xd8] sm:$0xff]   ;;  %v1274_v18 = vld [vmem:[%s1701_s1 + $0xe0] sm:$0xff]   ;;  %v1278_v22 = vld [vmem:[%s1701_s1 + $0xe8] sm:$0xff]  }
   0x8   :  { %1063 = vmatprep.subr.bf16.mxu0 %v1264_v8  ;;  %v1271_v15 = vld [vmem:[%s1701_s1 + $0x98] sm:$0xff]   ;;  %v1275_v19 = vld [vmem:[%s1701_s1 + $0xa0] sm:$0xff]   ;;  %v1279_v23 = vld [vmem:[%s1701_s1 + $0xa8] sm:$0xff]  }
   0x9   :  { %1084 = vmatpush3.bf16.msra.mxu1 %v1263_v7  ;;  %v1280_v24 = vld [vmem:[%s1701_s1 + $0x70] sm:$0xff]   ;;  %v1284_v28 = vld [vmem:[%s1701_s1 + $0x78] sm:$0xff]   ;;  %v25_v31 = vld [vmem:[%s1700_s0] sm:$0xff] }
   0xa   :  { %1085 = vmatprep.subr.bf16.mxu1 %v1266_v10  ;;  %v1281_v25 = vld [vmem:[%s1701_s1 + $0x30] sm:$0xff]   ;;  %v1285_v29 = vld [vmem:[%s1701_s1 + $0x38] sm:$0xff]   ;;  %v977_v32 = vcombine.low %v25_v31, %v25_v31  ;;  %v978_v33 = vcombine.high %v25_v31, %v25_v31  ;;  %v1290_v35 = vld [vmem:[%s1701_s1 + $0x140] sm:$0xff]  }
   0xb   :  { %1064 = vmatpush3.bf16.msra.mxu0 %v1265_v9  ;;  %v1282_v26 = vld [vmem:[%s1701_s1 + $0xf0] sm:$0xff]   ;;  %v1286_v30 = vld [vmem:[%s1701_s1 + $0xf8] sm:$0xff]   ;;  %v26_v36 = vld [vmem:[%s1700_s0 + $0x8] sm:$0xff]  ;;  %v1361_v9 = vmov 0.0  }
   0xc   :  { %1065 = vmatprep.subr.bf16.mxu0 %v1268_v12  ;;  %v1283_v27 = vld [vmem:[%s1701_s1 + $0xb0] sm:$0xff]   ;;  %v1289_v34 = vld [vmem:[%s1701_s1 + $0xb8] sm:$0xff]   ;;  %677 = vmatprep.mubr.bf16.mxu0 %v978_v33  ;;  %v979_v37 = vcombine.low %v26_v36, %v26_v36  ;;  %v980_v38 = vcombine.high %v26_v36, %v26_v36  ;;  %v1293_v39 = vld [vmem:[%s1701_s1 + $0x100] sm:$0xff]  }
   0xd   :  { %1086 = vmatpush3.bf16.msra.mxu1 %v1267_v11  ;;  %v1294_v40 = vld [vmem:[%s1701_s1 + $0x1c0] sm:$0xff]   ;;  %v1296_v42 = vld [vmem:[%s1701_s1 + $0x148] sm:$0xff]   ;;  %v1300_v46 = vld [vmem:[%s1701_s1 + $0x150] sm:$0xff]  }
   0xe   :  { %1087 = vmatprep.subr.bf16.mxu1 %v1270_v14  ;;  %717 = vmatprep.mubr.bf16.mxu1 %v980_v38  ;;  %v1295_v41 = vld [vmem:[%s1701_s1 + $0x180] sm:$0xff]   ;;  %v1297_v43 = vld [vmem:[%s1701_s1 + $0x108] sm:$0xff]   ;;  %v1301_v47 = vld [vmem:[%s1701_s1 + $0x110] sm:$0xff]  }
   0xf   :  { %1066 = vmatpush3.bf16.msra.mxu0 %v1269_v13  ;;  %v1298_v44 = vld [vmem:[%s1701_s1 + $0x1c8] sm:$0xff]   ;;  %v1302_v48 = vld [vmem:[%s1701_s1 + $0x1d0] sm:$0xff]   ;;  %v1304_v50 = vld [vmem:[%s1701_s1 + $0x158] sm:$0xff]  }
  0x10   :  { %1067 = vmatprep.subr.bf16.mxu0 %v1272_v16  ;;  %v1299_v45 = vld [vmem:[%s1701_s1 + $0x188] sm:$0xff]   ;;  %v1303_v49 = vld [vmem:[%s1701_s1 + $0x190] sm:$0xff]   ;;  %v1305_v51 = vld [vmem:[%s1701_s1 + $0x118] sm:$0xff]  }
  0x11   :  { %1088 = vmatpush3.bf16.msra.mxu1 %v1271_v15  ;;  %v1306_v52 = vld [vmem:[%s1701_s1 + $0x1d8] sm:$0xff]   ;;  %v1308_v54 = vld [vmem:[%s1701_s1 + $0x160] sm:$0xff]   ;;  %v1312_v58 = vld [vmem:[%s1701_s1 + $0x168] sm:$0xff]  }
  0x12   :  { %1089 = vmatprep.subr.bf16.mxu1 %v1274_v18  ;;  %v1307_v53 = vld [vmem:[%s1701_s1 + $0x198] sm:$0xff]   ;;  %v1309_v55 = vld [vmem:[%s1701_s1 + $0x120] sm:$0xff]   ;;  %v1313_v59 = vld [vmem:[%s1701_s1 + $0x128] sm:$0xff]  }
  0x13   :  { %1068 = vmatpush3.bf16.msra.mxu0 %v1273_v17  ;;  %v1310_v56 = vld [vmem:[%s1701_s1 + $0x1e0] sm:$0xff]   ;;  %v1314_v60 = vld [vmem:[%s1701_s1 + $0x1e8] sm:$0xff]   ;;  %v1316_v62 = vld [vmem:[%s1701_s1 + $0x170] sm:$0xff]  }
  0x14   :  { %1069 = vmatprep.subr.bf16.mxu0 %v1276_v20  ;;  %v1311_v57 = vld [vmem:[%s1701_s1 + $0x1a0] sm:$0xff]   ;;  %v1315_v61 = vld [vmem:[%s1701_s1 + $0x1a8] sm:$0xff]   ;;  %v1317_v63 = vld [vmem:[%s1701_s1 + $0x130] sm:$0xff]  }
  0x15   :  { %1090 = vmatpush3.bf16.msra.mxu1 %v1275_v19  ;;  %v1318_v0 = vld [vmem:[%s1701_s1 + $0x1f0] sm:$0xff]   ;;  %v1320_v2 = vld [vmem:[%s1701_s1 + $0x178] sm:$0xff]   ;;  %v1328_v13 = vld [vmem:[%s1701_s1 + $0x200] sm:$0xff]  }
  0x16   :  { %1091 = vmatprep.subr.bf16.mxu1 %v1278_v22  ;;  %v1319_v1 = vld [vmem:[%s1701_s1 + $0x1b0] sm:$0xff]   ;;  %v1321_v3 = vld [vmem:[%s1701_s1 + $0x138] sm:$0xff]   ;;  %v1329_v14 = vld [vmem:[%s1701_s1 + $0x208] sm:$0xff]  }
  0x17   :  { %1070 = vmatpush3.bf16.msra.mxu0 %v1277_v21  ;;  %v1322_v4 = vld [vmem:[%s1701_s1 + $0x1f8] sm:$0xff]   ;;  %v27_v5 = vld [vmem:[%s1700_s0 + $0x10] sm:$0xff] }
  0x18   :  { %1071 = vmatprep.subr.bf16.mxu0 %v1280_v24  ;;  %v981_v6 = vcombine.low %v27_v5, %v27_v5  ;;  %v982_v7 = vcombine.high %v27_v5, %v27_v5  ;;  %v1325_v8 = vld [vmem:[%s1701_s1 + $0x1b8] sm:$0xff]   ;;  %v1330_v15 = vld [vmem:[%s1701_s1 + $0x210] sm:$0xff]  }
  0x19   :  { %1092 = vmatpush3.bf16.msra.mxu1 %v1279_v23  ;;  %v28_v10 = vld [vmem:[%s1700_s0 + $0x18] sm:$0xff] }
  0x1a   :  { %1093 = vmatprep.subr.bf16.mxu1 %v1282_v26  ;;  %v983_v11 = vcombine.low %v28_v10, %v28_v10  ;;  %v984_v12 = vcombine.high %v28_v10, %v28_v10 }
  0x1b   :  { %1072 = vmatpush3.bf16.msra.mxu0 %v1281_v25 }
  0x1c   :  { %1073 = vmatprep.subr.bf16.mxu0 %v1284_v28 }
  0x1d   :  { %1094 = vmatpush3.bf16.msra.mxu1 %v1283_v27 }
  0x1e   :  { %1095 = vmatprep.subr.bf16.mxu1 %v1286_v30 }
  0x1f   :  { %1074 = vmatpush3.bf16.msra.mxu0 %v1285_v29 }
  0x20   :  { %1103 = vmatprep.subr.bf16.mxu0 %v1290_v35 }
  0x21   :  { %1096 = vmatpush3.bf16.msra.mxu1 %v1289_v34 }
  0x22   :  { %678 = vmatmul.mubr.bf16.vlgmr.msra.gmra.mrb[0].mxu0 %v977_v32  ;;  %1125 = vmatprep.subr.bf16.mxu1 %v1294_v40 }
  0x23   :  { %1104 = vmatpush3.bf16.msra.mxu0 %v1293_v39  ;;  %757 = vmatprep.mubr.bf16.mxu0 %v982_v7 }
  0x24   :  { %718 = vmatmul.mubr.bf16.vlgmr.msra.gmra.mrb[0].mxu1 %v979_v37  ;;  %1105 = vmatprep.subr.bf16.mxu0 %v1296_v42 }
  0x25   :  { %1126 = vmatpush3.bf16.msra.mxu1 %v1295_v41  ;;  %797 = vmatprep.mubr.bf16.mxu1 %v984_v12 }
  0x26   :  { %1127 = vmatprep.subr.bf16.mxu1 %v1298_v44 }
  0x27   :  { %1106 = vmatpush3.bf16.msra.mxu0 %v1297_v43 }
  0x28   :  { %1107 = vmatprep.subr.bf16.mxu0 %v1300_v46 }
  0x29   :  { %1128 = vmatpush3.bf16.msra.mxu1 %v1299_v45 }
  0x2a   :  { %1129 = vmatprep.subr.bf16.mxu1 %v1302_v48 }
  0x2b   :  { %1108 = vmatpush3.bf16.msra.mxu0 %v1301_v47 }
  0x2c   :  { %1109 = vmatprep.subr.bf16.mxu0 %v1304_v50 }
  0x2d   :  { %1130 = vmatpush3.bf16.msra.mxu1 %v1303_v49 }
  0x2e   :  { %1131 = vmatprep.subr.bf16.mxu1 %v1306_v52 }
  0x2f   :  { %1110 = vmatpush3.bf16.msra.mxu0 %v1305_v51 }
  0x30   :  { %1111 = vmatprep.subr.bf16.mxu0 %v1308_v54 }
  0x31   :  { %1132 = vmatpush3.bf16.msra.mxu1 %v1307_v53 }
  0x32   :  { %1133 = vmatprep.subr.bf16.mxu1 %v1310_v56 }
  0x33   :  { %1112 = vmatpush3.bf16.msra.mxu0 %v1309_v55 }
  0x34   :  { %1113 = vmatprep.subr.bf16.mxu0 %v1312_v58 }
  0x35   :  { %1134 = vmatpush3.bf16.msra.mxu1 %v1311_v57 }
  0x36   :  { %1135 = vmatprep.subr.bf16.mxu1 %v1314_v60 }
  0x37   :  { %1114 = vmatpush3.bf16.msra.mxu0 %v1313_v59 }
  0x38   :  { %1115 = vmatprep.subr.bf16.mxu0 %v1316_v62 }
  0x39   :  { %1136 = vmatpush3.bf16.msra.mxu1 %v1315_v61 }
  0x3a   :  { %1137 = vmatprep.subr.bf16.mxu1 %v1318_v0 }
  0x3b   :  { %1116 = vmatpush3.bf16.msra.mxu0 %v1317_v63 }
  0x3c   :  { %1117 = vmatprep.subr.bf16.mxu0 %v1320_v2 }
  0x3d   :  { %1138 = vmatpush3.bf16.msra.mxu1 %v1319_v1 }
  0x3e   :  { %1139 = vmatprep.subr.bf16.mxu1 %v1322_v4 }
  0x3f   :  { %1118 = vmatpush3.bf16.msra.mxu0 %v1321_v3 }
  0x40   :  { %1173 = vmatprep.subr.bf16.mxu0 %v1361_v9 }
  0x41   :  { %1140 = vmatpush3.bf16.msra.mxu1 %v1325_v8 }
  0x42   :  { %758 = vmatmul.mubr.bf16.vlgmr.msra.gmra.mrb[4].mxu0 %v981_v6 }
  0x43   :  { %1174 = vmatpush3.bf16.msra.mxu0 %v1328_v13  ;;  %1189 = vmatprep.mubr.msk.bf16.mxu0 %vm1362_vm0, %v1361_v9 }
  0x44   :  { %798 = vmatmul.mubr.bf16.vlgmr.msra.gmra.mrb[4].mxu1 %v983_v11  ;;  %1175 = vmatprep.subr.bf16.mxu0 %v1361_v9 }
  0x45   :  { %1225 = vmatprep.mubr.msk.f32.mxu1 %vm1362_vm0, %v1361_v9 }
  0x47   :  { %1176 = vmatpush3.bf16.msra.mxu0 %v1329_v14 }
  0x48   :  { %1177 = vmatprep.subr.bf16.mxu0 %v1361_v9 }
  0x49   :  { %11 = vsyncpa [#allocation3], 0  ;;  %v1331_v16 = vld [vmem:[%s1701_s1 + $0x218] sm:$0xff]   ;;  %v1332_v17 = vld [vmem:[%s1701_s1 + $0x220] sm:$0xff]   ;;  %v1363_v25 = vmov 0.0|0.0   ;;  %vm849_vm1 = vcmask 1043456  }
  0x4a   :  { %v1333_v18 = vld [vmem:[%s1701_s1 + $0x228] sm:$0xff]   ;;  %v1334_v19 = vld [vmem:[%s1701_s1 + $0x230] sm:$0xff]   ;;  %v1335_v20 = vld [vmem:[%s1701_s1 + $0x238] sm:$0xff]   ;;  %1228 = vmatprep.subr.bf16.mxu1 %v1363_v25  ;;  %vm857_vm2 = vcmask 1047556   ;;  %vm865_vm3 = vcmask 1040384   ;;  %s1364_s14 = smov [#allocation2]  }
  0x4b   :  { %1178 = vmatpush3.bf16.msra.mxu0 %v1330_v15  ;;  %v1336_v21 = vld [vmem:[%s1700_s0 + $0x20] ss:$0 sps:$4 sm:$0xff]   ;;  %v868_v23 = vld [vmem:[%s1704_s4 + $0x8] sm:$0xff]  ;;  %v869_v24 = vld [vmem:[%s1704_s4 + $0x10] sm:$0xff]  ;;  %s968_s15 = sshll.u32 %s1364_s14, 4  ;;  %vm960_vm4 = vcmask 33792   ;;  %s969_s15 = int_to_ptr.vmem [resolvable:$true] %s968_s15 }
  0x4c   :  { %1179 = vmatprep.subr.bf16.mxu0 %v1361_v9  ;;  %v867_v22 = vld [vmem:[%s1704_s4] sm:$0xff]  ;;  %v870_v27 = vld [vmem:[%s1704_s4 + $0x18] sm:$0xff]  ;;  %v872_v30 = vld [vmem:[%s1704_s4 + $0x28] sm:$0xff]  ;;  %s1337_s16 = scalar_lea.vmem %s969_s15, 32  ;;  %p1342_p1 = scmp.lt.s32.totalorder %s969_s15, %s969_s15 }
  0x4d   :  { %v1229_v26 = vpack.c.bf16 %v868_v23, %v867_v22  ;;  %v1232_v28 = vpack.c.bf16 %v870_v27, %v869_v24  ;;  %v871_v29 = vld [vmem:[%s1704_s4 + $0x20] sm:$0xff]  ;;  %v873_v32 = vld [vmem:[%s1704_s4 + $0x30] sm:$0xff]  ;;  %v874_v33 = vld [vmem:[%s1704_s4 + $0x38] sm:$0xff]  ;;  %p1338_p0 = scmp.ne.s32.totalorder %s969_s15, %s1337_s16  ;;  %p1343_p2 = scmp.lt.s32.totalorder %s1337_s16, %s1337_s16 }
  0x4e   :  { %v1235_v31 = vpack.c.bf16 %v872_v30, %v871_v29  ;;  %v1238_v34 = vpack.c.bf16 %v874_v33, %v873_v32  ;;  %v875_v35 = vld [vmem:[%s1704_s4 + $0x40] sm:$0xff]  ;;  %v876_v36 = vld [vmem:[%s1704_s4 + $0x48] sm:$0xff]  ;;  %v877_v38 = vld [vmem:[%s1704_s4 + $0x50] sm:$0xff] }
  0x4f   :  { %1180 = vmatpush3.bf16.msra.mxu0 %v1331_v16  ;;  %1230 = vmatpush3.bf16.msra.mxu1 %v1229_v26  ;;  %v1241_v37 = vpack.c.bf16 %v876_v36, %v875_v35  ;;  %v878_v39 = vld [vmem:[%s1704_s4 + $0x58] sm:$0xff]  ;;  %v879_v41 = vld [vmem:[%s1704_s4 + $0x60] sm:$0xff]  ;;  %v880_v42 = vld [vmem:[%s1704_s4 + $0x68] sm:$0xff]  ;;  %p1344_p3 = por %p1343_p2, %p1342_p1 }
  0x50   :  { %1181 = vmatprep.subr.bf16.mxu0 %v1361_v9  ;;  %1231 = vmatprep.subr.bf16.mxu1 %v1363_v25  ;;  %v1244_v40 = vpack.c.bf16 %v878_v39, %v877_v38  ;;  %v1247_v43 = vpack.c.bf16 %v880_v42, %v879_v41  ;;  %v881_v44 = vld [vmem:[%s1704_s4 + $0x70] sm:$0xff]  ;;  %v882_v45 = vld [vmem:[%s1704_s4 + $0x78] sm:$0xff]  ;;  %v976_v48 = vld [vmem:[%s1702_s2] ss:$0 sm:$0xff] }
  0x51   :  { %v1250_v46 = vpack.c.bf16 %v882_v45, %v881_v44  ;;  %v845_v8 = vld [vmem:[%s1703_s3] sm:$0xf]  ;;  %p1345_p4 = pnand %p1344_p3, %p1338_p0 }
  0x52   :  { %v1058_v32 = vld [vmem:[%s1705_s5] ss:$0 sm:$0xff] }
  0x53   :  { %1182 = vmatpush3.bf16.msra.mxu0 %v1332_v17  ;;  %1233 = vmatpush3.bf16.msra.mxu1 %v1232_v28 }
  0x54   :  { %1183 = vmatprep.subr.bf16.mxu0 %v1361_v9  ;;  %1234 = vmatprep.subr.bf16.mxu1 %v1363_v25 }
  0x57   :  { %1184 = vmatpush3.bf16.msra.mxu0 %v1333_v18  ;;  %1236 = vmatpush3.bf16.msra.mxu1 %v1235_v31 }
  0x58   :  { %1185 = vmatprep.subr.bf16.mxu0 %v1361_v9  ;;  %1237 = vmatprep.subr.bf16.mxu1 %v1363_v25 }
  0x5b   :  { %1186 = vmatpush3.bf16.msra.mxu0 %v1334_v19  ;;  %1239 = vmatpush3.bf16.msra.mxu1 %v1238_v34 }
  0x5c   :  { %1187 = vmatprep.subr.bf16.mxu0 %v1361_v9  ;;  %1240 = vmatprep.subr.bf16.mxu1 %v1363_v25  ;;  %v846_v9 = vunpack.c.l.bf16 %v845_v8 }
  0x5f   :  { %1188 = vmatpush3.bf16.msra.mxu0 %v1335_v20  ;;  %1242 = vmatpush3.bf16.msra.mxu1 %v1241_v37 }
  0x60   :  { %1243 = vmatprep.subr.bf16.mxu1 %v1363_v25 }
  0x62   :  { %1190 = vmatmul.mubr.bf16.vlgmr.msra.gmra.mrb[8].mxu0 %v1336_v21 }
  0x63   :  { %1245 = vmatpush3.bf16.msra.mxu1 %v1244_v40 }
  0x64   :  { %1246 = vmatprep.subr.bf16.mxu1 %v1363_v25 }
  0x67   :  { %1248 = vmatpush3.bf16.msra.mxu1 %v1247_v43 }
  0x68   :  { %1249 = vmatprep.subr.bf16.mxu1 %v1363_v25 }
  0x6b   :  { %1251 = vmatpush3.bf16.msra.mxu1 %v1250_v46 }
  0xf5   :  { %v1075_v47 = vpop.f32.mrb[0].mxu0 }
  0xf6   :  { %v1076_v49 = vpop.f32.mrb[1].mxu0 }
  0xf7   :  { %v1077_v50 = vadd.f32 %v1076_v49, %v1075_v47  ;;  %v1078_v51 = vpop.f32.mrb[2].mxu0  ;;  %v1097_v52 = vpop.f32.mrb[0].mxu1 }
  0xf8   :  { %v1079_v53 = vpop.f32.mrb[3].mxu0  ;;  %v1098_v54 = vpop.f32.mrb[1].mxu1 }
  0xf9   :  { %v680_v55 = vadd.f32 %v1077_v50, %v976_v48  ;;  %v1099_v56 = vadd.f32 %v1098_v54, %v1097_v52  ;;  %v1100_v57 = vpop.f32.mrb[2].mxu1 }
  0xfa   :  { %v1101_v58 = vpop.f32.mrb[3].mxu1 }
  0xfb   :  { %v720_v59 = vadd.f32 %v1099_v56, %v680_v55 }
 0x115   :  { %v1119_v60 = vpop.f32.mrb[4].mxu0 }
 0x116   :  { %v1120_v61 = vpop.f32.mrb[5].mxu0 }
 0x117   :  { %v1121_v62 = vadd.f32 %v1120_v61, %v1119_v60  ;;  %v1122_v63 = vpop.f32.mrb[6].mxu0  ;;  %v1141_v0 = vpop.f32.mrb[4].mxu1 }
 0x118   :  { %v1123_v1 = vpop.f32.mrb[7].mxu0  ;;  %v1142_v2 = vpop.f32.mrb[5].mxu1 }
 0x119   :  { %v760_v3 = vadd.f32 %v1121_v62, %v720_v59  ;;  %v1143_v4 = vadd.f32 %v1142_v2, %v1141_v0  ;;  %v1144_v5 = vpop.f32.mrb[6].mxu1 }
 0x11a   :  { %v1145_v6 = vpop.f32.mrb[7].mxu1 }
 0x11b   :  { %v800_v7 = vadd.f32 %v1143_v4, %v760_v3 }
 0x135   :  { %v839_v10 = vpop.f32.mrb[8].mxu0 }
 0x136   :  { %v840_v11 = vadd.f32 %v839_v10, %v800_v7  ;;  %v1191_v12 = vpop.f32.mrb[9].mxu0 }
 0x137   :  { %v842_v13 = vpop.f32.mrb[10].mxu0 }
 0x138   :  { %v847_v14 = vadd.f32 %v846_v9, %v840_v11  ;;  %v1192_v15 = vpop.f32.mrb[11].mxu0 }
 0x13a   :  { %v848_v16 = vmax.f32 %v847_v14, 0.0 }
 0x13c   :  { %v850_v17 = vsel %vm849_vm1, %v848_v16, -inf  ;;  %v858_v18 = vsel %vm857_vm2, %v848_v16, -inf }
 0x13d   :  { %v851_v19 = vrot.slane %v850_v17, 4  ;;  %v859_v20 = vrot.slane %v858_v18, 4 }
 0x13f   :  { %v852_v21 = vmax.f32 %v850_v17, %v851_v19  ;;  %v860_v22 = vmax.f32 %v858_v18, %v859_v20 }
 0x141   :  { %v853_v23 = vrot.slane %v852_v21, 2  ;;  %v861_v24 = vrot.slane %v860_v22, 2 }
 0x143   :  { %v854_v25 = vmax.f32 %v852_v21, %v853_v23  ;;  %v862_v26 = vmax.f32 %v860_v22, %v861_v24 }
 0x145   :  { %v855_v27 = vrot.slane %v854_v25, 1  ;;  %v863_v28 = vrot.slane %v862_v26, 1 }
 0x147   :  { %v856_v29 = vmax.f32 %v854_v25, %v855_v27  ;;  %v864_v30 = vmax.f32 %v862_v26, %v863_v28 }
 0x149   :  { %v866_v31 = vsel %vm865_vm3, %v856_v29, %v864_v30 }
 0x14a   :  { %1226 = vmatmul.mubr.f32.vlgmr.msra.gmra.mrb[8].mxu1 %v866_v31 }
 0x21d   :  { %v956_v33 = vpop.f32.mrb[8].mxu1 }
 0x21e   :  { %v957_v34 = vadd.f32 %v1058_v32, %v956_v33  ;;  %v1227_v35 = vpop.f32.mrb[9].mxu1 }
 0x220   :  { %961 = vst.msk [vmem:[#allocation2] sm:$0x3] %vm960_vm4, %v957_v34 }
 0x221   :  { %1348 = shalt.err (!%p1345_p4)
}
 0x222   :  { %s1349_s19 = scalar_lea.hbm %s1706_s6, 32 }
 0x223   :  { %p1350_p5 = scmp.ne.s32.totalorder %s1706_s6, %s1349_s19  ;;  %p1353_p6 = scmp.lt.u32.totalorder %s1349_s19, %s1706_s6 }
 0x225   :  { %p1355_p7 = pnand %p1353_p6, %p1350_p5 }
 0x227   :  { %1358 = shalt.err (!%p1355_p7)
}
 0x228   :  { %971 = dma.vmem_to_hbm [thread:$0]  %s969_s15, 32, %s1706_s6, [#allocation3]  }
 0x229   :  { %1359 = dma.done.wait [#allocation3], 32  }
 0x22a   :  { %1360 = vsyncadd [#allocation3], 4294967264 }
 0x22b   :  { %975 = vsyncpa [#allocation3], 1 }

</bundles_post_ra>
